<compile_context>
chip_gen: v6e
topology: v6e:2x2x1
jax: 0.10.0
libtpu: 0.0.40
codegen_flags: <defaults>
</compile_context>

<pallas_src>
import functools
import jax
import jax.numpy as jnp
from jax.experimental import pallas as pl
from jax.experimental.pallas import tpu as pltpu

NEG_INF = -1e30
BN_EPS = 1e-5
LEAKY_SLOPE = 0.2


# ---------------------------------------------------------------------------
# In-kernel helper: one GATConv layer (multi-head, concat) + folded bias/BN.
# Column layout of xp / y (width HCP = H*C + 2H):
#   [0, H*C)        per-head feature blocks
#   [H*C, H*C+H)    spare "sum" lanes (zero in xp; carry the softmax denominator after the matmul)
#   [H*C+H, H*C+2H) per-head dst attention scores (W @ A_dst folded into W on the host)
# ---------------------------------------------------------------------------
def _gat_layer(h, adjb_ref, w_ref, asrc_ref, hmask_ref, ones_ref, scale_ref, shift_ref,
               *, n_head, hc, elt_dtype):
    h_bf = h.astype(jnp.bfloat16)
    # single MXU push: features | zero spare lanes | per-head dst scores
    xp = jnp.dot(h_bf, w_ref[...], preferred_element_type=jnp.float32)            # [NP, HCP]
    xp_bf = xp.astype(jnp.bfloat16)
    # s_src_t[h, j] = a_src_h . x'_h(j)   -- tiny [H, NP] result, row layout (no transpose needed)
    s_src_t = jax.lax.dot_general(asrc_ref[...], xp_bf, (((0,), (1,)), ((), ())),
                                  preferred_element_type=jnp.float32)             # [H, NP]

    adj_bias = adjb_ref[...]          # loaded at point of use (not pinned across layers)
    hmask = hmask_ref[...]            # [H, HCP]
    onesr = ones_ref[...]             # [H, HCP]

    y = None
    for hd in range(n_head):                                                       # static unroll
        s_dst = xp[:, hc + n_head + hd:hc + n_head + hd + 1]                       # [NP, 1]
        e = s_dst.astype(elt_dtype) + s_src_t[hd:hd + 1, :].astype(elt_dtype)      # [NP, NP]
        e = jnp.maximum(e, LEAKY_SLOPE * e)                                        # LeakyReLU(0.2)
        e = e + adj_bias                                                           # -1e30 off-edges
        e = e - jnp.max(e, axis=-1, keepdims=True)                                 # stable softmax
        p = jnp.exp(e).astype(jnp.bfloat16)                                        # masked -> 0
        # head-h feature block + a 1.0 "sum" lane; normalize AFTER the matmul (row-sum rides free)
        xph = (xp * hmask[hd:hd + 1, :] + onesr[hd:hd + 1, :]).astype(jnp.bfloat16)  # [NP, HCP]
        contrib = jnp.dot(p, xph, preferred_element_type=jnp.float32)              # [NP, HCP]
        inv = pl.reciprocal(contrib[:, hc + hd:hc + hd + 1], approx=True)          # EUP vrcp
        contrib = contrib * inv                                                    # ~20 lanes only
        y = contrib if y is None else y + contrib
    # GATConv bias + BatchNorm1d(eval) folded into a single scale/shift (zeros on the extra lanes).
    return y * scale_ref[...] + shift_ref[...]


# ---------------------------------------------------------------------------
# Fused forward kernel: 3x (GATConv + BN) -> global max||mean pool -> MLP head.
# ---------------------------------------------------------------------------
def gat_mnist_kernel(
        x_ref, adjb_ref, meanmat_ref,
        w1_ref, as1_ref, hm1_ref, on1_ref, sc1_ref, sh1_ref,
        w2_ref, as2_ref, hm2_ref, on2_ref, sc2_ref, sh2_ref,
        w3_ref, as3_ref, hm3_ref, on3_ref, sc3_ref, sh3_ref,
        mw1_ref, mt1_ref, mw2_ref, mt2_ref, mw3_ref, mb3_ref,
        out_ref, *, n_head, hc, nodes_per_graph, graphs_per_prog, elt_dtype):
    h = x_ref[...]                                                                 # [NP, F_pad]
    h = _gat_layer(h, adjb_ref, w1_ref, as1_ref, hm1_ref, on1_ref, sc1_ref, sh1_ref,
                   n_head=n_head, hc=hc, elt_dtype=elt_dtype)
    h = _gat_layer(h, adjb_ref, w2_ref, as2_ref, hm2_ref, on2_ref, sc2_ref, sh2_ref,
                   n_head=n_head, hc=hc, elt_dtype=elt_dtype)
    h = _gat_layer(h, adjb_ref, w3_ref, as3_ref, hm3_ref, on3_ref, sc3_ref, sh3_ref,
                   n_head=n_head, hc=hc, elt_dtype=elt_dtype)                      # [NP, HCP]

    # global_max_pool: contiguous per-graph node blocks -> sublane-only reshape + axis-1 max.
    hg = h.reshape(graphs_per_prog, nodes_per_graph, h.shape[-1])                  # [G, n, HCP]
    mx = jnp.max(hg, axis=1)                                                       # [G, HCP]
    # global_mean_pool: pooling matrix has 1/count pre-folded (no divide in-kernel).
    mean = jnp.dot(meanmat_ref[...].astype(jnp.bfloat16), h.astype(jnp.bfloat16),
                   preferred_element_type=jnp.float32)                             # [G, HCP]
    z = jnp.concatenate([mx, mean], axis=-1)                                       # [G, 2*HCP]

    # MLP head: Dropout = identity (eval); Linear bias + BN folded into W' / shift.
    z = jnp.maximum(jnp.dot(z.astype(jnp.bfloat16), mw1_ref[...],
                            preferred_element_type=jnp.float32) + mt1_ref[...], 0.0)
    z = jnp.maximum(jnp.dot(z.astype(jnp.bfloat16), mw2_ref[...],
                            preferred_element_type=jnp.float32) + mt2_ref[...], 0.0)
    out_ref[...] = jnp.dot(z.astype(jnp.bfloat16), mw3_ref[...],
                           preferred_element_type=jnp.float32) + mb3_ref[...]


def gat_mnist_forward(x_blk, adj_blk, mean_blk, gat_inputs, mlp_inputs,
                      *, n_head, hc, nodes_per_graph, graphs_per_prog, n_programs,
                      num_classes, elt_dtype):
    flat = [x_blk, adj_blk, mean_blk]
    for layer in gat_inputs:
        flat.extend(layer)
    flat.extend(mlp_inputs)

    kernel = functools.partial(gat_mnist_kernel, n_head=n_head, hc=hc,
                               nodes_per_graph=nodes_per_graph,
                               graphs_per_prog=graphs_per_prog, elt_dtype=elt_dtype)

    blocked_specs = [
        pl.BlockSpec((None,) + x_blk.shape[1:], lambda i: (i, 0, 0)),
        pl.BlockSpec((None,) + adj_blk.shape[1:], lambda i: (i, 0, 0)),
        pl.BlockSpec((None,) + mean_blk.shape[1:], lambda i: (i, 0, 0)),
    ]
    # weights: full-array blocks with a constant index_map -> stay resident across programs
    weight_specs = [pl.BlockSpec(a.shape, lambda i: (0, 0)) for a in flat[3:]]

    return pl.pallas_call(
        kernel,
        out_shape=jax.ShapeDtypeStruct((n_programs, graphs_per_prog, num_classes), jnp.float32),
        grid=(n_programs,),
        in_specs=blocked_specs + weight_specs,
        out_specs=pl.BlockSpec((None, graphs_per_prog, num_classes), lambda i: (i, 0, 0)),
        compiler_params=pltpu.CompilerParams(dimension_semantics=("parallel",)),
    )(*flat)


# ---------------------------------------------------------------------------
# Host-side parameter folding / packing
# ---------------------------------------------------------------------------
def fold_gat_layer(p, n_head, c_out, in_width):
    hc = n_head * c_out
    hcp = hc + 2 * n_head
    w = p["w"].astype(jnp.float32)                                   # [in_dim, hc]
    in_dim = w.shape[0]

    adst = jnp.zeros((hc, n_head), jnp.float32)
    asrc = jnp.zeros((hcp, n_head), jnp.float32)
    hmask = jnp.zeros((n_head, hcp), jnp.float32)
    onesrow = jnp.zeros((n_head, hcp), jnp.float32)
    for h in range(n_head):                                          # block-diagonal att weights
        adst = adst.at[h * c_out:(h + 1) * c_out, h].set(p["att_dst"][h])
        asrc = asrc.at[h * c_out:(h + 1) * c_out, h].set(p["att_src"][h])
        hmask = hmask.at[h, h * c_out:(h + 1) * c_out].set(1.0)
        onesrow = onesrow.at[h, hc + h].set(1.0)

    # W_aug = [ W | zero spare lanes | W @ A_dst ]  (dst scores come out of the feature matmul)
    w_aug = jnp.concatenate([w, jnp.zeros((in_dim, n_head), jnp.float32), w @ adst], axis=1)
    if in_width > in_dim:                                            # pad input rows (zeros)
        w_aug = jnp.concatenate(
            [w_aug, jnp.zeros((in_width - in_dim, hcp), jnp.float32)], axis=0)

    scale_f = p["gamma"] * jax.lax.rsqrt(p["var"] + BN_EPS)          # BN(eval) scale
    shift_f = p["beta"] + (p["bias"] - p["mean"]) * scale_f          # GAT bias + BN shift folded
    scale = jnp.zeros((1, hcp), jnp.float32).at[:, :hc].set(scale_f) # extra lanes forced to 0
    shift = jnp.zeros((1, hcp), jnp.float32).at[:, :hc].set(shift_f)
    return [w_aug.astype(jnp.bfloat16), asrc.astype(jnp.bfloat16), hmask, onesrow, scale, shift]


def fold_mlp(p, hc, hcp):
    s1 = p["g1"] * jax.lax.rsqrt(p["v1"] + BN_EPS)
    w1 = p["w1"] * s1                                                # BN scale folded into W
    t1 = p["be1"] + (p["b1"] - p["m1"]) * s1
    mh = w1.shape[1]
    # remap input rows: z = [max(width hcp) | mean(width hcp)]; extra lanes are exactly 0
    w1_aug = jnp.zeros((2 * hcp, mh), jnp.float32)
    w1_aug = w1_aug.at[0:hc, :].set(w1[0:hc, :])                     # max-pool block
    w1_aug = w1_aug.at[hcp:hcp + hc, :].set(w1[hc:2 * hc, :])        # mean-pool block

    s2 = p["g2"] * jax.lax.rsqrt(p["v2"] + BN_EPS)
    w2 = p["w2"] * s2
    t2 = p["be2"] + (p["b2"] - p["m2"]) * s2
    return [w1_aug.astype(jnp.bfloat16), t1, w2.astype(jnp.bfloat16), t2,
            p["w3"].astype(jnp.bfloat16), p["b3"]]


def init_params(key, num_features, hidden, n_head, mlp_hidden, num_classes):
    keys = iter(jax.random.split(key, 64))

    def nrm(shape, scale=0.1):
        return (scale * jax.random.normal(next(keys), shape)).astype(jnp.float32)

    gat = []
    in_dim = num_features
    for c in hidden:
        f_out = n_head * c
        gat.append(dict(
            w=nrm((in_dim, f_out)),
            att_src=nrm((n_head, c)),
            att_dst=nrm((n_head, c)),
            bias=nrm((1, f_out)),
            gamma=1.0 + nrm((1, f_out)),
            beta=nrm((1, f_out)),
            mean=jnp.zeros((1, f_out), jnp.float32),
            var=jnp.ones((1, f_out), jnp.float32),
        ))
        in_dim = f_out

    d_in = 2 * hidden[2] * n_head
    mlp = dict(
        w1=nrm((d_in, mlp_hidden)), b1=nrm((1, mlp_hidden)),
        g1=1.0 + nrm((1, mlp_hidden)), be1=nrm((1, mlp_hidden)),
        m1=jnp.zeros((1, mlp_hidden), jnp.float32), v1=jnp.ones((1, mlp_hidden), jnp.float32),
        w2=nrm((mlp_hidden, mlp_hidden)), b2=nrm((1, mlp_hidden)),
        g2=1.0 + nrm((1, mlp_hidden)), be2=nrm((1, mlp_hidden)),
        m2=jnp.zeros((1, mlp_hidden), jnp.float32), v2=jnp.ones((1, mlp_hidden), jnp.float32),
        w3=nrm((mlp_hidden, num_classes)), b3=nrm((1, num_classes)),
    )
    return dict(gat=gat, mlp=mlp)


if __name__ == "__main__":
    NUM_CLASSES = 10
    NUM_FEATURES = 3
    N_HEAD = 2
    HIDDEN = (8, 8, 8)
    MLP_HIDDEN = 128
    B = 8                          # graphs per batch
    NODES_PER_GRAPH = 16
    N = B * NODES_PER_GRAPH        # 128 nodes

    HC = N_HEAD * HIDDEN[2]        # 16
    HCP = HC + 2 * N_HEAD          # 20: features | sum lanes | folded dst-score lanes

    # per-generation choices: 2 programs (2 TCs) only on v7x; bf16 elementwise on v6e/v7x
    kind = jax.devices()[0].device_kind.lower()
    is_v7 = ("v7" in kind) or ("7x" in kind)
    is_v6 = "v6" in kind
    n_programs = 2 if (is_v7 and B % 2 == 0) else 1
    elt_dtype = jnp.bfloat16 if (is_v6 or is_v7) else jnp.float32

    nodes_per_prog = N // n_programs
    graphs_per_prog = B // n_programs

    key = jax.random.PRNGKey(0)
    k_x, k_p = jax.random.split(key)

    # node features [N, F_in], zero-padded to 8 feature lanes, blocked per program
    x = jax.random.normal(k_x, (N, NUM_FEATURES), dtype=jnp.float32)
    F_PAD = 8
    x_pad = jnp.pad(x, ((0, 0), (0, F_PAD - NUM_FEATURES)))
    x_blk = x_pad.reshape(n_programs, nodes_per_prog, F_PAD)

    # chain graph per example + self loops; adjacency bias[dst, src] = 0 if edge else -1e30
    src_list, dst_list = [], []
    for g in range(B):
        off = g * NODES_PER_GRAPH
        for i in range(NODES_PER_GRAPH):
            src_list.append(off + i); dst_list.append(off + i)          # self loop
            if i + 1 < NODES_PER_GRAPH:
                src_list.append(off + i); dst_list.append(off + i + 1)
                src_list.append(off + i + 1); dst_list.append(off + i)
    src = jnp.array(src_list, jnp.int32)
    dst = jnp.array(dst_list, jnp.int32)
    adj = jnp.zeros((N, N), jnp.float32).at[dst, src].set(1.0)
    adj_bias = jnp.where(adj > 0, 0.0, NEG_INF).astype(elt_dtype)
    # graphs are block-diagonal -> each program only needs its own diagonal adjacency block
    adj_blk = jnp.stack([adj_bias[i * nodes_per_prog:(i + 1) * nodes_per_prog,
                                  i * nodes_per_prog:(i + 1) * nodes_per_prog]
                         for i in range(n_programs)])

    # mean-pool matrix per program with 1/count pre-folded (kept f32; cast in-kernel)
    local_batch = jnp.repeat(jnp.arange(graphs_per_prog, dtype=jnp.int32), NODES_PER_GRAPH)
    onehot = (local_batch[None, :] == jnp.arange(graphs_per_prog)[:, None]).astype(jnp.float32)
    mean_local = onehot / float(NODES_PER_GRAPH)
    mean_blk = jnp.tile(mean_local[None], (n_programs, 1, 1))

    params = init_params(k_p, NUM_FEATURES, HIDDEN, N_HEAD, MLP_HIDDEN, NUM_CLASSES)
    in_widths = (F_PAD, HCP, HCP)
    gat_inputs = [fold_gat_layer(params["gat"][i], N_HEAD, HIDDEN[i], in_widths[i])
                  for i in range(3)]
    mlp_inputs = fold_mlp(params["mlp"], HC, HCP)

    out = gat_mnist_forward(x_blk, adj_blk, mean_blk, gat_inputs, mlp_inputs,
                            n_head=N_HEAD, hc=HC, nodes_per_graph=NODES_PER_GRAPH,
                            graphs_per_prog=graphs_per_prog, n_programs=n_programs,
                            num_classes=NUM_CLASSES, elt_dtype=elt_dtype)
    out = jax.block_until_ready(out).reshape(B, NUM_CLASSES)
    assert out.shape == (B, NUM_CLASSES) and out.dtype == jnp.float32
    assert bool(jnp.all(jnp.isfinite(out)))
    print("KERNEL_OK")
</pallas_src>

<mosaic_0001>
module attributes {stable_mosaic.version = 11 : i64} {
  func.func @gat_mnist_kernel(%arg0: i32, %arg1: memref<1x128x8xf32, #tpu.memory_space<vmem>>, %arg2: memref<1x128x128xf32, #tpu.memory_space<vmem>>, %arg3: memref<1x8x128xf32, #tpu.memory_space<vmem>>, %arg4: memref<8x20xbf16, #tpu.memory_space<vmem>>, %arg5: memref<20x2xbf16, #tpu.memory_space<vmem>>, %arg6: memref<2x20xf32, #tpu.memory_space<vmem>>, %arg7: memref<2x20xf32, #tpu.memory_space<vmem>>, %arg8: memref<1x20xf32, #tpu.memory_space<vmem>>, %arg9: memref<1x20xf32, #tpu.memory_space<vmem>>, %arg10: memref<20x20xbf16, #tpu.memory_space<vmem>>, %arg11: memref<20x2xbf16, #tpu.memory_space<vmem>>, %arg12: memref<2x20xf32, #tpu.memory_space<vmem>>, %arg13: memref<2x20xf32, #tpu.memory_space<vmem>>, %arg14: memref<1x20xf32, #tpu.memory_space<vmem>>, %arg15: memref<1x20xf32, #tpu.memory_space<vmem>>, %arg16: memref<20x20xbf16, #tpu.memory_space<vmem>>, %arg17: memref<20x2xbf16, #tpu.memory_space<vmem>>, %arg18: memref<2x20xf32, #tpu.memory_space<vmem>>, %arg19: memref<2x20xf32, #tpu.memory_space<vmem>>, %arg20: memref<1x20xf32, #tpu.memory_space<vmem>>, %arg21: memref<1x20xf32, #tpu.memory_space<vmem>>, %arg22: memref<40x128xbf16, #tpu.memory_space<vmem>>, %arg23: memref<1x128xf32, #tpu.memory_space<vmem>>, %arg24: memref<128x128xbf16, #tpu.memory_space<vmem>>, %arg25: memref<1x128xf32, #tpu.memory_space<vmem>>, %arg26: memref<128x10xbf16, #tpu.memory_space<vmem>>, %arg27: memref<1x10xf32, #tpu.memory_space<vmem>>, %arg28: memref<1x8x10xf32, #tpu.memory_space<vmem>>) attributes {dimension_semantics = [#tpu.dimension_semantics<parallel>], iteration_bounds = array<i64: 1>, scalar_prefetch = 0 : i64, scratch_operands = 0 : i64, tpu.core_type = #tpu.core_type<tc>, window_params = [{transform_indices = @transform_0, window_bounds = array<i64: 1, 128, 8>}, {transform_indices = @transform_1, window_bounds = array<i64: 1, 128, 128>}, {transform_indices = @transform_2, window_bounds = array<i64: 1, 8, 128>}, {pipeline_mode = #tpu.pipeline_mode<synchronous>, transform_indices = @transform_3, window_bounds = array<i64: 8, 20>}, {pipeline_mode = #tpu.pipeline_mode<synchronous>, transform_indices = @transform_4, window_bounds = array<i64: 20, 2>}, {pipeline_mode = #tpu.pipeline_mode<synchronous>, transform_indices = @transform_5, window_bounds = array<i64: 2, 20>}, {pipeline_mode = #tpu.pipeline_mode<synchronous>, transform_indices = @transform_6, window_bounds = array<i64: 2, 20>}, {pipeline_mode = #tpu.pipeline_mode<synchronous>, transform_indices = @transform_7, window_bounds = array<i64: 1, 20>}, {pipeline_mode = #tpu.pipeline_mode<synchronous>, transform_indices = @transform_8, window_bounds = array<i64: 1, 20>}, {pipeline_mode = #tpu.pipeline_mode<synchronous>, transform_indices = @transform_9, window_bounds = array<i64: 20, 20>}, {pipeline_mode = #tpu.pipeline_mode<synchronous>, transform_indices = @transform_10, window_bounds = array<i64: 20, 2>}, {pipeline_mode = #tpu.pipeline_mode<synchronous>, transform_indices = @transform_11, window_bounds = array<i64: 2, 20>}, {pipeline_mode = #tpu.pipeline_mode<synchronous>, transform_indices = @transform_12, window_bounds = array<i64: 2, 20>}, {pipeline_mode = #tpu.pipeline_mode<synchronous>, transform_indices = @transform_13, window_bounds = array<i64: 1, 20>}, {pipeline_mode = #tpu.pipeline_mode<synchronous>, transform_indices = @transform_14, window_bounds = array<i64: 1, 20>}, {pipeline_mode = #tpu.pipeline_mode<synchronous>, transform_indices = @transform_15, window_bounds = array<i64: 20, 20>}, {pipeline_mode = #tpu.pipeline_mode<synchronous>, transform_indices = @transform_16, window_bounds = array<i64: 20, 2>}, {pipeline_mode = #tpu.pipeline_mode<synchronous>, transform_indices = @transform_17, window_bounds = array<i64: 2, 20>}, {pipeline_mode = #tpu.pipeline_mode<synchronous>, transform_indices = @transform_18, window_bounds = array<i64: 2, 20>}, {pipeline_mode = #tpu.pipeline_mode<synchronous>, transform_indices = @transform_19, window_bounds = array<i64: 1, 20>}, {pipeline_mode = #tpu.pipeline_mode<synchronous>, transform_indices = @transform_20, window_bounds = array<i64: 1, 20>}, {pipeline_mode = #tpu.pipeline_mode<synchronous>, transform_indices = @transform_21, window_bounds = array<i64: 40, 128>}, {pipeline_mode = #tpu.pipeline_mode<synchronous>, transform_indices = @transform_22, window_bounds = array<i64: 1, 128>}, {pipeline_mode = #tpu.pipeline_mode<synchronous>, transform_indices = @transform_23, window_bounds = array<i64: 128, 128>}, {pipeline_mode = #tpu.pipeline_mode<synchronous>, transform_indices = @transform_24, window_bounds = array<i64: 1, 128>}, {pipeline_mode = #tpu.pipeline_mode<synchronous>, transform_indices = @transform_25, window_bounds = array<i64: 128, 10>}, {pipeline_mode = #tpu.pipeline_mode<synchronous>, transform_indices = @transform_26, window_bounds = array<i64: 1, 10>}, {transform_indices = @transform_27, window_bounds = array<i64: 1, 8, 10>}]} {
    %c0 = arith.constant 0 : index
    %c0_0 = arith.constant 0 : index
    %c0_1 = arith.constant 0 : index
    %0 = vector.load %arg1[%c0, %c0_0, %c0_1] : memref<1x128x8xf32, #tpu.memory_space<vmem>>, vector<1x128x8xf32>
    %1 = vector.shape_cast %0 : vector<1x128x8xf32> to vector<128x8xf32>
    %2 = arith.truncf %1 : vector<128x8xf32> to vector<128x8xbf16>
    %c0_2 = arith.constant 0 : index
    %c0_3 = arith.constant 0 : index
    %3 = vector.load %arg4[%c0_2, %c0_3] : memref<8x20xbf16, #tpu.memory_space<vmem>>, vector<8x20xbf16>
    %cst = arith.constant dense<0.000000e+00> : vector<128x20xf32>
    %4 = tpu.matmul %2, %3, %cst {dimension_numbers = #tpu.dot_dimension_numbers<[1], [0], [0], [1], [0, 0, 1, 1], [], []>} : vector<128x8xbf16>, vector<8x20xbf16>, vector<128x20xf32> -> vector<128x20xf32>
    %5 = arith.truncf %4 : vector<128x20xf32> to vector<128x20xbf16>
    %c0_4 = arith.constant 0 : index
    %c0_5 = arith.constant 0 : index
    %6 = vector.load %arg5[%c0_4, %c0_5] : memref<20x2xbf16, #tpu.memory_space<vmem>>, vector<20x2xbf16>
    %cst_6 = arith.constant dense<0.000000e+00> : vector<2x128xf32>
    %7 = tpu.matmul %6, %5, %cst_6 {dimension_numbers = #tpu.dot_dimension_numbers<[0], [1], [1], [0], [0, 1, 1, 0], [], []>} : vector<20x2xbf16>, vector<128x20xbf16>, vector<2x128xf32> -> vector<2x128xf32>
    %c0_7 = arith.constant 0 : index
    %c0_8 = arith.constant 0 : index
    %c0_9 = arith.constant 0 : index
    %8 = vector.load %arg2[%c0_7, %c0_8, %c0_9] : memref<1x128x128xf32, #tpu.memory_space<vmem>>, vector<1x128x128xf32>
    %9 = vector.shape_cast %8 : vector<1x128x128xf32> to vector<128x128xf32>
    %c0_10 = arith.constant 0 : index
    %c0_11 = arith.constant 0 : index
    %10 = vector.load %arg6[%c0_10, %c0_11] : memref<2x20xf32, #tpu.memory_space<vmem>>, vector<2x20xf32>
    %c0_12 = arith.constant 0 : index
    %c0_13 = arith.constant 0 : index
    %11 = vector.load %arg7[%c0_12, %c0_13] : memref<2x20xf32, #tpu.memory_space<vmem>>, vector<2x20xf32>
    %12 = vector.extract_strided_slice %4 {offsets = [0, 18], sizes = [128, 1], strides = [1, 1]} : vector<128x20xf32> to vector<128x1xf32>
    %13 = vector.extract_strided_slice %7 {offsets = [0, 0], sizes = [1, 128], strides = [1, 1]} : vector<2x128xf32> to vector<1x128xf32>
    %14 = vector.broadcast %12 : vector<128x1xf32> to vector<128x128xf32>
    %15 = vector.broadcast %13 : vector<1x128xf32> to vector<128x128xf32>
    %16 = arith.addf %14, %15 : vector<128x128xf32>
    %cst_14 = arith.constant 2.000000e-01 : f32
    %17 = vector.broadcast %cst_14 : f32 to vector<128x128xf32>
    %18 = arith.mulf %17, %16 : vector<128x128xf32>
    %19 = arith.maximumf %16, %18 : vector<128x128xf32>
    %20 = arith.addf %19, %9 : vector<128x128xf32>
    %cst_15 = arith.constant dense<0xFF800000> : vector<128xf32>
    %21 = vector.multi_reduction <maximumf>, %20, %cst_15 [1] : vector<128x128xf32> to vector<128xf32>
    %22 = vector.shape_cast %21 : vector<128xf32> to vector<128x1xf32>
    %23 = vector.broadcast %22 : vector<128x1xf32> to vector<128x128xf32>
    %24 = arith.subf %20, %23 : vector<128x128xf32>
    %25 = math.exp %24 : vector<128x128xf32>
    %26 = arith.truncf %25 : vector<128x128xf32> to vector<128x128xbf16>
    %27 = vector.extract_strided_slice %10 {offsets = [0, 0], sizes = [1, 20], strides = [1, 1]} : vector<2x20xf32> to vector<1x20xf32>
    %28 = vector.broadcast %27 : vector<1x20xf32> to vector<128x20xf32>
    %29 = arith.mulf %4, %28 : vector<128x20xf32>
    %30 = vector.extract_strided_slice %11 {offsets = [0, 0], sizes = [1, 20], strides = [1, 1]} : vector<2x20xf32> to vector<1x20xf32>
    %31 = vector.broadcast %30 : vector<1x20xf32> to vector<128x20xf32>
    %32 = arith.addf %29, %31 : vector<128x20xf32>
    %33 = arith.truncf %32 : vector<128x20xf32> to vector<128x20xbf16>
    %cst_16 = arith.constant dense<0.000000e+00> : vector<128x20xf32>
    %34 = tpu.matmul %26, %33, %cst_16 {dimension_numbers = #tpu.dot_dimension_numbers<[1], [0], [0], [1], [0, 0, 1, 1], [], []>} : vector<128x128xbf16>, vector<128x20xbf16>, vector<128x20xf32> -> vector<128x20xf32>
    %35 = vector.extract_strided_slice %34 {offsets = [0, 16], sizes = [128, 1], strides = [1, 1]} : vector<128x20xf32> to vector<128x1xf32>
    %36 = tpu.reciprocal %35 {approx = true} : vector<128x1xf32> -> vector<128x1xf32>
    %37 = vector.broadcast %36 : vector<128x1xf32> to vector<128x20xf32>
    %38 = arith.mulf %34, %37 : vector<128x20xf32>
    %39 = vector.extract_strided_slice %4 {offsets = [0, 19], sizes = [128, 1], strides = [1, 1]} : vector<128x20xf32> to vector<128x1xf32>
    %40 = vector.extract_strided_slice %7 {offsets = [1, 0], sizes = [1, 128], strides = [1, 1]} : vector<2x128xf32> to vector<1x128xf32>
    %41 = vector.broadcast %39 : vector<128x1xf32> to vector<128x128xf32>
    %42 = vector.broadcast %40 : vector<1x128xf32> to vector<128x128xf32>
    %43 = arith.addf %41, %42 : vector<128x128xf32>
    %cst_17 = arith.constant 2.000000e-01 : f32
    %44 = vector.broadcast %cst_17 : f32 to vector<128x128xf32>
    %45 = arith.mulf %44, %43 : vector<128x128xf32>
    %46 = arith.maximumf %43, %45 : vector<128x128xf32>
    %47 = arith.addf %46, %9 : vector<128x128xf32>
    %cst_18 = arith.constant dense<0xFF800000> : vector<128xf32>
    %48 = vector.multi_reduction <maximumf>, %47, %cst_18 [1] : vector<128x128xf32> to vector<128xf32>
    %49 = vector.shape_cast %48 : vector<128xf32> to vector<128x1xf32>
    %50 = vector.broadcast %49 : vector<128x1xf32> to vector<128x128xf32>
    %51 = arith.subf %47, %50 : vector<128x128xf32>
    %52 = math.exp %51 : vector<128x128xf32>
    %53 = arith.truncf %52 : vector<128x128xf32> to vector<128x128xbf16>
    %54 = vector.extract_strided_slice %10 {offsets = [1, 0], sizes = [1, 20], strides = [1, 1]} : vector<2x20xf32> to vector<1x20xf32>
    %55 = vector.broadcast %54 : vector<1x20xf32> to vector<128x20xf32>
    %56 = arith.mulf %4, %55 : vector<128x20xf32>
    %57 = vector.extract_strided_slice %11 {offsets = [1, 0], sizes = [1, 20], strides = [1, 1]} : vector<2x20xf32> to vector<1x20xf32>
    %58 = vector.broadcast %57 : vector<1x20xf32> to vector<128x20xf32>
    %59 = arith.addf %56, %58 : vector<128x20xf32>
    %60 = arith.truncf %59 : vector<128x20xf32> to vector<128x20xbf16>
    %cst_19 = arith.constant dense<0.000000e+00> : vector<128x20xf32>
    %61 = tpu.matmul %53, %60, %cst_19 {dimension_numbers = #tpu.dot_dimension_numbers<[1], [0], [0], [1], [0, 0, 1, 1], [], []>} : vector<128x128xbf16>, vector<128x20xbf16>, vector<128x20xf32> -> vector<128x20xf32>
    %62 = vector.extract_strided_slice %61 {offsets = [0, 17], sizes = [128, 1], strides = [1, 1]} : vector<128x20xf32> to vector<128x1xf32>
    %63 = tpu.reciprocal %62 {approx = true} : vector<128x1xf32> -> vector<128x1xf32>
    %64 = vector.broadcast %63 : vector<128x1xf32> to vector<128x20xf32>
    %65 = arith.mulf %61, %64 : vector<128x20xf32>
    %66 = arith.addf %38, %65 : vector<128x20xf32>
    %c0_20 = arith.constant 0 : index
    %c0_21 = arith.constant 0 : index
    %67 = vector.load %arg8[%c0_20, %c0_21] : memref<1x20xf32, #tpu.memory_space<vmem>>, vector<1x20xf32>
    %68 = vector.broadcast %67 : vector<1x20xf32> to vector<128x20xf32>
    %69 = arith.mulf %66, %68 : vector<128x20xf32>
    %c0_22 = arith.constant 0 : index
    %c0_23 = arith.constant 0 : index
    %70 = vector.load %arg9[%c0_22, %c0_23] : memref<1x20xf32, #tpu.memory_space<vmem>>, vector<1x20xf32>
    %71 = vector.broadcast %70 : vector<1x20xf32> to vector<128x20xf32>
    %72 = arith.addf %69, %71 : vector<128x20xf32>
    %73 = arith.truncf %72 : vector<128x20xf32> to vector<128x20xbf16>
    %c0_24 = arith.constant 0 : index
    %c0_25 = arith.constant 0 : index
    %74 = vector.load %arg10[%c0_24, %c0_25] : memref<20x20xbf16, #tpu.memory_space<vmem>>, vector<20x20xbf16>
    %cst_26 = arith.constant dense<0.000000e+00> : vector<128x20xf32>
    %75 = tpu.matmul %73, %74, %cst_26 {dimension_numbers = #tpu.dot_dimension_numbers<[1], [0], [0], [1], [0, 0, 1, 1], [], []>} : vector<128x20xbf16>, vector<20x20xbf16>, vector<128x20xf32> -> vector<128x20xf32>
    %76 = arith.truncf %75 : vector<128x20xf32> to vector<128x20xbf16>
    %c0_27 = arith.constant 0 : index
    %c0_28 = arith.constant 0 : index
    %77 = vector.load %arg11[%c0_27, %c0_28] : memref<20x2xbf16, #tpu.memory_space<vmem>>, vector<20x2xbf16>
    %cst_29 = arith.constant dense<0.000000e+00> : vector<2x128xf32>
    %78 = tpu.matmul %77, %76, %cst_29 {dimension_numbers = #tpu.dot_dimension_numbers<[0], [1], [1], [0], [0, 1, 1, 0], [], []>} : vector<20x2xbf16>, vector<128x20xbf16>, vector<2x128xf32> -> vector<2x128xf32>
    %c0_30 = arith.constant 0 : index
    %c0_31 = arith.constant 0 : index
    %c0_32 = arith.constant 0 : index
    %79 = vector.load %arg2[%c0_30, %c0_31, %c0_32] : memref<1x128x128xf32, #tpu.memory_space<vmem>>, vector<1x128x128xf32>
    %80 = vector.shape_cast %79 : vector<1x128x128xf32> to vector<128x128xf32>
    %c0_33 = arith.constant 0 : index
    %c0_34 = arith.constant 0 : index
    %81 = vector.load %arg12[%c0_33, %c0_34] : memref<2x20xf32, #tpu.memory_space<vmem>>, vector<2x20xf32>
    %c0_35 = arith.constant 0 : index
    %c0_36 = arith.constant 0 : index
    %82 = vector.load %arg13[%c0_35, %c0_36] : memref<2x20xf32, #tpu.memory_space<vmem>>, vector<2x20xf32>
    %83 = vector.extract_strided_slice %75 {offsets = [0, 18], sizes = [128, 1], strides = [1, 1]} : vector<128x20xf32> to vector<128x1xf32>
    %84 = vector.extract_strided_slice %78 {offsets = [0, 0], sizes = [1, 128], strides = [1, 1]} : vector<2x128xf32> to vector<1x128xf32>
    %85 = vector.broadcast %83 : vector<128x1xf32> to vector<128x128xf32>
    %86 = vector.broadcast %84 : vector<1x128xf32> to vector<128x128xf32>
    %87 = arith.addf %85, %86 : vector<128x128xf32>
    %cst_37 = arith.constant 2.000000e-01 : f32
    %88 = vector.broadcast %cst_37 : f32 to vector<128x128xf32>
    %89 = arith.mulf %88, %87 : vector<128x128xf32>
    %90 = arith.maximumf %87, %89 : vector<128x128xf32>
    %91 = arith.addf %90, %80 : vector<128x128xf32>
    %cst_38 = arith.constant dense<0xFF800000> : vector<128xf32>
    %92 = vector.multi_reduction <maximumf>, %91, %cst_38 [1] : vector<128x128xf32> to vector<128xf32>
    %93 = vector.shape_cast %92 : vector<128xf32> to vector<128x1xf32>
    %94 = vector.broadcast %93 : vector<128x1xf32> to vector<128x128xf32>
    %95 = arith.subf %91, %94 : vector<128x128xf32>
    %96 = math.exp %95 : vector<128x128xf32>
    %97 = arith.truncf %96 : vector<128x128xf32> to vector<128x128xbf16>
    %98 = vector.extract_strided_slice %81 {offsets = [0, 0], sizes = [1, 20], strides = [1, 1]} : vector<2x20xf32> to vector<1x20xf32>
    %99 = vector.broadcast %98 : vector<1x20xf32> to vector<128x20xf32>
    %100 = arith.mulf %75, %99 : vector<128x20xf32>
    %101 = vector.extract_strided_slice %82 {offsets = [0, 0], sizes = [1, 20], strides = [1, 1]} : vector<2x20xf32> to vector<1x20xf32>
    %102 = vector.broadcast %101 : vector<1x20xf32> to vector<128x20xf32>
    %103 = arith.addf %100, %102 : vector<128x20xf32>
    %104 = arith.truncf %103 : vector<128x20xf32> to vector<128x20xbf16>
    %cst_39 = arith.constant dense<0.000000e+00> : vector<128x20xf32>
    %105 = tpu.matmul %97, %104, %cst_39 {dimension_numbers = #tpu.dot_dimension_numbers<[1], [0], [0], [1], [0, 0, 1, 1], [], []>} : vector<128x128xbf16>, vector<128x20xbf16>, vector<128x20xf32> -> vector<128x20xf32>
    %106 = vector.extract_strided_slice %105 {offsets = [0, 16], sizes = [128, 1], strides = [1, 1]} : vector<128x20xf32> to vector<128x1xf32>
    %107 = tpu.reciprocal %106 {approx = true} : vector<128x1xf32> -> vector<128x1xf32>
    %108 = vector.broadcast %107 : vector<128x1xf32> to vector<128x20xf32>
    %109 = arith.mulf %105, %108 : vector<128x20xf32>
    %110 = vector.extract_strided_slice %75 {offsets = [0, 19], sizes = [128, 1], strides = [1, 1]} : vector<128x20xf32> to vector<128x1xf32>
    %111 = vector.extract_strided_slice %78 {offsets = [1, 0], sizes = [1, 128], strides = [1, 1]} : vector<2x128xf32> to vector<1x128xf32>
    %112 = vector.broadcast %110 : vector<128x1xf32> to vector<128x128xf32>
    %113 = vector.broadcast %111 : vector<1x128xf32> to vector<128x128xf32>
    %114 = arith.addf %112, %113 : vector<128x128xf32>
    %cst_40 = arith.constant 2.000000e-01 : f32
    %115 = vector.broadcast %cst_40 : f32 to vector<128x128xf32>
    %116 = arith.mulf %115, %114 : vector<128x128xf32>
    %117 = arith.maximumf %114, %116 : vector<128x128xf32>
    %118 = arith.addf %117, %80 : vector<128x128xf32>
    %cst_41 = arith.constant dense<0xFF800000> : vector<128xf32>
    %119 = vector.multi_reduction <maximumf>, %118, %cst_41 [1] : vector<128x128xf32> to vector<128xf32>
    %120 = vector.shape_cast %119 : vector<128xf32> to vector<128x1xf32>
    %121 = vector.broadcast %120 : vector<128x1xf32> to vector<128x128xf32>
    %122 = arith.subf %118, %121 : vector<128x128xf32>
    %123 = math.exp %122 : vector<128x128xf32>
    %124 = arith.truncf %123 : vector<128x128xf32> to vector<128x128xbf16>
    %125 = vector.extract_strided_slice %81 {offsets = [1, 0], sizes = [1, 20], strides = [1, 1]} : vector<2x20xf32> to vector<1x20xf32>
    %126 = vector.broadcast %125 : vector<1x20xf32> to vector<128x20xf32>
    %127 = arith.mulf %75, %126 : vector<128x20xf32>
    %128 = vector.extract_strided_slice %82 {offsets = [1, 0], sizes = [1, 20], strides = [1, 1]} : vector<2x20xf32> to vector<1x20xf32>
    %129 = vector.broadcast %128 : vector<1x20xf32> to vector<128x20xf32>
    %130 = arith.addf %127, %129 : vector<128x20xf32>
    %131 = arith.truncf %130 : vector<128x20xf32> to vector<128x20xbf16>
    %cst_42 = arith.constant dense<0.000000e+00> : vector<128x20xf32>
    %132 = tpu.matmul %124, %131, %cst_42 {dimension_numbers = #tpu.dot_dimension_numbers<[1], [0], [0], [1], [0, 0, 1, 1], [], []>} : vector<128x128xbf16>, vector<128x20xbf16>, vector<128x20xf32> -> vector<128x20xf32>
    %133 = vector.extract_strided_slice %132 {offsets = [0, 17], sizes = [128, 1], strides = [1, 1]} : vector<128x20xf32> to vector<128x1xf32>
    %134 = tpu.reciprocal %133 {approx = true} : vector<128x1xf32> -> vector<128x1xf32>
    %135 = vector.broadcast %134 : vector<128x1xf32> to vector<128x20xf32>
    %136 = arith.mulf %132, %135 : vector<128x20xf32>
    %137 = arith.addf %109, %136 : vector<128x20xf32>
    %c0_43 = arith.constant 0 : index
    %c0_44 = arith.constant 0 : index
    %138 = vector.load %arg14[%c0_43, %c0_44] : memref<1x20xf32, #tpu.memory_space<vmem>>, vector<1x20xf32>
    %139 = vector.broadcast %138 : vector<1x20xf32> to vector<128x20xf32>
    %140 = arith.mulf %137, %139 : vector<128x20xf32>
    %c0_45 = arith.constant 0 : index
    %c0_46 = arith.constant 0 : index
    %141 = vector.load %arg15[%c0_45, %c0_46] : memref<1x20xf32, #tpu.memory_space<vmem>>, vector<1x20xf32>
    %142 = vector.broadcast %141 : vector<1x20xf32> to vector<128x20xf32>
    %143 = arith.addf %140, %142 : vector<128x20xf32>
    %144 = arith.truncf %143 : vector<128x20xf32> to vector<128x20xbf16>
    %c0_47 = arith.constant 0 : index
    %c0_48 = arith.constant 0 : index
    %145 = vector.load %arg16[%c0_47, %c0_48] : memref<20x20xbf16, #tpu.memory_space<vmem>>, vector<20x20xbf16>
    %cst_49 = arith.constant dense<0.000000e+00> : vector<128x20xf32>
    %146 = tpu.matmul %144, %145, %cst_49 {dimension_numbers = #tpu.dot_dimension_numbers<[1], [0], [0], [1], [0, 0, 1, 1], [], []>} : vector<128x20xbf16>, vector<20x20xbf16>, vector<128x20xf32> -> vector<128x20xf32>
    %147 = arith.truncf %146 : vector<128x20xf32> to vector<128x20xbf16>
    %c0_50 = arith.constant 0 : index
    %c0_51 = arith.constant 0 : index
    %148 = vector.load %arg17[%c0_50, %c0_51] : memref<20x2xbf16, #tpu.memory_space<vmem>>, vector<20x2xbf16>
    %cst_52 = arith.constant dense<0.000000e+00> : vector<2x128xf32>
    %149 = tpu.matmul %148, %147, %cst_52 {dimension_numbers = #tpu.dot_dimension_numbers<[0], [1], [1], [0], [0, 1, 1, 0], [], []>} : vector<20x2xbf16>, vector<128x20xbf16>, vector<2x128xf32> -> vector<2x128xf32>
    %c0_53 = arith.constant 0 : index
    %c0_54 = arith.constant 0 : index
    %c0_55 = arith.constant 0 : index
    %150 = vector.load %arg2[%c0_53, %c0_54, %c0_55] : memref<1x128x128xf32, #tpu.memory_space<vmem>>, vector<1x128x128xf32>
    %151 = vector.shape_cast %150 : vector<1x128x128xf32> to vector<128x128xf32>
    %c0_56 = arith.constant 0 : index
    %c0_57 = arith.constant 0 : index
    %152 = vector.load %arg18[%c0_56, %c0_57] : memref<2x20xf32, #tpu.memory_space<vmem>>, vector<2x20xf32>
    %c0_58 = arith.constant 0 : index
    %c0_59 = arith.constant 0 : index
    %153 = vector.load %arg19[%c0_58, %c0_59] : memref<2x20xf32, #tpu.memory_space<vmem>>, vector<2x20xf32>
    %154 = vector.extract_strided_slice %146 {offsets = [0, 18], sizes = [128, 1], strides = [1, 1]} : vector<128x20xf32> to vector<128x1xf32>
    %155 = vector.extract_strided_slice %149 {offsets = [0, 0], sizes = [1, 128], strides = [1, 1]} : vector<2x128xf32> to vector<1x128xf32>
    %156 = vector.broadcast %154 : vector<128x1xf32> to vector<128x128xf32>
    %157 = vector.broadcast %155 : vector<1x128xf32> to vector<128x128xf32>
    %158 = arith.addf %156, %157 : vector<128x128xf32>
    %cst_60 = arith.constant 2.000000e-01 : f32
    %159 = vector.broadcast %cst_60 : f32 to vector<128x128xf32>
    %160 = arith.mulf %159, %158 : vector<128x128xf32>
    %161 = arith.maximumf %158, %160 : vector<128x128xf32>
    %162 = arith.addf %161, %151 : vector<128x128xf32>
    %cst_61 = arith.constant dense<0xFF800000> : vector<128xf32>
    %163 = vector.multi_reduction <maximumf>, %162, %cst_61 [1] : vector<128x128xf32> to vector<128xf32>
    %164 = vector.shape_cast %163 : vector<128xf32> to vector<128x1xf32>
    %165 = vector.broadcast %164 : vector<128x1xf32> to vector<128x128xf32>
    %166 = arith.subf %162, %165 : vector<128x128xf32>
    %167 = math.exp %166 : vector<128x128xf32>
    %168 = arith.truncf %167 : vector<128x128xf32> to vector<128x128xbf16>
    %169 = vector.extract_strided_slice %152 {offsets = [0, 0], sizes = [1, 20], strides = [1, 1]} : vector<2x20xf32> to vector<1x20xf32>
    %170 = vector.broadcast %169 : vector<1x20xf32> to vector<128x20xf32>
    %171 = arith.mulf %146, %170 : vector<128x20xf32>
    %172 = vector.extract_strided_slice %153 {offsets = [0, 0], sizes = [1, 20], strides = [1, 1]} : vector<2x20xf32> to vector<1x20xf32>
    %173 = vector.broadcast %172 : vector<1x20xf32> to vector<128x20xf32>
    %174 = arith.addf %171, %173 : vector<128x20xf32>
    %175 = arith.truncf %174 : vector<128x20xf32> to vector<128x20xbf16>
    %cst_62 = arith.constant dense<0.000000e+00> : vector<128x20xf32>
    %176 = tpu.matmul %168, %175, %cst_62 {dimension_numbers = #tpu.dot_dimension_numbers<[1], [0], [0], [1], [0, 0, 1, 1], [], []>} : vector<128x128xbf16>, vector<128x20xbf16>, vector<128x20xf32> -> vector<128x20xf32>
    %177 = vector.extract_strided_slice %176 {offsets = [0, 16], sizes = [128, 1], strides = [1, 1]} : vector<128x20xf32> to vector<128x1xf32>
    %178 = tpu.reciprocal %177 {approx = true} : vector<128x1xf32> -> vector<128x1xf32>
    %179 = vector.broadcast %178 : vector<128x1xf32> to vector<128x20xf32>
    %180 = arith.mulf %176, %179 : vector<128x20xf32>
    %181 = vector.extract_strided_slice %146 {offsets = [0, 19], sizes = [128, 1], strides = [1, 1]} : vector<128x20xf32> to vector<128x1xf32>
    %182 = vector.extract_strided_slice %149 {offsets = [1, 0], sizes = [1, 128], strides = [1, 1]} : vector<2x128xf32> to vector<1x128xf32>
    %183 = vector.broadcast %181 : vector<128x1xf32> to vector<128x128xf32>
    %184 = vector.broadcast %182 : vector<1x128xf32> to vector<128x128xf32>
    %185 = arith.addf %183, %184 : vector<128x128xf32>
    %cst_63 = arith.constant 2.000000e-01 : f32
    %186 = vector.broadcast %cst_63 : f32 to vector<128x128xf32>
    %187 = arith.mulf %186, %185 : vector<128x128xf32>
    %188 = arith.maximumf %185, %187 : vector<128x128xf32>
    %189 = arith.addf %188, %151 : vector<128x128xf32>
    %cst_64 = arith.constant dense<0xFF800000> : vector<128xf32>
    %190 = vector.multi_reduction <maximumf>, %189, %cst_64 [1] : vector<128x128xf32> to vector<128xf32>
    %191 = vector.shape_cast %190 : vector<128xf32> to vector<128x1xf32>
    %192 = vector.broadcast %191 : vector<128x1xf32> to vector<128x128xf32>
    %193 = arith.subf %189, %192 : vector<128x128xf32>
    %194 = math.exp %193 : vector<128x128xf32>
    %195 = arith.truncf %194 : vector<128x128xf32> to vector<128x128xbf16>
    %196 = vector.extract_strided_slice %152 {offsets = [1, 0], sizes = [1, 20], strides = [1, 1]} : vector<2x20xf32> to vector<1x20xf32>
    %197 = vector.broadcast %196 : vector<1x20xf32> to vector<128x20xf32>
    %198 = arith.mulf %146, %197 : vector<128x20xf32>
    %199 = vector.extract_strided_slice %153 {offsets = [1, 0], sizes = [1, 20], strides = [1, 1]} : vector<2x20xf32> to vector<1x20xf32>
    %200 = vector.broadcast %199 : vector<1x20xf32> to vector<128x20xf32>
    %201 = arith.addf %198, %200 : vector<128x20xf32>
    %202 = arith.truncf %201 : vector<128x20xf32> to vector<128x20xbf16>
    %cst_65 = arith.constant dense<0.000000e+00> : vector<128x20xf32>
    %203 = tpu.matmul %195, %202, %cst_65 {dimension_numbers = #tpu.dot_dimension_numbers<[1], [0], [0], [1], [0, 0, 1, 1], [], []>} : vector<128x128xbf16>, vector<128x20xbf16>, vector<128x20xf32> -> vector<128x20xf32>
    %204 = vector.extract_strided_slice %203 {offsets = [0, 17], sizes = [128, 1], strides = [1, 1]} : vector<128x20xf32> to vector<128x1xf32>
    %205 = tpu.reciprocal %204 {approx = true} : vector<128x1xf32> -> vector<128x1xf32>
    %206 = vector.broadcast %205 : vector<128x1xf32> to vector<128x20xf32>
    %207 = arith.mulf %203, %206 : vector<128x20xf32>
    %208 = arith.addf %180, %207 : vector<128x20xf32>
    %c0_66 = arith.constant 0 : index
    %c0_67 = arith.constant 0 : index
    %209 = vector.load %arg20[%c0_66, %c0_67] : memref<1x20xf32, #tpu.memory_space<vmem>>, vector<1x20xf32>
    %210 = vector.broadcast %209 : vector<1x20xf32> to vector<128x20xf32>
    %211 = arith.mulf %208, %210 : vector<128x20xf32>
    %c0_68 = arith.constant 0 : index
    %c0_69 = arith.constant 0 : index
    %212 = vector.load %arg21[%c0_68, %c0_69] : memref<1x20xf32, #tpu.memory_space<vmem>>, vector<1x20xf32>
    %213 = vector.broadcast %212 : vector<1x20xf32> to vector<128x20xf32>
    %214 = arith.addf %211, %213 : vector<128x20xf32>
    %215 = vector.shape_cast %214 : vector<128x20xf32> to vector<8x16x20xf32>
    %cst_70 = arith.constant dense<0xFF800000> : vector<8x20xf32>
    %216 = vector.multi_reduction <maximumf>, %215, %cst_70 [1] : vector<8x16x20xf32> to vector<8x20xf32>
    %c0_71 = arith.constant 0 : index
    %c0_72 = arith.constant 0 : index
    %c0_73 = arith.constant 0 : index
    %217 = vector.load %arg3[%c0_71, %c0_72, %c0_73] : memref<1x8x128xf32, #tpu.memory_space<vmem>>, vector<1x8x128xf32>
    %218 = vector.shape_cast %217 : vector<1x8x128xf32> to vector<8x128xf32>
    %219 = arith.truncf %218 : vector<8x128xf32> to vector<8x128xbf16>
    %220 = arith.truncf %214 : vector<128x20xf32> to vector<128x20xbf16>
    %cst_74 = arith.constant dense<0.000000e+00> : vector<8x20xf32>
    %221 = tpu.matmul %219, %220, %cst_74 {dimension_numbers = #tpu.dot_dimension_numbers<[1], [0], [0], [1], [0, 0, 1, 1], [], []>} : vector<8x128xbf16>, vector<128x20xbf16>, vector<8x20xf32> -> vector<8x20xf32>
    %222 = tpu.concatenate %216, %221 in 1 : vector<8x20xf32>, vector<8x20xf32> -> vector<8x40xf32>
    %223 = arith.truncf %222 : vector<8x40xf32> to vector<8x40xbf16>
    %c0_75 = arith.constant 0 : index
    %c0_76 = arith.constant 0 : index
    %224 = vector.load %arg22[%c0_75, %c0_76] : memref<40x128xbf16, #tpu.memory_space<vmem>>, vector<40x128xbf16>
    %cst_77 = arith.constant dense<0.000000e+00> : vector<8x128xf32>
    %225 = tpu.matmul %223, %224, %cst_77 {dimension_numbers = #tpu.dot_dimension_numbers<[1], [0], [0], [1], [0, 0, 1, 1], [], []>} : vector<8x40xbf16>, vector<40x128xbf16>, vector<8x128xf32> -> vector<8x128xf32>
    %c0_78 = arith.constant 0 : index
    %c0_79 = arith.constant 0 : index
    %226 = vector.load %arg23[%c0_78, %c0_79] : memref<1x128xf32, #tpu.memory_space<vmem>>, vector<1x128xf32>
    %227 = vector.broadcast %226 : vector<1x128xf32> to vector<8x128xf32>
    %228 = arith.addf %225, %227 : vector<8x128xf32>
    %cst_80 = arith.constant 0.000000e+00 : f32
    %229 = vector.broadcast %cst_80 : f32 to vector<8x128xf32>
    %230 = arith.maximumf %228, %229 : vector<8x128xf32>
    %231 = arith.truncf %230 : vector<8x128xf32> to vector<8x128xbf16>
    %c0_81 = arith.constant 0 : index
    %c0_82 = arith.constant 0 : index
    %232 = vector.load %arg24[%c0_81, %c0_82] : memref<128x128xbf16, #tpu.memory_space<vmem>>, vector<128x128xbf16>
    %cst_83 = arith.constant dense<0.000000e+00> : vector<8x128xf32>
    %233 = tpu.matmul %231, %232, %cst_83 {dimension_numbers = #tpu.dot_dimension_numbers<[1], [0], [0], [1], [0, 0, 1, 1], [], []>} : vector<8x128xbf16>, vector<128x128xbf16>, vector<8x128xf32> -> vector<8x128xf32>
    %c0_84 = arith.constant 0 : index
    %c0_85 = arith.constant 0 : index
    %234 = vector.load %arg25[%c0_84, %c0_85] : memref<1x128xf32, #tpu.memory_space<vmem>>, vector<1x128xf32>
    %235 = vector.broadcast %234 : vector<1x128xf32> to vector<8x128xf32>
    %236 = arith.addf %233, %235 : vector<8x128xf32>
    %cst_86 = arith.constant 0.000000e+00 : f32
    %237 = vector.broadcast %cst_86 : f32 to vector<8x128xf32>
    %238 = arith.maximumf %236, %237 : vector<8x128xf32>
    %239 = arith.truncf %238 : vector<8x128xf32> to vector<8x128xbf16>
    %c0_87 = arith.constant 0 : index
    %c0_88 = arith.constant 0 : index
    %240 = vector.load %arg26[%c0_87, %c0_88] : memref<128x10xbf16, #tpu.memory_space<vmem>>, vector<128x10xbf16>
    %cst_89 = arith.constant dense<0.000000e+00> : vector<8x10xf32>
    %241 = tpu.matmul %239, %240, %cst_89 {dimension_numbers = #tpu.dot_dimension_numbers<[1], [0], [0], [1], [0, 0, 1, 1], [], []>} : vector<8x128xbf16>, vector<128x10xbf16>, vector<8x10xf32> -> vector<8x10xf32>
    %c0_90 = arith.constant 0 : index
    %c0_91 = arith.constant 0 : index
    %242 = vector.load %arg27[%c0_90, %c0_91] : memref<1x10xf32, #tpu.memory_space<vmem>>, vector<1x10xf32>
    %243 = vector.broadcast %242 : vector<1x10xf32> to vector<8x10xf32>
    %244 = arith.addf %241, %243 : vector<8x10xf32>
    %c0_92 = arith.constant 0 : index
    %c0_93 = arith.constant 0 : index
    %c0_94 = arith.constant 0 : index
    %245 = vector.load %arg28[%c0_92, %c0_93, %c0_94] : memref<1x8x10xf32, #tpu.memory_space<vmem>>, vector<1x8x10xf32>
    %246 = vector.shape_cast %245 : vector<1x8x10xf32> to vector<8x10xf32>
    %247 = vector.shape_cast %244 : vector<8x10xf32> to vector<1x8x10xf32>
    tpu.vector_store %arg28[%c0_92, %c0_93, %c0_94], %247 {strides = array<i32>} : memref<1x8x10xf32, #tpu.memory_space<vmem>>, vector<1x8x10xf32>,
    return
  }
  func.func @transform_0(%arg0: i32) -> (i32, i32, i32) {
    %c0_i32 = arith.constant 0 : i32
    %c0_i32_0 = arith.constant 0 : i32
    %c0_i32_1 = arith.constant 0 : i32
    return %arg0, %c0_i32, %c0_i32_0 : i32, i32, i32
  }
  func.func @transform_1(%arg0: i32) -> (i32, i32, i32) {
    %c0_i32 = arith.constant 0 : i32
    %c0_i32_0 = arith.constant 0 : i32
    %c0_i32_1 = arith.constant 0 : i32
    return %arg0, %c0_i32, %c0_i32_0 : i32, i32, i32
  }
  func.func @transform_2(%arg0: i32) -> (i32, i32, i32) {
    %c0_i32 = arith.constant 0 : i32
    %c0_i32_0 = arith.constant 0 : i32
    %c0_i32_1 = arith.constant 0 : i32
    return %arg0, %c0_i32, %c0_i32_0 : i32, i32, i32
  }
  func.func @transform_3(%arg0: i32) -> (i32, i32) {
    %c0_i32 = arith.constant 0 : i32
    %c0_i32_0 = arith.constant 0 : i32
    %c0_i32_1 = arith.constant 0 : i32
    return %c0_i32, %c0_i32_0 : i32, i32
  }
  func.func @transform_4(%arg0: i32) -> (i32, i32) {
    %c0_i32 = arith.constant 0 : i32
    %c0_i32_0 = arith.constant 0 : i32
    %c0_i32_1 = arith.constant 0 : i32
    return %c0_i32, %c0_i32_0 : i32, i32
  }
  func.func @transform_5(%arg0: i32) -> (i32, i32) {
    %c0_i32 = arith.constant 0 : i32
    %c0_i32_0 = arith.constant 0 : i32
    %c0_i32_1 = arith.constant 0 : i32
    return %c0_i32, %c0_i32_0 : i32, i32
  }
  func.func @transform_6(%arg0: i32) -> (i32, i32) {
    %c0_i32 = arith.constant 0 : i32
    %c0_i32_0 = arith.constant 0 : i32
    %c0_i32_1 = arith.constant 0 : i32
    return %c0_i32, %c0_i32_0 : i32, i32
  }
  func.func @transform_7(%arg0: i32) -> (i32, i32) {
    %c0_i32 = arith.constant 0 : i32
    %c0_i32_0 = arith.constant 0 : i32
    %c0_i32_1 = arith.constant 0 : i32
    return %c0_i32, %c0_i32_0 : i32, i32
  }
  func.func @transform_8(%arg0: i32) -> (i32, i32) {
    %c0_i32 = arith.constant 0 : i32
    %c0_i32_0 = arith.constant 0 : i32
    %c0_i32_1 = arith.constant 0 : i32
    return %c0_i32, %c0_i32_0 : i32, i32
  }
  func.func @transform_9(%arg0: i32) -> (i32, i32) {
    %c0_i32 = arith.constant 0 : i32
    %c0_i32_0 = arith.constant 0 : i32
    %c0_i32_1 = arith.constant 0 : i32
    return %c0_i32, %c0_i32_0 : i32, i32
  }
  func.func @transform_10(%arg0: i32) -> (i32, i32) {
    %c0_i32 = arith.constant 0 : i32
    %c0_i32_0 = arith.constant 0 : i32
    %c0_i32_1 = arith.constant 0 : i32
    return %c0_i32, %c0_i32_0 : i32, i32
  }
  func.func @transform_11(%arg0: i32) -> (i32, i32) {
    %c0_i32 = arith.constant 0 : i32
    %c0_i32_0 = arith.constant 0 : i32
    %c0_i32_1 = arith.constant 0 : i32
    return %c0_i32, %c0_i32_0 : i32, i32
  }
  func.func @transform_12(%arg0: i32) -> (i32, i32) {
    %c0_i32 = arith.constant 0 : i32
    %c0_i32_0 = arith.constant 0 : i32
    %c0_i32_1 = arith.constant 0 : i32
    return %c0_i32, %c0_i32_0 : i32, i32
  }
  func.func @transform_13(%arg0: i32) -> (i32, i32) {
    %c0_i32 = arith.constant 0 : i32
    %c0_i32_0 = arith.constant 0 : i32
    %c0_i32_1 = arith.constant 0 : i32
    return %c0_i32, %c0_i32_0 : i32, i32
  }
  func.func @transform_14(%arg0: i32) -> (i32, i32) {
    %c0_i32 = arith.constant 0 : i32
    %c0_i32_0 = arith.constant 0 : i32
    %c0_i32_1 = arith.constant 0 : i32
    return %c0_i32, %c0_i32_0 : i32, i32
  }
  func.func @transform_15(%arg0: i32) -> (i32, i32) {
    %c0_i32 = arith.constant 0 : i32
    %c0_i32_0 = arith.constant 0 : i32
    %c0_i32_1 = arith.constant 0 : i32
    return %c0_i32, %c0_i32_0 : i32, i32
  }
  func.func @transform_16(%arg0: i32) -> (i32, i32) {
    %c0_i32 = arith.constant 0 : i32
    %c0_i32_0 = arith.constant 0 : i32
    %c0_i32_1 = arith.constant 0 : i32
    return %c0_i32, %c0_i32_0 : i32, i32
  }
  func.func @transform_17(%arg0: i32) -> (i32, i32) {
    %c0_i32 = arith.constant 0 : i32
    %c0_i32_0 = arith.constant 0 : i32
    %c0_i32_1 = arith.constant 0 : i32
    return %c0_i32, %c0_i32_0 : i32, i32
  }
  func.func @transform_18(%arg0: i32) -> (i32, i32) {
    %c0_i32 = arith.constant 0 : i32
    %c0_i32_0 = arith.constant 0 : i32
    %c0_i32_1 = arith.constant 0 : i32
    return %c0_i32, %c0_i32_0 : i32, i32
  }
  func.func @transform_19(%arg0: i32) -> (i32, i32) {
    %c0_i32 = arith.constant 0 : i32
    %c0_i32_0 = arith.constant 0 : i32
    %c0_i32_1 = arith.constant 0 : i32
    return %c0_i32, %c0_i32_0 : i32, i32
  }
  func.func @transform_20(%arg0: i32) -> (i32, i32) {
    %c0_i32 = arith.constant 0 : i32
    %c0_i32_0 = arith.constant 0 : i32
    %c0_i32_1 = arith.constant 0 : i32
    return %c0_i32, %c0_i32_0 : i32, i32
  }
  func.func @transform_21(%arg0: i32) -> (i32, i32) {
    %c0_i32 = arith.constant 0 : i32
    %c0_i32_0 = arith.constant 0 : i32
    %c0_i32_1 = arith.constant 0 : i32
    return %c0_i32, %c0_i32_0 : i32, i32
  }
  func.func @transform_22(%arg0: i32) -> (i32, i32) {
    %c0_i32 = arith.constant 0 : i32
    %c0_i32_0 = arith.constant 0 : i32
    %c0_i32_1 = arith.constant 0 : i32
    return %c0_i32, %c0_i32_0 : i32, i32
  }
  func.func @transform_23(%arg0: i32) -> (i32, i32) {
    %c0_i32 = arith.constant 0 : i32
    %c0_i32_0 = arith.constant 0 : i32
    %c0_i32_1 = arith.constant 0 : i32
    return %c0_i32, %c0_i32_0 : i32, i32
  }
  func.func @transform_24(%arg0: i32) -> (i32, i32) {
    %c0_i32 = arith.constant 0 : i32
    %c0_i32_0 = arith.constant 0 : i32
    %c0_i32_1 = arith.constant 0 : i32
    return %c0_i32, %c0_i32_0 : i32, i32
  }
  func.func @transform_25(%arg0: i32) -> (i32, i32) {
    %c0_i32 = arith.constant 0 : i32
    %c0_i32_0 = arith.constant 0 : i32
    %c0_i32_1 = arith.constant 0 : i32
    return %c0_i32, %c0_i32_0 : i32, i32
  }
  func.func @transform_26(%arg0: i32) -> (i32, i32) {
    %c0_i32 = arith.constant 0 : i32
    %c0_i32_0 = arith.constant 0 : i32
    %c0_i32_1 = arith.constant 0 : i32
    return %c0_i32, %c0_i32_0 : i32, i32
  }
  func.func @transform_27(%arg0: i32) -> (i32, i32, i32) {
    %c0_i32 = arith.constant 0 : i32
    %c0_i32_0 = arith.constant 0 : i32
    %c0_i32_1 = arith.constant 0 : i32
    return %arg0, %c0_i32, %c0_i32_0 : i32, i32, i32
  }
}

</mosaic_0001>

<bundles_post_ra>
// kernel: tpu_custom_call.1
= control target key start
LH: loop header
LB: loop body
LE: loop exit
PB: predicated region body
PF: predicated region fallthrough
CT: control target
= control target key end

     0   :  { %s8359_s0 = inlined_call_operand.vmem [shape: f32[1,128,8], index: 0, kind: input, shape index: {}]   ;;  %s8360_s1 = inlined_call_operand.vmem [shape: f32[1,128,128], index: 1, kind: input, shape index: {}]   ;;  %s8361_s2 = inlined_call_operand.hbm [shape: f32[1,8,128], index: 2, kind: input, shape index: {}]   ;;  %s8362_s3 = inlined_call_operand.vmem [shape: bf16[8,20], index: 3, kind: input, shape index: {}]   ;;  %s8363_s4 = inlined_call_operand.vmem [shape: bf16[20,2], index: 4, kind: input, shape index: {}]   ;;  %s8364_s5 = inlined_call_operand.vmem [shape: f32[2,20], index: 5, kind: input, shape index: {}]   ;;  %s8365_s6 = inlined_call_operand.vmem [shape: f32[2,20], index: 6, kind: input, shape index: {}]   ;;  %s8366_s7 = inlined_call_operand.hbm [shape: f32[1,20], index: 7, kind: input, shape index: {}]   ;;  %s8367_s8 = inlined_call_operand.hbm [shape: f32[1,20], index: 8, kind: input, shape index: {}]   ;;  %s8368_s9 = inlined_call_operand.vmem [shape: bf16[20,20], index: 9, kind: input, shape index: {}]   ;;  %s8369_s10 = inlined_call_operand.vmem [shape: bf16[20,2], index: 10, kind: input, shape index: {}]   ;;  %s8370_s11 = inlined_call_operand.vmem [shape: f32[2,20], index: 11, kind: input, shape index: {}]   ;;  %s8371_s12 = inlined_call_operand.vmem [shape: f32[2,20], index: 12, kind: input, shape index: {}]   ;;  %s8372_s13 = inlined_call_operand.vmem [shape: f32[1,20], index: 13, kind: input, shape index: {}]   ;;  %s8373_s14 = inlined_call_operand.vmem [shape: f32[1,20], index: 14, kind: input, shape index: {}]   ;;  %s8374_s15 = inlined_call_operand.vmem [shape: bf16[20,20], index: 15, kind: input, shape index: {}]   ;;  %s8375_s16 = inlined_call_operand.vmem [shape: bf16[20,2], index: 16, kind: input, shape index: {}]   ;;  %s8376_s17 = inlined_call_operand.vmem [shape: f32[2,20], index: 17, kind: input, shape index: {}]   ;;  %s8377_s18 = inlined_call_operand.vmem [shape: f32[2,20], index: 18, kind: input, shape index: {}]   ;;  %s8378_s19 = inlined_call_operand.vmem [shape: f32[1,20], index: 19, kind: input, shape index: {}]   ;;  %s8379_s20 = inlined_call_operand.vmem [shape: f32[1,20], index: 20, kind: input, shape index: {}]   ;;  %s8380_s21 = inlined_call_operand.vmem [shape: bf16[40,128], index: 21, kind: input, shape index: {}]   ;;  %s8381_s22 = inlined_call_operand.vmem [shape: f32[1,128], index: 22, kind: input, shape index: {}]   ;;  %s8382_s23 = inlined_call_operand.vmem [shape: bf16[128,128], index: 23, kind: input, shape index: {}]   ;;  %s8383_s24 = inlined_call_operand.vmem [shape: f32[1,128], index: 24, kind: input, shape index: {}]   ;;  %s8384_s25 = inlined_call_operand.vmem [shape: bf16[128,10], index: 25, kind: input, shape index: {}]   ;;  %s8385_s26 = inlined_call_operand.vmem [shape: f32[1,10], index: 26, kind: input, shape index: {}]   ;;  %s8386_s27 = inlined_call_operand.hbm [shape: f32[1,8,10], index: 27, kind: output, shape index: {}]  }
   0x1   :  { %8422 = sst [smem:[#allocation17_spill]] %s8359_s0 }
   0x2   :  { %8423 = sst [smem:[#allocation18_spill]] %s8360_s1 }
   0x3   :  { %8424 = sst [smem:[#allocation19_spill]] %s8361_s2 }
   0x4   :  { %8425 = sst [smem:[#allocation20_spill]] %s8362_s3 }
   0x5   :  { %8426 = sst [smem:[#allocation21_spill]] %s8363_s4 }
   0x6   :  { %8427 = sst [smem:[#allocation22_spill]] %s8364_s5 }
   0x7   :  { %8428 = sst [smem:[#allocation23_spill]] %s8365_s6 }
   0x8   :  { %8429 = sst [smem:[#allocation24_spill]] %s8366_s7 }
   0x9   :  { %8430 = sst [smem:[#allocation25_spill]] %s8367_s8 }
   0xa   :  { %8431 = sst [smem:[#allocation26_spill]] %s8368_s9 }
   0xb   :  { %8432 = sst [smem:[#allocation27_spill]] %s8369_s10 }
   0xc   :  { %8433 = sst [smem:[#allocation28_spill]] %s8370_s11 }
   0xd   :  { %32 = vsyncpa [#allocation3], 0 }
   0xe   :  { %33 = vsyncpa [#allocation6], 0 }
   0xf   :  { %34 = vsyncpa [#allocation4], 0  ;;  %s5684_s7 = smov [#allocation5]   ;;  %s5685_s8 = smov [#allocation2]  }
  0x10   :  { %s63_s4 = sshll.u32 %s5684_s7, 4  ;;  %s45_s30 = sshll.u32 %s5685_s8, 4  ;;  %s64_s4 = int_to_ptr.vmem [resolvable:$true] %s63_s4  ;;  %s46_s30 = int_to_ptr.vmem [resolvable:$true] %s45_s30 }
  0x11   :  { %s5606_s9 = scalar_lea.vmem %s64_s4, 16  ;;  %s5610_s5 = scalar_lea.vmem %s64_s4, 32 }
  0x12   :  { %p5607_p0 = scmp.ne.s32.totalorder %s64_s4, %s5606_s9  ;;  %p5611_p1 = scmp.lt.s32.totalorder %s64_s4, %s64_s4 }
  0x13   :  { %p5612_p2 = scmp.lt.s32.totalorder %s5610_s5, %s5606_s9 }
  0x15   :  { %p5613_p3 = por %p5612_p2, %p5611_p1 }
  0x17   :  { %p5614_p4 = pnand %p5613_p3, %p5607_p0 }
  0x19   :  { %5617 = shalt.err (!%p5614_p4)
}
  0x1a   :  { %s8434_s10 = sld [smem:[#allocation24_spill]]  ;;  %s5626_s29 = scalar_lea.vmem %s46_s30, 128 }
  0x1b   :  { %p5627_p5 = scmp.ne.s32.totalorder %s46_s30, %s5626_s29  ;;  %p5631_p6 = scmp.lt.s32.totalorder %s46_s30, %s46_s30 }
  0x1c   :  { %p5632_p7 = scmp.lt.s32.totalorder %s5626_s29, %s5626_s29 }
  0x1e   :  { %p5633_p8 = por %p5632_p7, %p5631_p6 }
  0x20   :  { %66 = dma.hbm_to_vmem [thread:$0]  %s8434_s10, 16, %s64_s4, [#allocation6]  }
  0x21   :  { %p5634_p9 = pnand %p5633_p8, %p5627_p5 }
  0x23   :  { %5637 = shalt.err (!%p5634_p9)
}
  0x24   :  { %s8435_s11 = sld [smem:[#allocation19_spill]]  ;;  %s5686_s2 = smov [#allocation7]  }
  0x25   :  { %s73_s3 = sshll.u32 %s5686_s2, 4  ;;  %s74_s3 = int_to_ptr.vmem [resolvable:$true] %s73_s3 }
  0x26   :  { %s5646_s7 = scalar_lea.vmem %s74_s3, 16  ;;  %s5650_s8 = scalar_lea.vmem %s74_s3, 32 }
  0x27   :  { %p5647_p10 = scmp.ne.s32.totalorder %s74_s3, %s5646_s7  ;;  %p5651_p11 = scmp.lt.s32.totalorder %s74_s3, %s74_s3 }
  0x28   :  { %p5652_p12 = scmp.lt.s32.totalorder %s5650_s8, %s5646_s7 }
  0x2a   :  { %48 = dma.hbm_to_vmem [thread:$0]  %s8435_s11, 128, %s46_s30, [#allocation3]  }
  0x2b   :  { %p5653_p13 = por %p5652_p12, %p5651_p11 }
  0x2d   :  { %p5654_p0 = pnand %p5653_p13, %p5647_p10 }
  0x2f   :  { %5657 = shalt.err (!%p5654_p0)
}
  0x30   :  { %s8436_s5 = sld [smem:[#allocation25_spill]] }
  0x36   :  { %76 = dma.hbm_to_vmem [thread:$0]  %s8436_s5, 16, %s74_s3, [#allocation6]  }
  0x37   :  { %5678 = dma.done.wait [#allocation3], 128  }
  0x38   :  { %5679 = vsyncadd [#allocation3], 4294967168 }
  0x39   :  { %5680 = dma.done.wait [#allocation6], 32  }
  0x3a   :  { %5681 = vsyncadd [#allocation6], 4294967264  ;;  %v8394_v0 = vmov 18   ;;  %vm173_vm0 = vcmask 1043456   ;;  %s8437_s0 = sld [smem:[#allocation20_spill]]  ;;  %vm148_vm1 = vcmask 64512   ;;  %v477_v30 = vlaneseq }
  0x3b   :  { %5108 = vset.pattern.permute.xlu1 %v8394_v0  ;;  %s8438_s1 = sld [smem:[#allocation17_spill]]  ;;  %v8396_v29 = vmov 0.0   ;;  %vm5689_vm2 = vmmov 0   ;;  %v8392_v43 = vmov 19   ;;  %vm311_vm3 = vcmask 162816  }
  0x3c   :  { %s8439_s7 = sld [smem:[#allocation21_spill]]  ;;  %4730 = vmatprep.subr.bf16.mxu1 %v8396_v29  ;;  %4746 = vmatprep.mubr.msk.bf16.mxu1 %vm5689_vm2, %v8396_v29  ;;  %v478_v31 = vshrl.u32 %v477_v30, 7  ;;  %vm1473_vm4 = vcmask 1041408   ;;  %vm4124_vm5 = vcmask 1041409   ;;  %vm4126_vm6 = vcmask 1042434  }
  0x3d   :  { %s8441_s5 = sld [smem:[#allocation22_spill]]  ;;  %vm4128_vm7 = vcmask 1043459   ;;  %vm4130_vm8 = vcmask 1044484   ;;  %vm4132_vm9 = vcmask 1045509   ;;  %vm4134_vm10 = vcmask 1046534  }
  0x3e   :  { %v5916_v32 = vsub.s32 1, %v478_v31  ;;  %s8446_s6 = sld [smem:[#allocation18_spill]]  ;;  %vm4136_vm11 = vcmask 1047559   ;;  %vm4172_vm12 = vcmask 326656   ;;  %vm4445_vm13 = vcmask 80896  }
  0x3f   :  { %s8450_s8 = sld [smem:[#allocation26_spill]] }
  0x40   :  { %v147_v1 = vld [vmem:[%s8437_s0] sm:$0xf]  ;;  %8440 = vst [vmem:[#allocation12_spill] sm:$0xff] %v5916_v32  ;;  %s8442_s0 = sld [smem:[#allocation23_spill]] }
  0x41   :  { %v123_v2 = vld [vmem:[%s8438_s1] sm:$0xff]  ;;  %v124_v3 = vld [vmem:[%s8438_s1 + $0x8] sm:$0xff]  ;;  %5092 = vmatprep.subr.msk.bf16.mxu0 %vm173_vm0, %v147_v1  ;;  %v175_v4 = vsel %vm173_vm0, %v147_v1, 0  ;;  %v125_v6 = vld [vmem:[%s8438_s1 + $0x10] sm:$0xff]  ;;  %s8452_s30 = sld [smem:[#allocation27_spill]] }
  0x42   :  { %v139_v5 = vpack.c.bf16 %v124_v3, %v123_v2  ;;  %v126_v7 = vld [vmem:[%s8438_s1 + $0x18] sm:$0xff]  ;;  %v127_v8 = vld [vmem:[%s8438_s1 + $0x20] sm:$0xff]  ;;  %4713 = vmatpush3.bf16.msra.mxu0 %v175_v4  ;;  %v128_v10 = vld [vmem:[%s8438_s1 + $0x28] sm:$0xff]  ;;  %s8454_s11 = sld [smem:[#allocation28_spill]] }
  0x43   :  { %v140_v9 = vpack.c.bf16 %v126_v7, %v125_v6  ;;  %v141_v11 = vpack.c.bf16 %v128_v10, %v127_v8  ;;  %v129_v12 = vld [vmem:[%s8438_s1 + $0x30] sm:$0xff]  ;;  %v130_v13 = vld [vmem:[%s8438_s1 + $0x38] sm:$0xff]  ;;  %v131_v14 = vld [vmem:[%s8438_s1 + $0x40] sm:$0xff] }
  0x44   :  { %4714 = vmatprep.mubr.msk.bf16.mxu0 %vm148_vm1, %v139_v5  ;;  %v5153_v15 = vld [vmem:[%s8439_s7] sm:$0xff]   ;;  %v132_v16 = vld [vmem:[%s8438_s1 + $0x48] sm:$0xff]  ;;  %v142_v18 = vpack.c.bf16 %v130_v13, %v129_v12  ;;  %v133_v20 = vld [vmem:[%s8438_s1 + $0x50] sm:$0xff] }
  0x45   :  { %4715 = vmatmul.mubr.msk.bf16.vlgmr.msra.gmra.mxu0 %vm148_vm1, %v140_v9  ;;  %v5154_v17 = vld [vmem:[%s8439_s7 + $0x8] ss:$0 sps:$4 sm:$0x33]   ;;  %295 = vxpose.xlu0.c.b16.start [1/2] (short) (narrow) %v5153_v15, 16  ;;  %v143_v19 = vpack.c.bf16 %v132_v16, %v131_v14  ;;  %v134_v21 = vld [vmem:[%s8438_s1 + $0x58] sm:$0xff]  ;;  %v135_v22 = vld [vmem:[%s8438_s1 + $0x60] sm:$0xff] }
  0x46   :  { %4718 = vmatprep.mubr.msk.bf16.mxu0 %vm148_vm1, %v141_v11  ;;  %v136_v23 = vld [vmem:[%s8438_s1 + $0x68] sm:$0xff]  ;;  %v144_v24 = vpack.c.bf16 %v134_v21, %v133_v20  ;;  %v137_v26 = vld [vmem:[%s8438_s1 + $0x70] sm:$0xff]  ;;  %v138_v27 = vld [vmem:[%s8438_s1 + $0x78] sm:$0xff]  ;;  %v6008_v11 = vsub.s32 0, %v478_v31 }
  0x47   :  { %v145_v25 = vpack.c.bf16 %v136_v23, %v135_v22  ;;  %v146_v28 = vpack.c.bf16 %v138_v27, %v137_v26  ;;  %v395_v33 = vld [vmem:[%s8441_s5] sm:$0x3] }
  0x48   :  { %v5924_v34 = vld [vmem:[%s8442_s0] sm:$0x3]  ;;  %v5927_v35 = vrot.slane %v395_v33, %v5916_v32  ;;  %8445 = vst [vmem:[#allocation15_spill] sm:$0xff] %v6008_v11 }
  0x49   :  { %296 = vxpose.xlu0.c.b16.end [2/2] (short) (narrow) %v5154_v17, 16  ;;  %v5931_v36 = vrot.slane %v5924_v34, %v5916_v32 }
  0x4d   :  { %4719 = vmatmul.mubr.msk.bf16.gmra.mxu0 %vm148_vm1, %v142_v18  ;;  %v6023_v18 = vrot.slane %v395_v33, %v6008_v11 }
  0x4e   :  { %4722 = vmatprep.mubr.msk.bf16.mxu0 %vm148_vm1, %v143_v19 }
  0x52   :  { %5107 = vset.pattern.permute.xlu0 %v8394_v0 }
  0x55   :  { %4723 = vmatmul.mubr.msk.bf16.gmra.mxu0 %vm148_vm1, %v144_v24 }
  0x56   :  { %4726 = vmatprep.mubr.msk.bf16.mxu0 %vm148_vm1, %v145_v25 }
  0x5d   :  { %4727 = vmatmul.mubr.msk.bf16.gmra.mxu0 %vm148_vm1, %v146_v28  ;;  %v6046_v28 = vrot.slane %v5924_v34, %v6008_v11 }
 0x105   :  { %v5933_v37 = vpop.f32.mrf.mxu0 }
 0x106   :  { %409 = vperm.xlu0 %5107, %v5933_v37   ;;  %v1116_v38 = vmul.f32 %v5933_v37, %v5927_v35 }
 0x107   :  { %v5938_v39 = vpop.f32.mrf.mxu0 }
 0x108   :  { %399 = vperm.xlu1 %5108, %v5938_v39   ;;  %v1136_v40 = vadd.f32 %v5931_v36, %v1116_v38  ;;  %v1114_v41 = vmul.f32 %v5927_v35, %v5938_v39 }
 0x109   :  { %v5944_v42 = vpop.f32.mrf.mxu0 }
 0x10a   :  { %5109 = vset.pattern.permute.xlu0 %v8392_v43  ;;  %v275_v44 = vpack.c.bf16 %v5944_v42, %v5933_v37  ;;  %v1117_v45 = vmul.f32 %v5944_v42, %v5927_v35  ;;  %v1134_v47 = vadd.f32 %v5931_v36, %v1114_v41 }
 0x10b   :  { %891 = vperm.xlu0 %5109, %v5938_v39   ;;  %v5952_v46 = vpop.f32.mrf.mxu0 }
 0x10c   :  { %414 = vperm.xlu1 %5108, %v5944_v42   ;;  %v274_v48 = vpack.c.bf16 %v5952_v46, %v5938_v39  ;;  %v1137_v50 = vadd.f32 %v5931_v36, %v1117_v45  ;;  %v1115_v51 = vmul.f32 %v5927_v35, %v5952_v46 }
 0x10d   :  { %v5958_v49 = vpop.f32.mrf.mxu0 }
 0x10e   :  { %v1120_v53 = vmul.f32 %v5958_v49, %v5927_v35  ;;  %v5968_v54 = vpack.c.bf16 %v1137_v50, %v1136_v40  ;;  %v1135_v55 = vadd.f32 %v5931_v36, %v1115_v51 }
 0x10f   :  { %5110 = vset.pattern.permute.xlu0 %v8394_v0  ;;  %v5964_v52 = vpop.f32.mrf.mxu0 }
 0x110   :  { %8443 = vst [vmem:[#allocation13_spill] sm:$0xff] %v5968_v54  ;;  %404 = vperm.xlu1 %5108, %v5952_v46   ;;  %429 = vperm.xlu0 %5110, %v5958_v49   ;;  %v1140_v57 = vadd.f32 %v5931_v36, %v1120_v53  ;;  %v1118_v58 = vmul.f32 %v5927_v35, %v5964_v52 }
 0x111   :  { %v5973_v56 = vpop.f32.mrf.mxu0  ;;  %v5978_v59 = vpack.c.bf16 %v1135_v55, %v1134_v47 }
 0x112   :  { %v1121_v60 = vmul.f32 %v5973_v56, %v5927_v35  ;;  %v1138_v62 = vadd.f32 %v5931_v36, %v1118_v58 }
 0x113   :  { %8444 = vst [vmem:[#allocation14_spill] sm:$0xff] %v5978_v59  ;;  %v5982_v61 = vpop.f32.mrf.mxu0 }
 0x114   :  { %419 = vperm.xlu1 %5108, %v5964_v52   ;;  %v1141_v1 = vadd.f32 %v5931_v36, %v1121_v60  ;;  %v1119_v2 = vmul.f32 %v5927_v35, %v5982_v61 }
 0x115   :  { %v5986_v63 = vpop.f32.mrf.mxu0 }
 0x116   :  { %449 = vperm.xlu0 %5110, %v5986_v63   ;;  %v1124_v4 = vmul.f32 %v5986_v63, %v5927_v35  ;;  %v5996_v5 = vpack.c.bf16 %v1141_v1, %v1140_v57  ;;  %v1139_v6 = vadd.f32 %v5931_v36, %v1119_v2  ;;  %v647_v47 = vmul.f32 %v5986_v63, %v6023_v18 }
 0x117   :  { %v5992_v3 = vpop.f32.mrf.mxu0 }
 0x118   :  { %434 = vperm.xlu1 %5108, %v5973_v56   ;;  %v1122_v7 = vmul.f32 %v5927_v35, %v5992_v3  ;;  %v1144_v9 = vadd.f32 %v5931_v36, %v1124_v4  ;;  %v6005_v10 = vpack.c.bf16 %v1139_v6, %v1138_v62  ;;  %v667_v4 = vadd.f32 %v6046_v28, %v647_v47 }
 0x119   :  { %v6002_v8 = vpop.f32.mrf.mxu0  ;;  %v645_v6 = vmul.f32 %v6023_v18, %v5992_v3 }
 0x11a   :  { %439 = vperm.xlu0 %5110, %v5992_v3   ;;  %v1125_v12 = vmul.f32 %v6002_v8, %v5927_v35  ;;  %v1142_v14 = vadd.f32 %v5931_v36, %v1122_v7  ;;  %v648_v33 = vmul.f32 %v6002_v8, %v6023_v18 }
 0x11b   :  { %v6012_v13 = vpop.f32.mrf.mxu0 }
 0x11c   :  { %424 = vperm.xlu1 %5108, %v5982_v61   ;;  %v1145_v16 = vadd.f32 %v5931_v36, %v1125_v12  ;;  %v1123_v17 = vmul.f32 %v5927_v35, %v6012_v13  ;;  %v668_v57 = vadd.f32 %v6046_v28, %v648_v33  ;;  %v646_v1 = vmul.f32 %v6023_v18, %v6012_v13 }
 0x11d   :  { %v6016_v15 = vpop.f32.mrf.mxu0  ;;  %v278_v47 = vpack.c.bf16 %v6012_v13, %v5992_v3 }
 0x11e   :  { %469 = vperm.xlu0 %5110, %v6016_v15   ;;  %v6027_v20 = vpack.c.bf16 %v1145_v16, %v1144_v9  ;;  %v1143_v21 = vadd.f32 %v5931_v36, %v1123_v17  ;;  %v651_v22 = vmul.f32 %v6016_v15, %v6023_v18  ;;  %v678_v9 = vpack.c.bf16 %v668_v57, %v667_v4 }
 0x11f   :  { %v6025_v19 = vpop.f32.mrf.mxu0  ;;  %v666_v12 = vadd.f32 %v6046_v28, %v646_v1  ;;  %v665_v16 = vadd.f32 %v6046_v28, %v645_v6  ;;  %v643_v17 = vmul.f32 %v5958_v49, %v6023_v18  ;;  %v328_v57 = vsel %vm311_vm3, %v278_v47, 0  ;;  %v6181_v47 = vld [vmem:[%s8446_s6 + $0x8] sm:$0xff] }
 0x120   :  { %454 = vperm.xlu1 %5108, %v6002_v8   ;;  %v1126_v23 = vmul.f32 %v5927_v35, %v6025_v19  ;;  %v6037_v25 = vpack.c.bf16 %v1143_v21, %v1142_v14  ;;  %v649_v30 = vmul.f32 %v6023_v18, %v6025_v19  ;;  %v671_v41 = vadd.f32 %v6046_v28, %v651_v22 }
 0x121   :  { %v6035_v24 = vpop.f32.mrf.mxu0  ;;  %v644_v14 = vmul.f32 %v5973_v56, %v6023_v18  ;;  %v677_v21 = vpack.c.bf16 %v666_v12, %v665_v16  ;;  %v279_v22 = vpack.c.bf16 %v6002_v8, %v5986_v63  ;;  %v277_v1 = vpack.c.bf16 %v5973_v56, %v5958_v49 }
 0x122   :  { %459 = vperm.xlu0 %5110, %v6025_v19   ;;  %v281_v26 = vpack.c.bf16 %v6035_v24, %v6016_v15  ;;  %v652_v27 = vmul.f32 %v6035_v24, %v6023_v18  ;;  %v1146_v38 = vadd.f32 %v5931_v36, %v1126_v23  ;;  %v669_v53 = vadd.f32 %v6046_v28, %v649_v30 }
 0x123   :  { %v6050_v31 = vpop.f32.mrf.mxu0  ;;  %v664_v23 = vadd.f32 %v6046_v28, %v644_v14  ;;  %v641_v30 = vmul.f32 %v6023_v18, %v5964_v52  ;;  %v331_v33 = vsel %vm311_vm3, %v279_v22, 0 }
 0x124   :  { %444 = vperm.xlu1 %5108, %v6012_v13   ;;  %v337_v40 = vsel %vm311_vm3, %v281_v26, 0  ;;  %v672_v34 = vadd.f32 %v6046_v28, %v652_v27  ;;  %v650_v45 = vmul.f32 %v6023_v18, %v6050_v31  ;;  %v1127_v50 = vmul.f32 %v5927_v35, %v6050_v31 }
 0x125   :  { %4731 = vmatpush3.bf16.xpose.msra.mxu1 %v337_v40  ;;  %v280_v62 = vpack.c.bf16 %v6050_v31, %v6025_v19  ;;  %v642_v26 = vmul.f32 %v6023_v18, %v5982_v61  ;;  %v663_v27 = vadd.f32 %v6046_v28, %v643_v17 }
 0x126   :  { %5112 = vset.pattern.permute.xlu0 %v8392_v43  ;;  %v680_v51 = vpack.c.bf16 %v672_v34, %v671_v41  ;;  %v670_v55 = vadd.f32 %v6046_v28, %v650_v45  ;;  %4732 = vmatprep.subr.bf16.mxu1 %v8396_v29  ;;  %v1147_v58 = vadd.f32 %v5931_v36, %v1127_v50 }
 0x127   :  { %903 = vperm.xlu0 %5112, %v5944_v42   ;;  %v334_v7 = vsel %vm311_vm3, %v280_v62, 0  ;;  %v662_v40 = vadd.f32 %v6046_v28, %v642_v26  ;;  %v640_v41 = vmul.f32 %v5944_v42, %v6023_v18  ;;  %v661_v34 = vadd.f32 %v6046_v28, %v641_v30 }
 0x128   :  { %474 = vperm.xlu1 %5108, %v6035_v24   ;;  %4750 = vmatprep.subr.bf16.mxu0 %v680_v51  ;;  %v679_v60 = vpack.c.bf16 %v670_v55, %v669_v53  ;;  %v6077_v2 = vpack.c.bf16 %v1147_v58, %v1146_v38  ;;  %v676_v38 = vpack.c.bf16 %v664_v23, %v663_v27 }
 0x129   :  { %4751 = vmatpush3.bf16.msra.mxu0 %v680_v51  ;;  %v639_v45 = vmul.f32 %v5933_v37, %v6023_v18  ;;  %v675_v50 = vpack.c.bf16 %v662_v40, %v661_v34  ;;  %v660_v51 = vadd.f32 %v6046_v28, %v640_v41  ;;  %v638_v53 = vmul.f32 %v6023_v18, %v5952_v46 }
 0x12a   :  { %4752 = vmatprep.subr.bf16.mxu0 %v679_v60  ;;  %v637_v55 = vmul.f32 %v6023_v18, %v5938_v39  ;;  %v1128_v18 = vmul.f32 %v6016_v15, %v5927_v35 }
 0x12b   :  { %911 = vperm.xlu0 %5112, %v5982_v61   ;;  %v658_v58 = vadd.f32 %v6046_v28, %v638_v53 }
 0x12c   :  { %464 = vperm.xlu1 %5108, %v6050_v31   ;;  %v657_v62 = vadd.f32 %v6046_v28, %v637_v55 }
 0x12d   :  { %4733 = vmatpush3.bf16.xpose.msra.mxu1 %v334_v7  ;;  %4753 = vmatpush3.bf16.msra.mxu0 %v679_v60  ;;  %v1129_v60 = vmul.f32 %v6035_v24, %v5927_v35  ;;  %v325_v7 = vsel %vm311_vm3, %v277_v1, 0  ;;  %v276_v35 = vpack.c.bf16 %v5982_v61, %v5964_v52 }
 0x12e   :  { %4754 = vmatprep.subr.bf16.mxu0 %v678_v9  ;;  %4734 = vmatprep.subr.bf16.mxu1 %v8396_v29  ;;  %v673_v4 = vpack.c.bf16 %v658_v58, %v657_v62 }
 0x12f   :  { %919 = vperm.xlu0 %5112, %v5973_v56   ;;  %v1149_v6 = vadd.f32 %v5931_v36, %v1129_v60  ;;  %v303_v56 = vpop.trf.xlu0 }
 0x130   :  { %5111 = vset.pattern.permute.xlu1 %v8392_v43 }
 0x131   :  { %895 = vperm.xlu1 %5111, %v5952_v46   ;;  %4755 = vmatpush3.bf16.msra.mxu0 %v678_v9 }
 0x132   :  { %4756 = vmatprep.subr.bf16.mxu0 %v677_v21 }
 0x133   :  { %927 = vperm.xlu0 %5112, %v6012_v13  }
 0x135   :  { %899 = vperm.xlu1 %5111, %v5933_v37   ;;  %4735 = vmatpush3.bf16.xpose.msra.mxu1 %v331_v33 }
 0x136   :  { %4757 = vmatpush3.bf16.msra.mxu0 %v677_v21  ;;  %4736 = vmatprep.subr.bf16.mxu1 %v8396_v29 }
 0x137   :  { %4758 = vmatprep.subr.bf16.mxu0 %v676_v38  ;;  %935 = vperm.xlu0 %5112, %v6002_v8   ;;  %v659_v8 = vadd.f32 %v6046_v28, %v639_v45 }
 0x139   :  { %907 = vperm.xlu1 %5111, %v5964_v52   ;;  %v674_v13 = vpack.c.bf16 %v660_v51, %v659_v8  ;;  %v316_v52 = vsel %vm311_vm3, %v274_v48, 0 }
 0x13a   :  { %4759 = vmatpush3.bf16.msra.mxu0 %v676_v38 }
 0x13b   :  { %4760 = vmatprep.subr.bf16.mxu0 %v675_v50  ;;  %951 = vperm.xlu0 %5112, %v6035_v24   ;;  %v1148_v24 = vadd.f32 %v5931_v36, %v1128_v18  ;;  %v319_v36 = vsel %vm311_vm3, %v275_v44, 0 }
 0x13d   :  { %915 = vperm.xlu1 %5111, %v5958_v49   ;;  %4737 = vmatpush3.bf16.xpose.msra.mxu1 %v328_v57  ;;  %v6141_v28 = vpack.c.bf16 %v1149_v6, %v1148_v24  ;;  %v322_v49 = vsel %vm311_vm3, %v276_v35, 0  ;;  %v6201_v24 = vld [vmem:[%s8446_s6 + $0x10] sm:$0xff] }
 0x13e   :  { %4761 = vmatpush3.bf16.msra.mxu0 %v675_v50  ;;  %4738 = vmatprep.subr.bf16.mxu1 %v8396_v29  ;;  %v6186_v50 = vld [vmem:[%s8446_s6] sm:$0xff] }
 0x13f   :  { %4762 = vmatprep.subr.bf16.mxu0 %v674_v13  ;;  %943 = vperm.xlu0 %5112, %v6050_v31  }
 0x141   :  { %923 = vperm.xlu1 %5111, %v5992_v3  }
 0x142   :  { %4763 = vmatpush3.bf16.msra.mxu0 %v674_v13 }
 0x143   :  { %4764 = vmatprep.subr.bf16.mxu0 %v673_v4 }
 0x145   :  { %931 = vperm.xlu1 %5111, %v5986_v63   ;;  %4739 = vmatpush3.bf16.xpose.msra.mxu1 %v325_v7  ;;  %v6206_v7 = vld [vmem:[%s8446_s6 + $0x20] sm:$0xff] }
 0x146   :  { %4765 = vmatpush3.bf16.msra.mxu0 %v673_v4  ;;  %4740 = vmatprep.subr.bf16.mxu1 %v8396_v29 }
 0x147   :  { %4782 = vmatprep.subr.bf16.mxu0 %v6141_v28 }
 0x149   :  { %939 = vperm.xlu1 %5111, %v6025_v19  }
 0x14d   :  { %947 = vperm.xlu1 %5111, %v6016_v15   ;;  %4741 = vmatpush3.bf16.xpose.msra.mxu1 %v322_v49 }
 0x14e   :  { %4742 = vmatprep.subr.bf16.mxu1 %v8396_v29 }
 0x155   :  { %4743 = vmatpush3.bf16.xpose.msra.mxu1 %v319_v36 }
 0x156   :  { %4744 = vmatprep.subr.bf16.mxu1 %v8396_v29 }
 0x15d   :  { %4745 = vmatpush3.bf16.xpose.msra.mxu1 %v316_v52 }
 0x164   :  { %4747 = vmatmul.mubr.msk.bf16.vlgmr.msra.gmra.mxu1 %vm311_vm3, %v303_v56 }
 0x181   :  { %v410_v37 = vpop.permute.xlu0 %409 }
 0x183   :  { %v400_v61 = vpop.permute.xlu1 %399 }
 0x186   :  { %v6161_v44 = vpop.permute.xlu0 %891 }
 0x187   :  { %v415_v63 = vpop.permute.xlu1 %414 }
 0x18b   :  { %v405_v3 = vpop.permute.xlu1 %404  ;;  %v430_v9 = vpop.permute.xlu0 %429 }
 0x18f   :  { %v420_v15 = vpop.permute.xlu1 %419 }
 0x191   :  { %v450_v39 = vpop.permute.xlu0 %449 }
 0x193   :  { %v435_v19 = vpop.permute.xlu1 %434 }
 0x195   :  { %v440_v14 = vpop.permute.xlu0 %439 }
 0x197   :  { %v425_v42 = vpop.permute.xlu1 %424 }
 0x199   :  { %v470_v53 = vpop.permute.xlu0 %469 }
 0x19b   :  { %v6163_v31 = vpop.permute.xlu1 %454 }
 0x19d   :  { %v460_v56 = vpop.permute.xlu0 %459 }
 0x19f   :  { %v445_v12 = vpop.permute.xlu1 %444 }
 0x1a3   :  { %v6165_v46 = vpop.permute.xlu1 %474 }
 0x1a7   :  { %v6170_v21 = vpop.permute.xlu1 %464 }
 0x1ac   :  { %v6190_v62 = vpop.permute.xlu1 %895 }
 0x224   :  { %v373_v48 = vpop.f32.mrf.mxu1 }
 0x225   :  { %v6168_v16 = vrot.slane %v373_v48, %v6008_v11 }
 0x226   :  { %v4748_v17 = vpop.f32.mrf.mxu1 }
 0x227   :  { %v482_v22 = vadd.f32 %v6168_v16, %v405_v3  ;;  %v481_v23 = vadd.f32 %v6168_v16, %v400_v61  ;;  %v483_v26 = vadd.f32 %v6168_v16, %v410_v37  ;;  %v485_v27 = vadd.f32 %v6168_v16, %v420_v15  ;;  %v6219_v3 = vld [vmem:[%s8446_s6 + $0x18] sm:$0xff]  ;;  %v6224_v15 = vld [vmem:[%s8446_s6 + $0x30] sm:$0xff] }
 0x228   :  { %v376_v30 = vpop.f32.mrf.mxu1  ;;  %v484_v33 = vadd.f32 %v6168_v16, %v415_v63  ;;  %v487_v38 = vadd.f32 %v6168_v16, %v430_v9  ;;  %v486_v58 = vadd.f32 %v6168_v16, %v425_v42  ;;  %v489_v60 = vadd.f32 %v6168_v16, %v440_v14  ;;  %v900_v9 = vpop.permute.xlu1 %899 }
 0x229   :  { %v498_v40 = vmul.f32 0.2, %v482_v22  ;;  %v497_v41 = vmul.f32 0.2, %v481_v23  ;;  %v499_v34 = vmul.f32 0.2, %v483_v26  ;;  %v488_v37 = vadd.f32 %v6168_v16, %v435_v19 }
 0x22a   :  { %v4749_v45 = vpop.f32.mrf.mxu1  ;;  %v501_v51 = vmul.f32 0.2, %v485_v27  ;;  %v500_v57 = vmul.f32 0.2, %v484_v33  ;;  %v503_v13 = vmul.f32 0.2, %v487_v38  ;;  %v491_v42 = vadd.f32 %v6168_v16, %v450_v39 }
 0x22b   :  { %v514_v8 = vmax.f32 %v482_v22, %v498_v40  ;;  %v513_v55 = vmax.f32 %v481_v23, %v497_v41  ;;  %v515_v4 = vmax.f32 %v483_v26, %v499_v34  ;;  %v502_v36 = vmul.f32 0.2, %v486_v58  ;;  %v6239_v26 = vld [vmem:[%s8446_s6 + $0x28] sm:$0xff]  ;;  %v6244_v19 = vld [vmem:[%s8446_s6 + $0x40] sm:$0xff] }
 0x22c   :  { %v517_v6 = vmax.f32 %v485_v27, %v501_v51  ;;  %v516_v35 = vmax.f32 %v484_v33, %v500_v57  ;;  %v519_v49 = vmax.f32 %v487_v38, %v503_v13  ;;  %v505_v52 = vmul.f32 0.2, %v489_v60  ;;  %v904_v38 = vpop.permute.xlu0 %903  ;;  %v908_v51 = vpop.permute.xlu1 %907  ;;  %v6265_v13 = vld [vmem:[%s8446_s6 + $0x38] sm:$0xff] }
 0x22d   :  { %v6193_v18 = vadd.f32 %v514_v8, %v6181_v47  ;;  %v6196_v1 = vadd.f32 %v513_v55, %v6186_v50  ;;  %v6211_v61 = vadd.f32 %v515_v4, %v6201_v24  ;;  %v518_v22 = vmax.f32 %v486_v58, %v502_v36  ;;  %v6270_v58 = vld [vmem:[%s8446_s6 + $0x50] sm:$0xff] }
 0x22e   :  { %v6214_v63 = vadd.f32 %v517_v6, %v6206_v7  ;;  %v6231_v14 = vadd.f32 %v516_v35, %v6219_v3  ;;  %v6234_v17 = vadd.f32 %v519_v49, %v6224_v15  ;;  %v521_v23 = vmax.f32 %v489_v60, %v505_v52 }
 0x22f   :  { %547 = vmax.xlane.f32.xlu0 %v6193_v18  ;;  %545 = vmax.xlane.f32.xlu1 %v6196_v1  ;;  %v504_v39 = vmul.f32 0.2, %v488_v37  ;;  %v507_v27 = vmul.f32 0.2, %v491_v42  ;;  %v490_v30 = vadd.f32 %v6168_v16, %v445_v12  ;;  %v493_v33 = vadd.f32 %v6168_v16, %v460_v56  ;;  %v6287_v56 = vld [vmem:[%s8446_s6 + $0x48] sm:$0xff] }
 0x230   :  { %v6249_v40 = vrot.slane %v373_v48, %v5916_v32  ;;  %v6254_v41 = vadd.f32 %v518_v22, %v6239_v26  ;;  %v6257_v34 = vadd.f32 %v521_v23, %v6244_v19  ;;  %v492_v45 = vadd.f32 %v6168_v16, %v6163_v31  ;;  %v912_v6 = vpop.permute.xlu0 %911 }
 0x231   :  { %v495_v12 = vadd.f32 %v6168_v16, %v470_v53  ;;  %v520_v8 = vmax.f32 %v488_v37, %v504_v39  ;;  %v523_v55 = vmax.f32 %v491_v42, %v507_v27  ;;  %v506_v48 = vmul.f32 0.2, %v490_v30 }
 0x232   :  { %v509_v57 = vmul.f32 0.2, %v493_v33  ;;  %v508_v31 = vmul.f32 0.2, %v492_v45  ;;  %v494_v60 = vadd.f32 %v6168_v16, %v6170_v21  ;;  %v958_v4 = vadd.f32 %v6249_v40, %v6161_v44  ;;  %v6292_v21 = vld [vmem:[%s8446_s6 + $0x60] sm:$0xff]  ;;  %v916_v44 = vpop.permute.xlu1 %915 }
 0x233   :  { %549 = vmax.xlane.f32.xlu0 %v6211_v61  ;;  %553 = vmax.xlane.f32.xlu1 %v6214_v63  ;;  %v511_v53 = vmul.f32 0.2, %v495_v12  ;;  %v6279_v35 = vadd.f32 %v520_v8, %v6265_v13  ;;  %v6282_v49 = vadd.f32 %v523_v55, %v6270_v58  ;;  %v522_v36 = vmax.f32 %v490_v30, %v506_v48  ;;  %v6305_v30 = vld [vmem:[%s8446_s6 + $0x58] sm:$0xff] }
 0x234   :  { %v525_v52 = vmax.f32 %v493_v33, %v509_v57  ;;  %v524_v37 = vmax.f32 %v492_v45, %v508_v31  ;;  %v510_v22 = vmul.f32 0.2, %v494_v60  ;;  %v974_v23 = vmul.f32 0.2, %v958_v4  ;;  %v6310_v33 = vld [vmem:[%s8446_s6 + $0x70] sm:$0xff]  ;;  %v920_v8 = vpop.permute.xlu0 %919 }
 0x235   :  { %v527_v42 = vmax.f32 %v495_v12, %v511_v53  ;;  %v6297_v39 = vadd.f32 %v522_v36, %v6287_v56  ;;  %v496_v45 = vadd.f32 %v6168_v16, %v6165_v46  ;;  %v960_v12 = vadd.f32 %v6249_v40, %v900_v9  ;;  %v6326_v46 = vld [vmem:[%s8446_s6 + $0x68] sm:$0xff] }
 0x236   :  { %v6300_v27 = vadd.f32 %v525_v52, %v6292_v21  ;;  %v6318_v55 = vadd.f32 %v524_v37, %v6305_v30  ;;  %v526_v57 = vmax.f32 %v494_v60, %v510_v22  ;;  %v990_v31 = vmax.f32 %v958_v4, %v974_v23  ;;  %v924_v53 = vpop.permute.xlu1 %923 }
 0x237   :  { %551 = vmax.xlane.f32.xlu0 %v6231_v14  ;;  %557 = vmax.xlane.f32.xlu1 %v6234_v17  ;;  %v6321_v48 = vadd.f32 %v527_v42, %v6310_v33  ;;  %v512_v16 = vmul.f32 0.2, %v496_v45  ;;  %v976_v9 = vmul.f32 0.2, %v960_v12  ;;  %v959_v36 = vadd.f32 %v6249_v40, %v6190_v62 }
 0x238   :  { %v962_v52 = vadd.f32 %v6249_v40, %v908_v51  ;;  %v6334_v60 = vadd.f32 %v526_v57, %v6326_v46  ;;  %v6337_v4 = vadd.f32 %v990_v31, %v6186_v50  ;;  %v961_v37 = vadd.f32 %v6249_v40, %v904_v38  ;;  %v928_v22 = vpop.permute.xlu0 %927  ;;  %v6344_v51 = vld [vmem:[%s8446_s6 + $0x78] sm:$0xff] }
 0x239   :  { %v964_v42 = vadd.f32 %v6249_v40, %v916_v44  ;;  %v528_v23 = vmax.f32 %v496_v45, %v512_v16  ;;  %v992_v43 = vmax.f32 %v960_v12, %v976_v9  ;;  %v975_v62 = vmul.f32 0.2, %v959_v36 }
 0x23a   :  { %v978_v0 = vmul.f32 0.2, %v962_v52  ;;  %v932_v29 = vpop.permute.xlu1 %931  ;;  %v977_v50 = vmul.f32 0.2, %v961_v37  ;;  %v963_v38 = vadd.f32 %v6249_v40, %v912_v6  ;;  %v966_v44 = vadd.f32 %v6249_v40, %v924_v53 }
 0x23b   :  { %555 = vmax.xlane.f32.xlu0 %v6254_v41  ;;  %561 = vmax.xlane.f32.xlu1 %v6257_v34  ;;  %v980_v57 = vmul.f32 0.2, %v964_v42  ;;  %v6351_v45 = vadd.f32 %v528_v23, %v6344_v51  ;;  %v6354_v12 = vadd.f32 %v992_v43, %v6201_v24  ;;  %v991_v31 = vmax.f32 %v959_v36, %v975_v62 }
 0x23c   :  { %v994_v16 = vmax.f32 %v962_v52, %v978_v0  ;;  %v936_v9 = vpop.permute.xlu0 %935  ;;  %v993_v11 = vmax.f32 %v961_v37, %v977_v50  ;;  %v979_v59 = vmul.f32 0.2, %v963_v38  ;;  %v982_v54 = vmul.f32 0.2, %v966_v44 }
 0x23d   :  { %v996_v32 = vmax.f32 %v964_v42, %v980_v57  ;;  %v6359_v53 = vadd.f32 %v991_v31, %v6181_v47  ;;  %v965_v43 = vadd.f32 %v6249_v40, %v920_v8  ;;  %v968_v0 = vadd.f32 %v6249_v40, %v932_v29 }
 0x23e   :  { %v940_v6 = vpop.permute.xlu1 %939  ;;  %v6362_v23 = vadd.f32 %v994_v16, %v6206_v7  ;;  %v6369_v24 = vadd.f32 %v993_v11, %v6219_v3  ;;  %v995_v52 = vmax.f32 %v963_v38, %v979_v59  ;;  %v998_v47 = vmax.f32 %v966_v44, %v982_v54 }
 0x23f   :  { %559 = vmax.xlane.f32.xlu0 %v6279_v35  ;;  %565 = vmax.xlane.f32.xlu1 %v6282_v49  ;;  %v6372_v36 = vadd.f32 %v996_v32, %v6224_v15  ;;  %v981_v42 = vmul.f32 0.2, %v965_v43  ;;  %v984_v7 = vmul.f32 0.2, %v968_v0  ;;  %v967_v62 = vadd.f32 %v6249_v40, %v928_v22 }
 0x240   :  { %v952_v37 = vpop.permute.xlu0 %951  ;;  %v970_v8 = vadd.f32 %v6249_v40, %v940_v6  ;;  %v6379_v11 = vadd.f32 %v995_v52, %v6239_v26  ;;  %v6382_v32 = vadd.f32 %v998_v47, %v6244_v19  ;;  %v969_v54 = vadd.f32 %v6249_v40, %v936_v9 }
 0x241   :  { %v997_v3 = vmax.f32 %v965_v43, %v981_v42  ;;  %v1000_v15 = vmax.f32 %v968_v0, %v984_v7  ;;  %v983_v22 = vmul.f32 0.2, %v967_v62  ;;  %v973_v43 = vadd.f32 %v6249_v40, %v952_v37 }
 0x242   :  { %v948_v29 = vpop.permute.xlu1 %947  ;;  %v986_v50 = vmul.f32 0.2, %v970_v8  ;;  %v985_v38 = vmul.f32 0.2, %v969_v54 }
 0x243   :  { %563 = vmax.xlane.f32.xlu0 %v6297_v39  ;;  %569 = vmax.xlane.f32.xlu1 %v6300_v27  ;;  %v972_v59 = vadd.f32 %v6249_v40, %v948_v29  ;;  %v6390_v19 = vadd.f32 %v997_v3, %v6265_v13  ;;  %v6393_v31 = vadd.f32 %v1000_v15, %v6270_v58 }
 0x244   :  { %v944_v57 = vpop.permute.xlu0 %943  ;;  %v999_v16 = vmax.f32 %v967_v62, %v983_v22  ;;  %v1002_v9 = vmax.f32 %v970_v8, %v986_v50  ;;  %v1001_v13 = vmax.f32 %v969_v54, %v985_v38 }
 0x245   :  { %v988_v44 = vmul.f32 0.2, %v972_v59  ;;  %v971_v26 = vadd.f32 %v6249_v40, %v944_v57  ;;  %v989_v40 = vmul.f32 0.2, %v973_v43 }
 0x246   :  { %v6399_v0 = vadd.f32 %v999_v16, %v6287_v56  ;;  %v6402_v52 = vadd.f32 %v1002_v9, %v6292_v21  ;;  %v6407_v58 = vadd.f32 %v1001_v13, %v6305_v30 }
 0x247   :  { %567 = vmax.xlane.f32.xlu0 %v6318_v55  ;;  %573 = vmax.xlane.f32.xlu1 %v6321_v48  ;;  %v987_v6 = vmul.f32 0.2, %v971_v26  ;;  %v1004_v47 = vmax.f32 %v972_v59, %v988_v44  ;;  %v1005_v21 = vmax.f32 %v973_v43, %v989_v40 }
 0x249   :  { %v6410_v42 = vadd.f32 %v1004_v47, %v6310_v33  ;;  %v1003_v7 = vmax.f32 %v971_v26, %v987_v6  ;;  %v6419_v37 = vadd.f32 %v1005_v21, %v6344_v51 }
 0x24b   :  { %571 = vmax.xlane.f32.xlu0 %v6334_v60  ;;  %1022 = vmax.xlane.f32.xlu1 %v6337_v4  ;;  %v6415_v56 = vadd.f32 %v1003_v7, %v6326_v46 }
 0x24f   :  { %575 = vmax.xlane.f32.xlu0 %v6351_v45  ;;  %1026 = vmax.xlane.f32.xlu1 %v6354_v12 }
 0x253   :  { %1024 = vmax.xlane.f32.xlu0 %v6359_v53  ;;  %1030 = vmax.xlane.f32.xlu1 %v6362_v23 }
 0x257   :  { %1028 = vmax.xlane.f32.xlu0 %v6369_v24  ;;  %1034 = vmax.xlane.f32.xlu1 %v6372_v36 }
 0x25b   :  { %1032 = vmax.xlane.f32.xlu0 %v6379_v11  ;;  %1038 = vmax.xlane.f32.xlu1 %v6382_v32 }
 0x25f   :  { %1036 = vmax.xlane.f32.xlu0 %v6390_v19  ;;  %1042 = vmax.xlane.f32.xlu1 %v6393_v31 }
 0x263   :  { %1040 = vmax.xlane.f32.xlu0 %v6399_v0  ;;  %1046 = vmax.xlane.f32.xlu1 %v6402_v52 }
 0x267   :  { %1044 = vmax.xlane.f32.xlu0 %v6407_v58  ;;  %1050 = vmax.xlane.f32.xlu1 %v6410_v42 }
 0x26b   :  { %1048 = vmax.xlane.f32.xlu0 %v6415_v56 }
 0x26f   :  { %1052 = vmax.xlane.f32.xlu0 %v6419_v37 }
 0x2b8   :  { %v548_v30 = vpop.xlane.xlu0 %547  ;;  %v546_v33 = vpop.xlane.xlu1 %545 }
 0x2b9   :  { %v578_v62 = vsub.f32 %v6193_v18, %v548_v30  ;;  %v577_v8 = vsub.f32 %v6196_v1, %v546_v33 }
 0x2bb   :  { %v595_v29 = vmul.f32 1.442695, %v578_v62  ;;  %v593_v54 = vmul.f32 1.442695, %v577_v8 }
 0x2bc   :  { %v550_v59 = vpop.xlane.xlu0 %549  ;;  %v554_v3 = vpop.xlane.xlu1 %553 }
 0x2bd   :  { %5182 = vpow2.f32 %v595_v29  ;;  %v579_v46 = vsub.f32 %v6211_v61, %v550_v59  ;;  %v581_v51 = vsub.f32 %v6214_v63, %v554_v3 }
 0x2be   :  { %5184 = vpow2.f32 %v593_v54 }
 0x2bf   :  { %v597_v15 = vmul.f32 1.442695, %v579_v46  ;;  %v601_v18 = vmul.f32 1.442695, %v581_v51 }
 0x2c0   :  { %v552_v22 = vpop.xlane.xlu0 %551  ;;  %v558_v50 = vpop.xlane.xlu1 %557 }
 0x2c1   :  { %v580_v57 = vsub.f32 %v6231_v14, %v552_v22  ;;  %5186 = vpow2.f32 %v597_v15  ;;  %v583_v1 = vsub.f32 %v6234_v17, %v558_v50 }
 0x2c3   :  { %v599_v38 = vmul.f32 1.442695, %v580_v57  ;;  %v605_v61 = vmul.f32 1.442695, %v583_v1 }
 0x2c4   :  { %v556_v44 = vpop.xlane.xlu0 %555  ;;  %v562_v26 = vpop.xlane.xlu1 %561 }
 0x2c5   :  { %5188 = vpow2.f32 %v599_v38  ;;  %v582_v16 = vsub.f32 %v6254_v41, %v556_v44  ;;  %v585_v6 = vsub.f32 %v6257_v34, %v562_v26 }
 0x2c6   :  { %5190 = vpow2.f32 %v601_v18 }
 0x2c7   :  { %v603_v9 = vmul.f32 1.442695, %v582_v16  ;;  %v609_v17 = vmul.f32 1.442695, %v585_v6 }
 0x2c8   :  { %v560_v63 = vpop.xlane.xlu0 %559  ;;  %v566_v43 = vpop.xlane.xlu1 %565 }
 0x2c9   :  { %5192 = vpow2.f32 %v603_v9  ;;  %v584_v14 = vsub.f32 %v6279_v35, %v560_v63  ;;  %v587_v40 = vsub.f32 %v6282_v49, %v566_v43 }
 0x2ca   :  { %v5183_v13 = vpop.eup %5182  ;;  %5194 = vpow2.f32 %v605_v61 }
 0x2cb   :  { %v5185_v47 = vpop.eup %5184  ;;  %v607_v7 = vmul.f32 1.442695, %v584_v14  ;;  %v613_v62 = vmul.f32 1.442695, %v587_v40 }
 0x2cc   :  { %v564_v21 = vpop.xlane.xlu0 %563  ;;  %v570_v30 = vpop.xlane.xlu1 %569  ;;  %v625_v41 = vpack.c.bf16 %v5183_v13, %v5185_v47 }
 0x2cd   :  { %5196 = vpow2.f32 %v607_v7  ;;  %v586_v33 = vsub.f32 %v6297_v39, %v564_v21  ;;  %v589_v8 = vsub.f32 %v6300_v27, %v570_v30 }
 0x2ce   :  { %4766 = vmatprep.mubr.bf16.mxu0 %v625_v41  ;;  %5198 = vpow2.f32 %v609_v17  ;;  %v5187_v54 = vpop.eup %5186 }
 0x2cf   :  { %v611_v34 = vmul.f32 1.442695, %v586_v33  ;;  %v617_v15 = vmul.f32 1.442695, %v589_v8 }
 0x2d0   :  { %v568_v35 = vpop.xlane.xlu0 %567  ;;  %v574_v29 = vpop.xlane.xlu1 %573 }
 0x2d1   :  { %5200 = vpow2.f32 %v611_v34  ;;  %v588_v59 = vsub.f32 %v6318_v55, %v568_v35  ;;  %v591_v51 = vsub.f32 %v6321_v48, %v574_v29 }
 0x2d2   :  { %v5189_v3 = vpop.eup %5188  ;;  %5202 = vpow2.f32 %v613_v62 }
 0x2d3   :  { %v615_v49 = vmul.f32 1.442695, %v588_v59  ;;  %v626_v46 = vpack.c.bf16 %v5189_v3, %v5187_v54  ;;  %v5191_v50 = vpop.eup %5190  ;;  %v621_v18 = vmul.f32 1.442695, %v591_v51 }
 0x2d4   :  { %v572_v39 = vpop.xlane.xlu0 %571  ;;  %v1023_v22 = vpop.xlane.xlu1 %1022 }
 0x2d5   :  { %5204 = vpow2.f32 %v615_v49  ;;  %v590_v57 = vsub.f32 %v6334_v60, %v572_v39  ;;  %4767 = vmatmul.mubr.bf16.vlgmr.msra.gmra.mxu0 %v626_v46  ;;  %v1054_v1 = vsub.f32 %v6337_v4, %v1023_v22 }
 0x2d6   :  { %v5193_v27 = vpop.eup %5192  ;;  %4783 = vmatpush3.bf16.msra.mxu0 %v6141_v28  ;;  %5206 = vpow2.f32 %v617_v15 }
 0x2d7   :  { %v619_v38 = vmul.f32 1.442695, %v590_v57  ;;  %4784 = vmatprep.subr.bf16.mxu0 %v6077_v2  ;;  %v627_v55 = vpack.c.bf16 %v5193_v27, %v5191_v50  ;;  %v5195_v26 = vpop.eup %5194  ;;  %v1070_v61 = vmul.f32 1.442695, %v1054_v1 }
 0x2d8   :  { %v576_v44 = vpop.xlane.xlu0 %575  ;;  %v1027_v48 = vpop.xlane.xlu1 %1026 }
 0x2d9   :  { %5208 = vpow2.f32 %v619_v38  ;;  %v592_v16 = vsub.f32 %v6351_v45, %v576_v44  ;;  %4770 = vmatprep.mubr.bf16.mxu0 %v627_v55  ;;  %v1056_v6 = vsub.f32 %v6354_v12, %v1027_v48 }
 0x2da   :  { %v5197_v60 = vpop.eup %5196  ;;  %4785 = vmatpush3.bf16.msra.mxu0 %v6077_v2  ;;  %5210 = vpow2.f32 %v621_v18 }
 0x2db   :  { %v623_v9 = vmul.f32 1.442695, %v592_v16  ;;  %4786 = vmatprep.subr.bf16.mxu0 %v6027_v20  ;;  %v628_v28 = vpack.c.bf16 %v5197_v60, %v5195_v26  ;;  %v5199_v43 = vpop.eup %5198  ;;  %v1074_v47 = vmul.f32 1.442695, %v1056_v6  ;;  %v8449_v60 = vmov 0.0  }
 0x2dc   :  { %v1025_v63 = vpop.xlane.xlu0 %1024  ;;  %v1031_v4 = vpop.xlane.xlu1 %1030 }
 0x2dd   :  { %5212 = vpow2.f32 %v623_v9  ;;  %v1055_v14 = vsub.f32 %v6359_v53, %v1025_v63  ;;  %4771 = vmatmul.mubr.bf16.gmra.mxu0 %v628_v28  ;;  %v1058_v7 = vsub.f32 %v6362_v23, %v1031_v4 }
 0x2de   :  { %v5201_v45 = vpop.eup %5200  ;;  %4787 = vmatpush3.bf16.msra.mxu0 %v6027_v20  ;;  %5214 = vpow2.f32 %v1070_v61 }
 0x2df   :  { %v1072_v13 = vmul.f32 1.442695, %v1055_v14  ;;  %4788 = vmatprep.subr.bf16.mxu0 %v6037_v25  ;;  %v629_v2 = vpack.c.bf16 %v5201_v45, %v5199_v43  ;;  %v5203_v40 = vpop.eup %5202  ;;  %v1078_v41 = vmul.f32 1.442695, %v1058_v7 }
 0x2e0   :  { %v1029_v17 = vpop.xlane.xlu0 %1028  ;;  %v1035_v12 = vpop.xlane.xlu1 %1034 }
 0x2e1   :  { %5216 = vpow2.f32 %v1072_v13  ;;  %v1057_v21 = vsub.f32 %v6369_v24, %v1029_v17  ;;  %4774 = vmatprep.mubr.bf16.mxu0 %v629_v2  ;;  %v1060_v33 = vsub.f32 %v6372_v36, %v1035_v12 }
 0x2e2   :  { %v5205_v53 = vpop.eup %5204  ;;  %4789 = vmatpush3.bf16.msra.mxu0 %v6037_v25  ;;  %5218 = vpow2.f32 %v1074_v47 }
 0x2e3   :  { %v1076_v30 = vmul.f32 1.442695, %v1057_v21  ;;  %4790 = vmatprep.subr.bf16.mxu0 %v5996_v5  ;;  %v630_v20 = vpack.c.bf16 %v5205_v53, %v5203_v40  ;;  %v5207_v62 = vpop.eup %5206  ;;  %v1082_v29 = vmul.f32 1.442695, %v1060_v33 }
 0x2e4   :  { %v1033_v34 = vpop.xlane.xlu0 %1032  ;;  %v1039_v23 = vpop.xlane.xlu1 %1038 }
 0x2e5   :  { %5220 = vpow2.f32 %v1076_v30  ;;  %v1059_v8 = vsub.f32 %v6379_v11, %v1033_v34  ;;  %4775 = vmatmul.mubr.bf16.gmra.mxu0 %v630_v20  ;;  %v1062_v54 = vsub.f32 %v6382_v32, %v1039_v23  ;;  %v8404_v34 = vmov 16  }
 0x2e6   :  { %v5209_v24 = vpop.eup %5208  ;;  %4791 = vmatpush3.bf16.msra.mxu0 %v5996_v5  ;;  %5222 = vpow2.f32 %v1078_v41  ;;  %v8447_v5 = vld [vmem:[#allocation13_spill] sm:$0xff]  ;;  %5113 = vset.pattern.permute.xlu1 %v8404_v34 }
 0x2e7   :  { %v1080_v35 = vmul.f32 1.442695, %v1059_v8  ;;  %4792 = vmatprep.subr.bf16.mxu0 %v6005_v10  ;;  %v631_v25 = vpack.c.bf16 %v5209_v24, %v5207_v62  ;;  %v5211_v3 = vpop.eup %5210  ;;  %v1086_v51 = vmul.f32 1.442695, %v1062_v54  ;;  %5114 = vset.pattern.permute.xlu0 %v8404_v34 }
 0x2e8   :  { %v1037_v59 = vpop.xlane.xlu0 %1036  ;;  %v1043_v36 = vpop.xlane.xlu1 %1042 }
 0x2e9   :  { %5224 = vpow2.f32 %v1080_v35  ;;  %v1061_v49 = vsub.f32 %v6390_v19, %v1037_v59  ;;  %4778 = vmatprep.mubr.bf16.mxu0 %v631_v25  ;;  %v1064_v39 = vsub.f32 %v6393_v31, %v1043_v36 }
 0x2ea   :  { %v5213_v11 = vpop.eup %5212  ;;  %4793 = vmatpush3.bf16.msra.mxu0 %v6005_v10  ;;  %5226 = vpow2.f32 %v1082_v29  ;;  %v8448_v10 = vld [vmem:[#allocation14_spill] sm:$0xff] }
 0x2eb   :  { %v1084_v46 = vmul.f32 1.442695, %v1061_v49  ;;  %4794 = vmatprep.subr.bf16.mxu0 %v8447_v5  ;;  %v632_v15 = vpack.c.bf16 %v5213_v11, %v5211_v3  ;;  %v5215_v50 = vpop.eup %5214  ;;  %v1090_v55 = vmul.f32 1.442695, %v1064_v39 }
 0x2ec   :  { %v1041_v22 = vpop.xlane.xlu0 %1040  ;;  %v1047_v32 = vpop.xlane.xlu1 %1046 }
 0x2ed   :  { %5228 = vpow2.f32 %v1084_v46  ;;  %v1063_v57 = vsub.f32 %v6399_v0, %v1041_v22  ;;  %4779 = vmatmul.mubr.bf16.gmra.mxu0 %v632_v15  ;;  %v1066_v18 = vsub.f32 %v6402_v52, %v1047_v32 }
 0x2ee   :  { %v5217_v19 = vpop.eup %5216  ;;  %4795 = vmatpush3.bf16.msra.mxu0 %v8447_v5  ;;  %5230 = vpow2.f32 %v1086_v51 }
 0x2ef   :  { %v1088_v27 = vmul.f32 1.442695, %v1063_v57  ;;  %4796 = vmatprep.subr.bf16.mxu0 %v8448_v10  ;;  %v1102_v38 = vpack.c.bf16 %v5217_v19, %v5215_v50  ;;  %v5219_v31 = vpop.eup %5218  ;;  %v1094_v9 = vmul.f32 1.442695, %v1066_v18 }
 0x2f0   :  { %v1045_v1 = vpop.xlane.xlu0 %1044  ;;  %v1051_v48 = vpop.xlane.xlu1 %1050 }
 0x2f1   :  { %5232 = vpow2.f32 %v1088_v27  ;;  %v1065_v44 = vsub.f32 %v6407_v58, %v1045_v1  ;;  %4798 = vmatprep.mubr.bf16.mxu0 %v1102_v38  ;;  %v1068_v28 = vsub.f32 %v6410_v42, %v1051_v48 }
 0x2f2   :  { %v5221_v0 = vpop.eup %5220  ;;  %4797 = vmatpush3.bf16.msra.mxu0 %v8448_v10  ;;  %5234 = vpow2.f32 %v1090_v55 }
 0x2f3   :  { %v1092_v26 = vmul.f32 1.442695, %v1065_v44  ;;  %v1103_v16 = vpack.c.bf16 %v5221_v0, %v5219_v31  ;;  %4834 = vmatprep.subr.bf16.mxu0 %v8449_v60  ;;  %v5223_v52 = vpop.eup %5222  ;;  %v1098_v43 = vmul.f32 1.442695, %v1068_v28  ;;  %v8406_v0 = vmov 17  }
 0x2f4   :  { %v1049_v61 = vpop.xlane.xlu0 %1048 }
 0x2f5   :  { %5236 = vpow2.f32 %v1092_v26  ;;  %v1067_v6 = vsub.f32 %v6415_v56, %v1049_v61  ;;  %4799 = vmatmul.mubr.bf16.vlgmr.msra.gmra.mxu0 %v1103_v16 }
 0x2f6   :  { %v5225_v58 = vpop.eup %5224  ;;  %5238 = vpow2.f32 %v1094_v9 }
 0x2f7   :  { %v1096_v63 = vmul.f32 1.442695, %v1067_v6  ;;  %v1104_v4 = vpack.c.bf16 %v5225_v58, %v5223_v52  ;;  %v5227_v45 = vpop.eup %5226 }
 0x2f8   :  { %v1053_v14 = vpop.xlane.xlu0 %1052 }
 0x2f9   :  { %5240 = vpow2.f32 %v1096_v63  ;;  %v1069_v13 = vsub.f32 %v6419_v37, %v1053_v14  ;;  %4802 = vmatprep.mubr.bf16.mxu0 %v1104_v4 }
 0x2fa   :  { %v5229_v2 = vpop.eup %5228  ;;  %5242 = vpow2.f32 %v1098_v43 }
 0x2fb   :  { %v1100_v47 = vmul.f32 1.442695, %v1069_v13  ;;  %v1105_v42 = vpack.c.bf16 %v5229_v2, %v5227_v45  ;;  %v5231_v7 = vpop.eup %5230 }
 0x2fd   :  { %5244 = vpow2.f32 %v1100_v47  ;;  %4803 = vmatmul.mubr.bf16.gmra.mxu0 %v1105_v42  ;;  %v5155_v42 = vld [vmem:[%s8450_s8 + $0x8] ss:$0 sps:$4 sm:$0x33]  }
 0x2fe   :  { %v5233_v56 = vpop.eup %5232  ;;  %5093 = vmatprep.subr.msk.bf16.mxu1 %vm1473_vm4, %v5155_v42 }
 0x2ff   :  { %v1106_v17 = vpack.c.bf16 %v5233_v56, %v5231_v7  ;;  %v5235_v12 = vpop.eup %5234 }
 0x301   :  { %4806 = vmatprep.mubr.bf16.mxu0 %v1106_v17  ;;  %v1475_v17 = vsel %vm1473_vm4, %v5155_v42, 0 }
 0x302   :  { %v5237_v40 = vpop.eup %5236  ;;  %4815 = vmatpush3.bf16.msra.mxu1 %v1475_v17 }
 0x303   :  { %v1107_v21 = vpack.c.bf16 %v5237_v40, %v5235_v12  ;;  %v5239_v53 = vpop.eup %5238  ;;  %v5156_v40 = vld [vmem:[%s8450_s8] sm:$0xff]  }
 0x304   :  { %4816 = vmatprep.subr.bf16.mxu1 %v5156_v40 }
 0x305   :  { %4807 = vmatmul.mubr.bf16.gmra.mxu0 %v1107_v21 }
 0x306   :  { %v5241_v30 = vpop.eup %5240  ;;  %4817 = vmatpush3.bf16.msra.mxu1 %v5156_v40 }
 0x307   :  { %v1108_v20 = vpack.c.bf16 %v5241_v30, %v5239_v53  ;;  %v5243_v41 = vpop.eup %5242 }
 0x309   :  { %4810 = vmatprep.mubr.bf16.mxu0 %v1108_v20 }
 0x30a   :  { %v5245_v37 = vpop.eup %5244 }
 0x30b   :  { %v1109_v33 = vpack.c.bf16 %v5245_v37, %v5243_v41 }
 0x30d   :  { %4811 = vmatmul.mubr.bf16.gmra.mxu0 %v1109_v33 }
 0x30e   :  { %4850 = vmatprep.mubr.msk.bf16.mxu0 %vm5689_vm2, %v8449_v60 }
 0x395   :  { %v6474_v23 = vpop.f32.mrf.mxu0 }
 0x396   :  { %5246 = vrcp.f32 %v6474_v23 }
 0x397   :  { %v6477_v62 = vpop.f32.mrf.mxu0 }
 0x398   :  { %5248 = vrcp.f32 %v6477_v62 }
 0x399   :  { %v6479_v8 = vpop.f32.mrf.mxu0 }
 0x39b   :  { %v6482_v24 = vpop.f32.mrf.mxu0 }
 0x39c   :  { %5250 = vrcp.f32 %v6482_v24 }
 0x39d   :  { %v6485_v35 = vpop.f32.mrf.mxu0  ;;  %5252 = vrcp.f32 %v6479_v8 }
 0x39e   :  { %5254 = vrcp.f32 %v6485_v35 }
 0x39f   :  { %v6488_v25 = vpop.f32.mrf.mxu0 }
 0x3a1   :  { %v6491_v29 = vpop.f32.mrf.mxu0 }
 0x3a2   :  { %5256 = vrcp.f32 %v6491_v29 }
 0x3a3   :  { %v5247_v54 = vpop.eup %5246  ;;  %v6494_v59 = vpop.f32.mrf.mxu0  ;;  %5258 = vrcp.f32 %v6488_v25 }
 0x3a4   :  { %806 = vperm.xlu1 %5113, %v5247_v54  }
 0x3a5   :  { %v6496_v36 = vpop.f32.mrf.mxu0  ;;  %v5249_v3 = vpop.eup %5248 }
 0x3a7   :  { %v6499_v49 = vpop.f32.mrf.mxu0 }
 0x3a8   :  { %5260 = vrcp.f32 %v6499_v49  ;;  %796 = vperm.xlu1 %5113, %v5249_v3  }
 0x3a9   :  { %v5251_v11 = vpop.eup %5250  ;;  %v6502_v46 = vpop.f32.mrf.mxu0  ;;  %5262 = vrcp.f32 %v6494_v59 }
 0x3aa   :  { %801 = vperm.xlu0 %5114, %v5251_v11   ;;  %v5253_v5 = vpop.eup %5252  ;;  %5264 = vrcp.f32 %v6502_v46 }
 0x3ab   :  { %v6505_v15 = vpop.f32.mrf.mxu0  ;;  %v5255_v39 = vpop.eup %5254  ;;  %5266 = vrcp.f32 %v6496_v36 }
 0x3ac   :  { %811 = vperm.xlu1 %5113, %v5253_v5   ;;  %5268 = vrcp.f32 %v6505_v15 }
 0x3ad   :  { %v6508_v51 = vpop.f32.mrf.mxu0 }
 0x3af   :  { %v5257_v22 = vpop.eup %5256  ;;  %v6511_v32 = vpop.f32.mrf.mxu0 }
 0x3b0   :  { %826 = vperm.xlu1 %5113, %v5255_v39   ;;  %831 = vperm.xlu0 %5114, %v5257_v22   ;;  %v5259_v57 = vpop.eup %5258 }
 0x3b1   :  { %v6513_v50 = vpop.f32.mrf.mxu0 }
 0x3b3   :  { %v6516_v19 = vpop.f32.mrf.mxu0 }
 0x3b4   :  { %816 = vperm.xlu1 %5113, %v5259_v57   ;;  %v8451_v57 = vmov 18  }
 0x3b5   :  { %v5261_v27 = vpop.eup %5260  ;;  %v6518_v10 = vpop.f32.mrf.mxu0 }
 0x3b6   :  { %5270 = vrcp.f32 %v6518_v10  ;;  %836 = vperm.xlu0 %5114, %v5261_v27   ;;  %v5263_v38 = vpop.eup %5262  ;;  %v5157_v27 = vld [vmem:[%s8452_s30] sm:$0xff]  }
 0x3b7   :  { %v6521_v55 = vpop.f32.mrf.mxu0  ;;  %v5265_v18 = vpop.eup %5264 }
 0x3b8   :  { %821 = vperm.xlu1 %5113, %v5263_v38   ;;  %v5267_v31 = vpop.eup %5266  ;;  %5272 = vrcp.f32 %v6521_v55  ;;  %v5158_v38 = vld [vmem:[%s8452_s30 + $0x8] ss:$0 sps:$4 sm:$0x33]  }
 0x3b9   :  { %v6523_v1 = vpop.f32.mrf.mxu0  ;;  %v5269_v26 = vpop.eup %5268 }
 0x3ba   :  { %851 = vperm.xlu0 %5114, %v5265_v18   ;;  %5274 = vrcp.f32 %v6523_v1  ;;  %v8453_v18 = vmov 19  }
 0x3bb   :  { %v6526_v44 = vpop.f32.mrf.mxu0 }
 0x3bc   :  { %846 = vperm.xlu1 %5113, %v5267_v31  }
 0x3bd   :  { %v6528_v48 = vpop.f32.mrf.mxu0 }
 0x3be   :  { %5116 = vset.pattern.permute.xlu0 %v8406_v0 }
 0x3bf   :  { %v6532_v16 = vpop.f32.mrf.mxu0 }
 0x3c0   :  { %5276 = vrcp.f32 %v6532_v16  ;;  %841 = vperm.xlu1 %5113, %v5269_v26  }
 0x3c1   :  { %v6535_v9 = vpop.f32.mrf.mxu0  ;;  %5278 = vrcp.f32 %v6526_v44 }
 0x3c2   :  { %5280 = vrcp.f32 %v6511_v32 }
 0x3c3   :  { %v5271_v28 = vpop.eup %5270  ;;  %v6538_v61 = vpop.f32.mrf.mxu0  ;;  %5282 = vrcp.f32 %v6528_v48 }
 0x3c4   :  { %5115 = vset.pattern.permute.xlu1 %v8406_v0 }
 0x3c5   :  { %1283 = vperm.xlu1 %5115, %v5271_v28   ;;  %v6542_v52 = vpop.f32.mrf.mxu0  ;;  %v5273_v58 = vpop.eup %5272 }
 0x3c7   :  { %v6545_v6 = vpop.f32.mrf.mxu0  ;;  %v5275_v43 = vpop.eup %5274 }
 0x3c8   :  { %5284 = vrcp.f32 %v6545_v6 }
 0x3c9   :  { %1273 = vperm.xlu1 %5115, %v5273_v58   ;;  %v6547_v63 = vpop.f32.mrf.mxu0  ;;  %5286 = vrcp.f32 %v6516_v19 }
 0x3ca   :  { %5288 = vrcp.f32 %v6508_v51 }
 0x3cb   :  { %v6550_v4 = vpop.f32.mrf.mxu0 }
 0x3cd   :  { %v5277_v14 = vpop.eup %5276  ;;  %1288 = vperm.xlu1 %5115, %v5275_v43   ;;  %v6553_v45 = vpop.f32.mrf.mxu0 }
 0x3ce   :  { %1293 = vperm.xlu0 %5116, %v5277_v14   ;;  %v5279_v2 = vpop.eup %5278 }
 0x3cf   :  { %v6556_v13 = vpop.f32.mrf.mxu0  ;;  %v5281_v47 = vpop.eup %5280 }
 0x3d0   :  { %5290 = vrcp.f32 %v6556_v13  ;;  %v5283_v7 = vpop.eup %5282 }
 0x3d1   :  { %1278 = vperm.xlu1 %5115, %v5279_v2   ;;  %5292 = vrcp.f32 %v6513_v50  ;;  %v6578_v37 = vpop.f32.mrf.mxu0 }
 0x3d2   :  { %5117 = vset.pattern.permute.xlu0 %v8404_v34  ;;  %5294 = vrcp.f32 %v6535_v9 }
 0x3d3   :  { %856 = vperm.xlu0 %5117, %v5281_v47   ;;  %5296 = vrcp.f32 %v6538_v61  ;;  %v6581_v54 = vpop.f32.mrf.mxu0 }
 0x3d4   :  { %5298 = vrcp.f32 %v6542_v52 }
 0x3d5   :  { %1303 = vperm.xlu1 %5115, %v5283_v7   ;;  %v5285_v56 = vpop.eup %5284  ;;  %5300 = vrcp.f32 %v6547_v63 }
 0x3d6   :  { %v5287_v12 = vpop.eup %5286  ;;  %5302 = vrcp.f32 %v6550_v4 }
 0x3d7   :  { %5120 = vset.pattern.permute.xlu0 %v8406_v0  ;;  %v5289_v21 = vpop.eup %5288  ;;  %5304 = vrcp.f32 %v6553_v45 }
 0x3d8   :  { %1313 = vperm.xlu0 %5120, %v5285_v56   ;;  %5306 = vrcp.f32 %v6581_v54 }
 0x3d9   :  { %5118 = vset.pattern.permute.xlu1 %v8404_v34  ;;  %5308 = vrcp.f32 %v6578_v37 }
 0x3da   :  { %861 = vperm.xlu1 %5118, %v5287_v12  }
 0x3dd   :  { %v5291_v53 = vpop.eup %5290 }
 0x3de   :  { %866 = vperm.xlu1 %5118, %v5289_v21   ;;  %1333 = vperm.xlu0 %5120, %v5291_v53   ;;  %v5293_v30 = vpop.eup %5292 }
 0x3df   :  { %v5295_v20 = vpop.eup %5294 }
 0x3e0   :  { %v5297_v41 = vpop.eup %5296 }
 0x3e1   :  { %v5299_v33 = vpop.eup %5298 }
 0x3e2   :  { %5119 = vset.pattern.permute.xlu1 %v8406_v0  ;;  %5121 = vset.pattern.permute.xlu0 %v8404_v34  ;;  %v5301_v3 = vpop.eup %5300 }
 0x3e3   :  { %1308 = vperm.xlu1 %5119, %v5295_v20   ;;  %871 = vperm.xlu0 %5121, %v5293_v30   ;;  %v5303_v11 = vpop.eup %5302 }
 0x3e4   :  { %v5305_v5 = vpop.eup %5304 }
 0x3e5   :  { %v5307_v39 = vpop.eup %5306 }
 0x3e6   :  { %v5309_v22 = vpop.eup %5308 }
 0x3e7   :  { %1298 = vperm.xlu1 %5119, %v5297_v41  }
 0x3eb   :  { %1323 = vperm.xlu1 %5119, %v5299_v33  }
 0x3ef   :  { %1328 = vperm.xlu1 %5119, %v5301_v3  }
 0x3f3   :  { %1318 = vperm.xlu1 %5119, %v5303_v11  }
 0x3f7   :  { %1343 = vperm.xlu1 %5119, %v5305_v5  }
 0x3fb   :  { %1338 = vperm.xlu1 %5119, %v5307_v39  }
 0x3ff   :  { %1348 = vperm.xlu1 %5119, %v5309_v22  }
 0x401   :  { %1595 = vxpose.xlu0.c.b16.start [1/2] (short) (narrow) %v5157_v27, 16 }
 0x403   :  { %5122 = vset.pattern.permute.xlu1 %v8451_v57 }
 0x405   :  { %1596 = vxpose.xlu0.c.b16.end [2/2] (short) (narrow) %v5158_v38, 16  ;;  %v6610_v38 = vld [vmem:[#allocation7] ss:$0 sm:$0xff] }
 0x40e   :  { %5123 = vset.pattern.permute.xlu0 %v8453_v18 }
 0x41f   :  { %v807_v31 = vpop.permute.xlu1 %806 }
 0x420   :  { %v876_v20 = vmul.f32 %v6474_v23, %v807_v31 }
 0x423   :  { %v797_v26 = vpop.permute.xlu1 %796 }
 0x424   :  { %v874_v21 = vmul.f32 %v797_v26, %v6477_v62 }
 0x425   :  { %v802_v17 = vpop.permute.xlu0 %801 }
 0x426   :  { %v875_v39 = vmul.f32 %v802_v17, %v6482_v24 }
 0x427   :  { %v812_v28 = vpop.permute.xlu1 %811 }
 0x428   :  { %v877_v53 = vmul.f32 %v6479_v8, %v812_v28 }
 0x42b   :  { %v827_v58 = vpop.permute.xlu1 %826  ;;  %v832_v3 = vpop.permute.xlu0 %831 }
 0x42f   :  { %v817_v43 = vpop.permute.xlu1 %816 }
 0x431   :  { %v837_v27 = vpop.permute.xlu0 %836 }
 0x433   :  { %v822_v14 = vpop.permute.xlu1 %821 }
 0x437   :  { %v6593_v2 = vpop.permute.xlu1 %846 }
 0x43b   :  { %v6595_v47 = vpop.permute.xlu1 %841 }
 0x440   :  { %v1284_v42 = vpop.permute.xlu1 %1283 }
 0x441   :  { %v1353_v12 = vmul.f32 %v6518_v10, %v1284_v42 }
 0x443   :  { %v1369_v11 = vadd.f32 %v1353_v12, %v876_v20  ;;  %v881_v20 = vmul.f32 %v6491_v29, %v832_v3 }
 0x444   :  { %v1274_v7 = vpop.permute.xlu1 %1273 }
 0x445   :  { %v1351_v56 = vmul.f32 %v1274_v7, %v6521_v55  ;;  %v6604_v55 = vld [vmem:[#allocation5] ss:$0 sm:$0xff] }
 0x447   :  { %v1367_v41 = vadd.f32 %v1351_v56, %v874_v21  ;;  %v852_v56 = vpop.permute.xlu0 %851 }
 0x448   :  { %v1289_v40 = vpop.permute.xlu1 %1288 }
 0x449   :  { %v1354_v30 = vmul.f32 %v6523_v1, %v1289_v40  ;;  %v1390_v62 = vmul.f32 %v6604_v55, %v1367_v41  ;;  %v1392_v1 = vmul.f32 %v6604_v55, %v1369_v11  ;;  %v878_v41 = vmul.f32 %v817_v43, %v6488_v25 }
 0x44a   :  { %v880_v11 = vmul.f32 %v6485_v35, %v827_v58 }
 0x44b   :  { %v1370_v33 = vadd.f32 %v1354_v30, %v877_v53  ;;  %v1413_v24 = vadd.f32 %v6610_v38, %v1390_v62  ;;  %v1294_v40 = vpop.permute.xlu0 %1293 }
 0x44c   :  { %v1279_v5 = vpop.permute.xlu1 %1278  ;;  %v1355_v21 = vmul.f32 %v1294_v40, %v6532_v16 }
 0x44d   :  { %v1352_v10 = vmul.f32 %v1279_v5, %v6526_v44  ;;  %v1393_v22 = vmul.f32 %v6604_v55, %v1370_v33  ;;  %v1415_v44 = vadd.f32 %v6610_v38, %v1392_v1 }
 0x44f   :  { %v1368_v8 = vadd.f32 %v1352_v10, %v875_v39  ;;  %v1416_v26 = vadd.f32 %v6610_v38, %v1393_v22  ;;  %v857_v5 = vpop.permute.xlu0 %856  ;;  %v1371_v39 = vadd.f32 %v1355_v21, %v878_v41 }
 0x450   :  { %v1304_v23 = vpop.permute.xlu1 %1303 }
 0x451   :  { %v1391_v31 = vmul.f32 %v6604_v55, %v1368_v8  ;;  %v1430_v17 = vpack.c.bf16 %v1416_v26, %v1415_v44  ;;  %v1357_v53 = vmul.f32 %v6528_v48, %v1304_v23  ;;  %v879_v8 = vmul.f32 %v822_v14, %v6494_v59 }
 0x452   :  { %v1394_v1 = vmul.f32 %v6604_v55, %v1371_v39  ;;  %v882_v26 = vmul.f32 %v837_v27, %v6499_v49  ;;  %v883_v49 = vmul.f32 %v6595_v47, %v6505_v15 }
 0x453   :  { %v1414_v28 = vadd.f32 %v6610_v38, %v1391_v31  ;;  %v1373_v22 = vadd.f32 %v1357_v53, %v880_v11  ;;  %v1314_v43 = vpop.permute.xlu0 %1313 }
 0x454   :  { %v1417_v3 = vadd.f32 %v6610_v38, %v1394_v1  ;;  %v1359_v23 = vmul.f32 %v1314_v43, %v6545_v6 }
 0x455   :  { %v6617_v42 = vpop.permute.xlu1 %861  ;;  %v1429_v7 = vpack.c.bf16 %v1414_v28, %v1413_v24  ;;  %v1396_v25 = vmul.f32 %v6604_v55, %v1373_v22  ;;  %v885_v24 = vmul.f32 %v6502_v46, %v852_v56 }
 0x456   :  { %v1375_v40 = vadd.f32 %v1359_v23, %v882_v26 }
 0x457   :  { %4818 = vmatprep.mubr.msk.bf16.mxu1 %vm311_vm3, %v1429_v7  ;;  %v884_v7 = vmul.f32 %v6496_v36, %v6593_v2 }
 0x458   :  { %4819 = vmatmul.mubr.msk.bf16.vlgmr.msra.gmra.mxu1 %vm311_vm3, %v1430_v17  ;;  %v1398_v27 = vmul.f32 %v6604_v55, %v1375_v40 }
 0x459   :  { %v867_v12 = vpop.permute.xlu1 %866  ;;  %v1334_v21 = vpop.permute.xlu0 %1333 }
 0x45a   :  { %v1363_v36 = vmul.f32 %v1334_v21, %v6556_v13  ;;  %v1421_v15 = vadd.f32 %v6610_v38, %v1398_v27  ;;  %v888_v22 = vmul.f32 %v6508_v51, %v867_v12 }
 0x45e   :  { %v1309_v30 = vpop.permute.xlu1 %1308 }
 0x45f   :  { %v1358_v33 = vmul.f32 %v6535_v9, %v1309_v30 }
 0x461   :  { %v1374_v10 = vadd.f32 %v1358_v33, %v881_v20  ;;  %v886_v20 = vmul.f32 %v857_v5, %v6511_v32 }
 0x462   :  { %v1299_v62 = vpop.permute.xlu1 %1298 }
 0x463   :  { %v1356_v16 = vmul.f32 %v1299_v62, %v6538_v61  ;;  %v1397_v48 = vmul.f32 %v6604_v55, %v1374_v10  ;;  %v1419_v61 = vadd.f32 %v6610_v38, %v1396_v25  ;;  %v1379_v47 = vadd.f32 %v1363_v36, %v886_v20  ;;  %v872_v62 = vpop.permute.xlu0 %871 }
 0x464   :  { %v887_v10 = vmul.f32 %v6617_v42, %v6516_v19 }
 0x465   :  { %v1372_v29 = vadd.f32 %v1356_v16, %v879_v8  ;;  %v1420_v58 = vadd.f32 %v6610_v38, %v1397_v48  ;;  %v1402_v16 = vmul.f32 %v6604_v55, %v1379_v47 }
 0x466   :  { %v1324_v9 = vpop.permute.xlu1 %1323 }
 0x467   :  { %v1395_v35 = vmul.f32 %v6604_v55, %v1372_v29  ;;  %v1361_v14 = vmul.f32 %v6542_v52, %v1324_v9  ;;  %v1432_v17 = vpack.c.bf16 %v1420_v58, %v1419_v61  ;;  %v889_v29 = vmul.f32 %v6513_v50, %v872_v62 }
 0x469   :  { %v1418_v59 = vadd.f32 %v6610_v38, %v1395_v35  ;;  %v1377_v53 = vadd.f32 %v1361_v14, %v884_v7 }
 0x46a   :  { %v1329_v31 = vpop.permute.xlu1 %1328 }
 0x46b   :  { %v1362_v28 = vmul.f32 %v6547_v63, %v1329_v31  ;;  %v1431_v44 = vpack.c.bf16 %v1418_v59, %v1417_v3  ;;  %v1400_v56 = vmul.f32 %v6604_v55, %v1377_v53  ;;  %v6686_v3 = vld [vmem:[%s8371_s12] sm:$0x3] }
 0x46d   :  { %v1378_v6 = vadd.f32 %v1362_v28, %v885_v24  ;;  %4822 = vmatprep.mubr.msk.bf16.mxu1 %vm311_vm3, %v1431_v44  ;;  %v1423_v39 = vadd.f32 %v6610_v38, %v1400_v56 }
 0x46e   :  { %4823 = vmatmul.mubr.msk.bf16.gmra.mxu1 %vm311_vm3, %v1432_v17  ;;  %v1319_v52 = vpop.permute.xlu1 %1318 }
 0x46f   :  { %v1360_v46 = vmul.f32 %v1319_v52, %v6550_v4  ;;  %v1401_v63 = vmul.f32 %v6604_v55, %v1378_v6 }
 0x471   :  { %v1376_v2 = vadd.f32 %v1360_v46, %v883_v49  ;;  %v1424_v33 = vadd.f32 %v6610_v38, %v1401_v63 }
 0x472   :  { %v1344_v30 = vpop.permute.xlu1 %1343 }
 0x473   :  { %v1399_v41 = vmul.f32 %v6604_v55, %v1376_v2  ;;  %v1365_v11 = vmul.f32 %v6553_v45, %v1344_v30  ;;  %v1434_v8 = vpack.c.bf16 %v1424_v33, %v1423_v39 }
 0x475   :  { %v1422_v4 = vadd.f32 %v6610_v38, %v1399_v41  ;;  %v1381_v48 = vadd.f32 %v1365_v11, %v888_v22 }
 0x476   :  { %v1339_v13 = vpop.permute.xlu1 %1338 }
 0x477   :  { %v1364_v32 = vmul.f32 %v1339_v13, %v6581_v54  ;;  %v1433_v5 = vpack.c.bf16 %v1422_v4, %v1421_v15  ;;  %v1425_v54 = vadd.f32 %v6610_v38, %v1402_v16  ;;  %v1404_v42 = vmul.f32 %v6604_v55, %v1381_v48 }
 0x479   :  { %v1380_v1 = vadd.f32 %v1364_v32, %v887_v10  ;;  %4826 = vmatprep.mubr.msk.bf16.mxu1 %vm311_vm3, %v1433_v5  ;;  %v1427_v35 = vadd.f32 %v6610_v38, %v1404_v42 }
 0x47a   :  { %4827 = vmatmul.mubr.msk.bf16.gmra.mxu1 %vm311_vm3, %v1434_v8  ;;  %v1349_v45 = vpop.permute.xlu1 %1348 }
 0x47b   :  { %v1403_v19 = vmul.f32 %v6604_v55, %v1380_v1  ;;  %v1366_v51 = vmul.f32 %v6578_v37, %v1349_v45  ;;  %v6681_v37 = vld [vmem:[%s8454_s11] sm:$0x3] }
 0x47d   :  { %v1426_v12 = vadd.f32 %v6610_v38, %v1403_v19  ;;  %v1382_v25 = vadd.f32 %v1366_v51, %v889_v29  ;;  %v8459_v51 = vld [vmem:[#allocation15_spill] sm:$0xff] }
 0x47f   :  { %v1405_v43 = vmul.f32 %v6604_v55, %v1382_v25  ;;  %v1435_v9 = vpack.c.bf16 %v1426_v12, %v1425_v54  ;;  %v8455_v55 = vld [vmem:[#allocation12_spill] sm:$0xff]  ;;  %v6791_v54 = vrot.slane %v6681_v37, %v8459_v51 }
 0x480   :  { %v6690_v23 = vrot.slane %v6681_v37, %v8455_v55 }
 0x481   :  { %v1428_v58 = vadd.f32 %v6610_v38, %v1405_v43  ;;  %4830 = vmatprep.mubr.msk.bf16.mxu1 %vm311_vm3, %v1435_v9  ;;  %v6694_v38 = vrot.slane %v6686_v3, %v8455_v55 }
 0x483   :  { %v1436_v50 = vpack.c.bf16 %v1428_v58, %v1427_v35 }
 0x485   :  { %4831 = vmatmul.mubr.msk.bf16.gmra.mxu1 %vm311_vm3, %v1436_v50  ;;  %v6811_v50 = vrot.slane %v6686_v3, %v8459_v51 }
 0x518   :  { %v6696_v59 = vpop.f32.mrf.mxu1 }
 0x519   :  { %1692 = vperm.xlu1 %5122, %v6696_v59   ;;  %v2399_v61 = vmul.f32 %v6696_v59, %v6690_v23 }
 0x51a   :  { %v6701_v14 = vpop.f32.mrf.mxu1 }
 0x51b   :  { %2174 = vperm.xlu0 %5123, %v6701_v14   ;;  %v2419_v31 = vadd.f32 %v6694_v38, %v2399_v61  ;;  %v2397_v26 = vmul.f32 %v6690_v23, %v6701_v14 }
 0x51c   :  { %v6707_v24 = vpop.f32.mrf.mxu1 }
 0x51d   :  { %1682 = vperm.xlu1 %5122, %v6701_v14   ;;  %v1575_v28 = vpack.c.bf16 %v6707_v24, %v6696_v59  ;;  %v2400_v44 = vmul.f32 %v6707_v24, %v6690_v23  ;;  %v2417_v17 = vadd.f32 %v6694_v38, %v2397_v26 }
 0x51e   :  { %v6714_v7 = vpop.f32.mrf.mxu1 }
 0x51f   :  { %5126 = vset.pattern.permute.xlu0 %v8451_v57  ;;  %v1574_v40 = vpack.c.bf16 %v6714_v7, %v6701_v14  ;;  %v2420_v6 = vadd.f32 %v6694_v38, %v2400_v44  ;;  %v2398_v21 = vmul.f32 %v6690_v23, %v6714_v7 }
 0x521   :  { %1697 = vperm.xlu1 %5122, %v6707_v24   ;;  %v6724_v53 = vpack.c.bf16 %v2420_v6, %v2419_v31  ;;  %v2418_v52 = vadd.f32 %v6694_v38, %v2398_v21 }
 0x523   :  { %8456 = vst [vmem:[#allocation13_spill] sm:$0xff] %v6724_v53  ;;  %v6727_v49 = vpack.c.bf16 %v2418_v52, %v2417_v17 }
 0x525   :  { %8457 = vst [vmem:[#allocation14_spill] sm:$0xff] %v6727_v49  ;;  %1687 = vperm.xlu1 %5122, %v6714_v7  }
 0x529   :  { %5124 = vset.pattern.permute.xlu1 %v8453_v18 }
 0x52a   :  { %2178 = vperm.xlu1 %5124, %v6714_v7  }
 0x52e   :  { %5125 = vset.pattern.permute.xlu1 %v8451_v57  ;;  %v6733_v46 = vpop.f32.mrf.mxu1 }
 0x52f   :  { %1712 = vperm.xlu1 %5125, %v6733_v46   ;;  %v2403_v63 = vmul.f32 %v6733_v46, %v6690_v23 }
 0x530   :  { %v6738_v27 = vpop.f32.mrf.mxu1 }
 0x531   :  { %v2423_v36 = vadd.f32 %v6694_v38, %v2403_v63  ;;  %v2401_v2 = vmul.f32 %v6690_v23, %v6738_v27 }
 0x532   :  { %v6743_v56 = vpop.f32.mrf.mxu1 }
 0x533   :  { %1702 = vperm.xlu1 %5125, %v6738_v27   ;;  %v2404_v30 = vmul.f32 %v6743_v56, %v6690_v23  ;;  %v2421_v41 = vadd.f32 %v6694_v38, %v2401_v2 }
 0x534   :  { %v6748_v20 = vpop.f32.mrf.mxu1 }
 0x535   :  { %v2424_v33 = vadd.f32 %v6694_v38, %v2404_v30  ;;  %v2402_v15 = vmul.f32 %v6690_v23, %v6748_v20 }
 0x537   :  { %1717 = vperm.xlu1 %5125, %v6743_v56   ;;  %v6755_v47 = vpack.c.bf16 %v2424_v33, %v2423_v36  ;;  %v2422_v4 = vadd.f32 %v6694_v38, %v2402_v15 }
 0x539   :  { %v6760_v39 = vpack.c.bf16 %v2422_v4, %v2421_v41 }
 0x53a   :  { %v6758_v11 = vpop.f32.mrf.mxu1 }
 0x53b   :  { %8458 = vst [vmem:[#allocation16_spill] sm:$0xff] %v6760_v39  ;;  %1707 = vperm.xlu1 %5125, %v6748_v20   ;;  %v2407_v13 = vmul.f32 %v6758_v11, %v6690_v23  ;;  %v1930_v21 = vmul.f32 %v6758_v11, %v6791_v54 }
 0x53c   :  { %v6765_v10 = vpop.f32.mrf.mxu1 }
 0x53d   :  { %v2427_v22 = vadd.f32 %v6694_v38, %v2407_v13  ;;  %v2405_v32 = vmul.f32 %v6690_v23, %v6765_v10 }
 0x53e   :  { %v6770_v5 = vpop.f32.mrf.mxu1 }
 0x53f   :  { %1732 = vperm.xlu1 %5125, %v6758_v11   ;;  %v2408_v62 = vmul.f32 %v6770_v5, %v6690_v23  ;;  %v2425_v16 = vadd.f32 %v6694_v38, %v2405_v32  ;;  %v1931_v31 = vmul.f32 %v6770_v5, %v6791_v54  ;;  %v1928_v32 = vmul.f32 %v6791_v54, %v6765_v10 }
 0x540   :  { %v6775_v8 = vpop.f32.mrf.mxu1 }
 0x541   :  { %1727 = vperm.xlu0 %5126, %v6775_v8   ;;  %v2428_v48 = vadd.f32 %v6694_v38, %v2408_v62  ;;  %v2406_v1 = vmul.f32 %v6690_v23, %v6775_v8  ;;  %v1951_v15 = vadd.f32 %v6811_v50, %v1931_v31  ;;  %v1929_v4 = vmul.f32 %v6791_v54, %v6775_v8 }
 0x543   :  { %1722 = vperm.xlu1 %5125, %v6765_v10   ;;  %v6783_v45 = vpack.c.bf16 %v2428_v48, %v2427_v22  ;;  %v2426_v29 = vadd.f32 %v6694_v38, %v2406_v1  ;;  %v1950_v22 = vadd.f32 %v6811_v50, %v1930_v21  ;;  %v1949_v48 = vadd.f32 %v6811_v50, %v1929_v4 }
 0x544   :  { %v1927_v1 = vmul.f32 %v6743_v56, %v6791_v54 }
 0x545   :  { %v6786_v19 = vpop.f32.mrf.mxu1  ;;  %v6793_v42 = vpack.c.bf16 %v2426_v29, %v2425_v16  ;;  %v1961_v16 = vpack.c.bf16 %v1951_v15, %v1950_v22  ;;  %v1948_v29 = vadd.f32 %v6811_v50, %v1928_v32  ;;  %v1577_v22 = vpack.c.bf16 %v6743_v56, %v6733_v46 }
 0x546   :  { %1752 = vperm.xlu0 %5126, %v6786_v19   ;;  %v1934_v25 = vmul.f32 %v6786_v19, %v6791_v54 }
 0x547   :  { %1737 = vperm.xlu1 %5125, %v6770_v5   ;;  %v6796_v12 = vpop.f32.mrf.mxu1 }
 0x548   :  { %v2409_v43 = vmul.f32 %v6690_v23, %v6796_v12  ;;  %v1932_v37 = vmul.f32 %v6791_v54, %v6796_v12  ;;  %v1954_v17 = vadd.f32 %v6811_v50, %v1934_v25  ;;  %v1926_v25 = vmul.f32 %v6733_v46, %v6791_v54 }
 0x549   :  { %v6802_v9 = vpop.f32.mrf.mxu1 }
 0x54a   :  { %1742 = vperm.xlu0 %5126, %v6796_v12   ;;  %v1581_v35 = vpack.c.bf16 %v6802_v9, %v6786_v19  ;;  %v1935_v58 = vmul.f32 %v6802_v9, %v6791_v54  ;;  %v2429_v26 = vadd.f32 %v6694_v38, %v2409_v43  ;;  %v1952_v36 = vadd.f32 %v6811_v50, %v1932_v37 }
 0x54b   :  { %1757 = vperm.xlu1 %5125, %v6802_v9   ;;  %v6816_v61 = vpop.f32.mrf.mxu1  ;;  %v1960_v43 = vpack.c.bf16 %v1949_v48, %v1948_v29  ;;  %v1925_v37 = vmul.f32 %v6791_v54, %v6748_v20  ;;  %v1946_v31 = vadd.f32 %v6811_v50, %v1926_v25 }
 0x54c   :  { %v1636_v44 = vsel %vm311_vm3, %v1581_v35, 0  ;;  %v1955_v6 = vadd.f32 %v6811_v50, %v1935_v58  ;;  %v1933_v3 = vmul.f32 %v6791_v54, %v6816_v61  ;;  %v2410_v52 = vmul.f32 %v6690_v23, %v6816_v61 }
 0x54d   :  { %4835 = vmatpush3.bf16.xpose.msra.mxu0 %v1636_v44  ;;  %v1580_v33 = vpack.c.bf16 %v6816_v61, %v6796_v12  ;;  %v1579_v35 = vpack.c.bf16 %v6770_v5, %v6758_v11  ;;  %v1947_v58 = vadd.f32 %v6811_v50, %v1927_v1 }
 0x54e   :  { %5128 = vset.pattern.permute.xlu0 %v8453_v18  ;;  %v1963_v63 = vpack.c.bf16 %v1955_v6, %v1954_v17  ;;  %v1953_v2 = vadd.f32 %v6811_v50, %v1933_v3  ;;  %4836 = vmatprep.subr.bf16.mxu0 %v8449_v60  ;;  %v2430_v30 = vadd.f32 %v6694_v38, %v2410_v52 }
 0x54f   :  { %2186 = vperm.xlu0 %5128, %v6707_v24   ;;  %1747 = vperm.xlu1 %5125, %v6816_v61   ;;  %v1633_v62 = vsel %vm311_vm3, %v1580_v33, 0  ;;  %v1630_v44 = vsel %vm311_vm3, %v1579_v35, 0  ;;  %v1959_v17 = vpack.c.bf16 %v1947_v58, %v1946_v31  ;;  %v1945_v6 = vadd.f32 %v6811_v50, %v1925_v37 }
 0x550   :  { %4854 = vmatprep.subr.bf16.mxu1 %v1963_v63  ;;  %v1962_v41 = vpack.c.bf16 %v1953_v2, %v1952_v36  ;;  %v6842_v13 = vpack.c.bf16 %v2430_v30, %v2429_v26  ;;  %v1924_v26 = vmul.f32 %v6791_v54, %v6738_v27  ;;  %v1923_v3 = vmul.f32 %v6707_v24, %v6791_v54 }
 0x551   :  { %4855 = vmatpush3.bf16.msra.mxu1 %v1963_v63  ;;  %v1922_v52 = vmul.f32 %v6696_v59, %v6791_v54  ;;  %v1578_v36 = vpack.c.bf16 %v6775_v8, %v6765_v10  ;;  %v1921_v30 = vmul.f32 %v6791_v54, %v6714_v7  ;;  %v1920_v33 = vmul.f32 %v6791_v54, %v6701_v14 }
 0x552   :  { %4856 = vmatprep.subr.bf16.mxu1 %v1962_v41  ;;  %v1944_v21 = vadd.f32 %v6811_v50, %v1924_v26  ;;  %v1943_v2 = vadd.f32 %v6811_v50, %v1923_v3  ;;  %v2411_v54 = vmul.f32 %v6786_v19, %v6690_v23 }
 0x553   :  { %2194 = vperm.xlu0 %5128, %v6748_v20   ;;  %5127 = vset.pattern.permute.xlu1 %v8453_v18  ;;  %v1940_v4 = vadd.f32 %v6811_v50, %v1920_v33 }
 0x554   :  { %2182 = vperm.xlu1 %5127, %v6696_v59   ;;  %v1958_v63 = vpack.c.bf16 %v1945_v6, %v1944_v21  ;;  %v2431_v32 = vadd.f32 %v6694_v38, %v2411_v54  ;;  %v6949_v54 = vld [vmem:[%s8446_s6 + $0x8] sm:$0xff] }
 0x555   :  { %4837 = vmatpush3.bf16.xpose.msra.mxu0 %v1633_v62  ;;  %4857 = vmatpush3.bf16.msra.mxu1 %v1962_v41  ;;  %v1942_v41 = vadd.f32 %v6811_v50, %v1922_v52 }
 0x556   :  { %4858 = vmatprep.subr.bf16.mxu1 %v1961_v16  ;;  %4838 = vmatprep.subr.bf16.mxu0 %v8449_v60 }
 0x557   :  { %2202 = vperm.xlu0 %5128, %v6743_v56   ;;  %v1957_v15 = vpack.c.bf16 %v1943_v2, %v1942_v41  ;;  %v1618_v56 = vsel %vm311_vm3, %v1575_v28, 0 }
 0x558   :  { %2190 = vperm.xlu1 %5127, %v6738_v27  }
 0x559   :  { %4859 = vmatpush3.bf16.msra.mxu1 %v1961_v16 }
 0x55a   :  { %4860 = vmatprep.subr.bf16.mxu1 %v1960_v43 }
 0x55b   :  { %2210 = vperm.xlu0 %5128, %v6775_v8   ;;  %v2412_v8 = vmul.f32 %v6802_v9, %v6690_v23  ;;  %v1624_v23 = vsel %vm311_vm3, %v1577_v22, 0  ;;  %v6957_v22 = vld [vmem:[%s8446_s6] sm:$0xff] }
 0x55c   :  { %2198 = vperm.xlu1 %5127, %v6733_v46   ;;  %v1576_v46 = vpack.c.bf16 %v6748_v20, %v6738_v27  ;;  %v1615_v27 = vsel %vm311_vm3, %v1574_v40, 0  ;;  %v1603_v20 = vpop.trf.xlu0 }
 0x55d   :  { %4839 = vmatpush3.bf16.xpose.msra.mxu0 %v1630_v44  ;;  %4861 = vmatpush3.bf16.msra.mxu1 %v1960_v43 }
 0x55e   :  { %4862 = vmatprep.subr.bf16.mxu1 %v1959_v17  ;;  %4840 = vmatprep.subr.bf16.mxu0 %v8449_v60 }
 0x55f   :  { %2218 = vperm.xlu0 %5128, %v6770_v5   ;;  %v1627_v5 = vsel %vm311_vm3, %v1578_v36, 0 }
 0x560   :  { %2206 = vperm.xlu1 %5127, %v6765_v10   ;;  %v1941_v10 = vadd.f32 %v6811_v50, %v1921_v30 }
 0x561   :  { %4863 = vmatpush3.bf16.msra.mxu1 %v1959_v17 }
 0x562   :  { %4864 = vmatprep.subr.bf16.mxu1 %v1958_v63 }
 0x563   :  { %2234 = vperm.xlu0 %5128, %v6802_v9   ;;  %v2432_v9 = vadd.f32 %v6694_v38, %v2412_v8  ;;  %v1621_v38 = vsel %vm311_vm3, %v1576_v46, 0 }
 0x564   :  { %2214 = vperm.xlu1 %5127, %v6758_v11   ;;  %v1956_v11 = vpack.c.bf16 %v1941_v10, %v1940_v4 }
 0x565   :  { %4841 = vmatpush3.bf16.xpose.msra.mxu0 %v1627_v5  ;;  %4865 = vmatpush3.bf16.msra.mxu1 %v1958_v63  ;;  %v6907_v50 = vpack.c.bf16 %v2432_v9, %v2431_v32 }
 0x566   :  { %4866 = vmatprep.subr.bf16.mxu1 %v1957_v15  ;;  %4842 = vmatprep.subr.bf16.mxu0 %v8449_v60 }
 0x567   :  { %2226 = vperm.xlu0 %5128, %v6816_v61  }
 0x568   :  { %2222 = vperm.xlu1 %5127, %v6796_v12  }
 0x569   :  { %4867 = vmatpush3.bf16.msra.mxu1 %v1957_v15 }
 0x56a   :  { %4868 = vmatprep.subr.bf16.mxu1 %v1956_v11 }
 0x56b   :  { %5130 = vset.pattern.permute.xlu0 %v8404_v34 }
 0x56c   :  { %2230 = vperm.xlu1 %5127, %v6786_v19  }
 0x56d   :  { %4843 = vmatpush3.bf16.xpose.msra.mxu0 %v1624_v23  ;;  %4869 = vmatpush3.bf16.msra.mxu1 %v1956_v11 }
 0x56e   :  { %4886 = vmatprep.subr.bf16.mxu1 %v6907_v50  ;;  %4844 = vmatprep.subr.bf16.mxu0 %v8449_v60 }
 0x570   :  { %5129 = vset.pattern.permute.xlu1 %v8404_v34 }
 0x575   :  { %4845 = vmatpush3.bf16.xpose.msra.mxu0 %v1621_v38 }
 0x576   :  { %4846 = vmatprep.subr.bf16.mxu0 %v8449_v60 }
 0x57d   :  { %4847 = vmatpush3.bf16.xpose.msra.mxu0 %v1618_v56 }
 0x57e   :  { %4848 = vmatprep.subr.bf16.mxu0 %v8449_v60 }
 0x585   :  { %4849 = vmatpush3.bf16.xpose.msra.mxu0 %v1615_v27 }
 0x58c   :  { %4851 = vmatmul.mubr.msk.bf16.vlgmr.msra.gmra.mxu0 %vm311_vm3, %v1603_v20 }
 0x594   :  { %v1693_v19 = vpop.permute.xlu1 %1692 }
 0x596   :  { %v6928_v29 = vpop.permute.xlu0 %2174 }
 0x598   :  { %v1683_v12 = vpop.permute.xlu1 %1682 }
 0x59c   :  { %v1698_v61 = vpop.permute.xlu1 %1697 }
 0x5a0   :  { %v1688_v62 = vpop.permute.xlu1 %1687 }
 0x5a5   :  { %v6926_v16 = vpop.permute.xlu1 %2178 }
 0x5aa   :  { %v1713_v59 = vpop.permute.xlu1 %1712 }
 0x5ae   :  { %v1703_v24 = vpop.permute.xlu1 %1702 }
 0x5b2   :  { %v1718_v28 = vpop.permute.xlu1 %1717 }
 0x5b6   :  { %v1708_v48 = vpop.permute.xlu1 %1707 }
 0x5ba   :  { %v1733_v1 = vpop.permute.xlu1 %1732 }
 0x5bc   :  { %v1728_v7 = vpop.permute.xlu0 %1727 }
 0x5be   :  { %v1723_v14 = vpop.permute.xlu1 %1722 }
 0x5c1   :  { %v6936_v58 = vpop.permute.xlu0 %1752 }
 0x5c2   :  { %v1738_v25 = vpop.permute.xlu1 %1737 }
 0x5c5   :  { %v1743_v4 = vpop.permute.xlu0 %1742 }
 0x5c6   :  { %v1758_v30 = vpop.permute.xlu1 %1757 }
 0x5ca   :  { %v1748_v20 = vpop.permute.xlu1 %1747 }
 0x64c   :  { %v6930_v40 = vpop.f32.mrf.mxu0 }
 0x64d   :  { %v6934_v43 = vrot.slane %v6930_v40, %v8459_v51 }
 0x64e   :  { %v4852_v35 = vpop.f32.mrf.mxu0 }
 0x64f   :  { %v1765_v37 = vadd.f32 %v6934_v43, %v1688_v62  ;;  %v1764_v31 = vadd.f32 %v6934_v43, %v1683_v12  ;;  %v1766_v26 = vadd.f32 %v6934_v43, %v1693_v19  ;;  %v1767_v44 = vadd.f32 %v6934_v43, %v1698_v61  ;;  %v6967_v19 = vld [vmem:[%s8446_s6 + $0x10] sm:$0xff]  ;;  %v6975_v61 = vld [vmem:[%s8446_s6 + $0x18] sm:$0xff] }
 0x650   :  { %v1675_v17 = vpop.f32.mrf.mxu0  ;;  %v1768_v6 = vadd.f32 %v6934_v43, %v1703_v24  ;;  %v1769_v3 = vadd.f32 %v6934_v43, %v1708_v48  ;;  %v1770_v10 = vadd.f32 %v6934_v43, %v1713_v59  ;;  %v1771_v8 = vadd.f32 %v6934_v43, %v1718_v28  ;;  %v6982_v28 = vpop.permute.xlu0 %2186  ;;  %v6989_v48 = vld [vmem:[%s8446_s6 + $0x20] sm:$0xff] }
 0x651   :  { %v1781_v21 = vmul.f32 0.2, %v1765_v37  ;;  %v1780_v52 = vmul.f32 0.2, %v1764_v31  ;;  %v1782_v63 = vmul.f32 0.2, %v1766_v26  ;;  %v1772_v59 = vadd.f32 %v6934_v43, %v1723_v14 }
 0x652   :  { %v4853_v36 = vpop.f32.mrf.mxu0  ;;  %v1783_v2 = vmul.f32 0.2, %v1767_v44  ;;  %v1784_v5 = vmul.f32 0.2, %v1768_v6  ;;  %v1785_v15 = vmul.f32 0.2, %v1769_v3  ;;  %v1773_v24 = vadd.f32 %v6934_v43, %v1728_v7 }
 0x653   :  { %v1797_v41 = vmax.f32 %v1765_v37, %v1781_v21  ;;  %v1796_v33 = vmax.f32 %v1764_v31, %v1780_v52  ;;  %v1798_v32 = vmax.f32 %v1766_v26, %v1782_v63  ;;  %v1786_v56 = vmul.f32 0.2, %v1770_v10  ;;  %v6997_v14 = vld [vmem:[%s8446_s6 + $0x28] sm:$0xff]  ;;  %v7009_v21 = vld [vmem:[%s8446_s6 + $0x30] sm:$0xff]  ;;  %v7017_v63 = vld [vmem:[%s8446_s6 + $0x38] sm:$0xff] }
 0x654   :  { %v1799_v23 = vmax.f32 %v1767_v44, %v1783_v2  ;;  %v1800_v46 = vmax.f32 %v1768_v6, %v1784_v5  ;;  %v1801_v38 = vmax.f32 %v1769_v3, %v1785_v15  ;;  %v1787_v27 = vmul.f32 0.2, %v1771_v8  ;;  %v2183_v3 = vpop.permute.xlu1 %2182  ;;  %v2195_v2 = vpop.permute.xlu0 %2194 }
 0x655   :  { %v6952_v11 = vadd.f32 %v6949_v54, %v1797_v41  ;;  %v6960_v9 = vadd.f32 %v6957_v22, %v1796_v33  ;;  %v6970_v12 = vadd.f32 %v6967_v19, %v1798_v32  ;;  %v1802_v37 = vmax.f32 %v1770_v10, %v1786_v56  ;;  %v7044_v56 = vld [vmem:[%s8446_s6 + $0x48] sm:$0xff] }
 0x656   :  { %v6978_v62 = vadd.f32 %v6975_v61, %v1799_v23  ;;  %v6992_v35 = vadd.f32 %v6989_v48, %v1800_v46  ;;  %v7000_v7 = vadd.f32 %v6997_v14, %v1801_v38  ;;  %v1803_v31 = vmax.f32 %v1771_v8, %v1787_v27  ;;  %v7036_v38 = vld [vmem:[%s8446_s6 + $0x40] sm:$0xff] }
 0x657   :  { %1830 = vmax.xlane.f32.xlu0 %v6952_v11  ;;  %1828 = vmax.xlane.f32.xlu1 %v6960_v9  ;;  %v1788_v26 = vmul.f32 0.2, %v1772_v59  ;;  %v1789_v44 = vmul.f32 0.2, %v1773_v24  ;;  %v1774_v17 = vadd.f32 %v6934_v43, %v1733_v1  ;;  %v1775_v6 = vadd.f32 %v6934_v43, %v1738_v25 }
 0x658   :  { %v7012_v52 = vadd.f32 %v7009_v21, %v1802_v37  ;;  %v7020_v1 = vadd.f32 %v7017_v63, %v1803_v31  ;;  %v1776_v25 = vadd.f32 %v6934_v43, %v1743_v4  ;;  %v1777_v36 = vadd.f32 %v6934_v43, %v1748_v20  ;;  %v2191_v46 = vpop.permute.xlu1 %2190  ;;  %v7054_v31 = vld [vmem:[%s8446_s6 + $0x50] sm:$0xff] }
 0x659   :  { %v1804_v41 = vmax.f32 %v1772_v59, %v1788_v26  ;;  %v1805_v33 = vmax.f32 %v1773_v24, %v1789_v44  ;;  %v1790_v5 = vmul.f32 0.2, %v1774_v17  ;;  %v1791_v15 = vmul.f32 0.2, %v1775_v6  ;;  %v7062_v44 = vld [vmem:[%s8446_s6 + $0x58] sm:$0xff] }
 0x65a   :  { %v7026_v10 = vrot.slane %v6930_v40, %v8455_v55  ;;  %v1792_v8 = vmul.f32 0.2, %v1776_v25  ;;  %v1793_v32 = vmul.f32 0.2, %v1777_v36  ;;  %v1778_v4 = vadd.f32 %v6934_v43, %v6936_v58 }
 0x65b   :  { %1832 = vmax.xlane.f32.xlu0 %v6970_v12  ;;  %1834 = vmax.xlane.f32.xlu1 %v6978_v62  ;;  %v1779_v23 = vadd.f32 %v6934_v43, %v1758_v30  ;;  %v7039_v40 = vadd.f32 %v7036_v38, %v1804_v41  ;;  %v7047_v27 = vadd.f32 %v7044_v56, %v1805_v33  ;;  %v2203_v43 = vpop.permute.xlu0 %2202  ;;  %v7076_v41 = vld [vmem:[%s8446_s6 + $0x60] sm:$0xff] }
 0x65c   :  { %v1806_v58 = vmax.f32 %v1774_v17, %v1790_v5  ;;  %v1807_v20 = vmax.f32 %v1775_v6, %v1791_v15  ;;  %v1808_v30 = vmax.f32 %v1776_v25, %v1792_v8  ;;  %v1809_v59 = vmax.f32 %v1777_v36, %v1793_v32  ;;  %v2199_v36 = vpop.permute.xlu1 %2198 }
 0x65d   :  { %v1794_v24 = vmul.f32 0.2, %v1778_v4  ;;  %v1795_v37 = vmul.f32 0.2, %v1779_v23  ;;  %v2241_v6 = vadd.f32 %v7026_v10, %v6928_v29  ;;  %v2242_v25 = vadd.f32 %v7026_v10, %v6926_v16  ;;  %v7084_v29 = vld [vmem:[%s8446_s6 + $0x68] sm:$0xff] }
 0x65e   :  { %v7057_v26 = vadd.f32 %v7054_v31, %v1806_v58  ;;  %v7065_v17 = vadd.f32 %v7062_v44, %v1807_v20  ;;  %v7079_v33 = vadd.f32 %v7076_v41, %v1808_v30  ;;  %v7087_v16 = vadd.f32 %v7084_v29, %v1809_v59  ;;  %v7097_v30 = vld [vmem:[%s8446_s6 + $0x70] sm:$0xff] }
 0x65f   :  { %1836 = vmax.xlane.f32.xlu0 %v6992_v35  ;;  %1838 = vmax.xlane.f32.xlu1 %v7000_v7  ;;  %v1810_v5 = vmax.f32 %v1778_v4, %v1794_v24  ;;  %v1811_v15 = vmax.f32 %v1779_v23, %v1795_v37  ;;  %v2211_v8 = vpop.permute.xlu0 %2210  ;;  %v2257_v32 = vmul.f32 0.2, %v2241_v6  ;;  %v2258_v58 = vmul.f32 0.2, %v2242_v25  ;;  %v7105_v23 = vld [vmem:[%s8446_s6 + $0x78] sm:$0xff] }
 0x660   :  { %v2243_v20 = vadd.f32 %v7026_v10, %v2183_v3  ;;  %v2244_v34 = vadd.f32 %v7026_v10, %v6982_v28  ;;  %v2245_v28 = vadd.f32 %v7026_v10, %v2191_v46  ;;  %v2246_v59 = vadd.f32 %v7026_v10, %v2195_v2  ;;  %v2207_v24 = vpop.permute.xlu1 %2206 }
 0x661   :  { %v7100_v4 = vadd.f32 %v7097_v30, %v1810_v5  ;;  %v7108_v3 = vadd.f32 %v7105_v23, %v1811_v15  ;;  %v2273_v37 = vmax.f32 %v2241_v6, %v2257_v32  ;;  %v2274_v0 = vmax.f32 %v2242_v25, %v2258_v58 }
 0x662   :  { %v2259_v51 = vmul.f32 0.2, %v2243_v20  ;;  %v2260_v55 = vmul.f32 0.2, %v2244_v34  ;;  %v2261_v5 = vmul.f32 0.2, %v2245_v28  ;;  %v2247_v60 = vadd.f32 %v7026_v10, %v2199_v36 }
 0x663   :  { %1840 = vmax.xlane.f32.xlu0 %v7012_v52  ;;  %1842 = vmax.xlane.f32.xlu1 %v7020_v1  ;;  %v2219_v18 = vpop.permute.xlu0 %2218  ;;  %v2262_v57 = vmul.f32 0.2, %v2246_v59  ;;  %v2248_v15 = vadd.f32 %v7026_v10, %v2203_v43  ;;  %v7117_v46 = vadd.f32 %v6957_v22, %v2273_v37  ;;  %v7120_v2 = vadd.f32 %v6949_v54, %v2274_v0 }
 0x664   :  { %v2275_v6 = vmax.f32 %v2243_v20, %v2259_v51  ;;  %v2276_v25 = vmax.f32 %v2244_v34, %v2260_v55  ;;  %v2215_v32 = vpop.permute.xlu1 %2214  ;;  %v2277_v58 = vmax.f32 %v2245_v28, %v2261_v5  ;;  %v2263_v53 = vmul.f32 0.2, %v2247_v60 }
 0x665   :  { %v2278_v49 = vmax.f32 %v2246_v59, %v2262_v57  ;;  %v2264_v39 = vmul.f32 0.2, %v2248_v15  ;;  %v2249_v0 = vadd.f32 %v7026_v10, %v2207_v24  ;;  %v2250_v34 = vadd.f32 %v7026_v10, %v2211_v8 }
 0x666   :  { %v7125_v43 = vadd.f32 %v6967_v19, %v2275_v6  ;;  %v7128_v22 = vadd.f32 %v6975_v61, %v2276_v25  ;;  %v7135_v55 = vadd.f32 %v6989_v48, %v2277_v58  ;;  %v2279_v51 = vmax.f32 %v2247_v60, %v2263_v53 }
 0x667   :  { %1844 = vmax.xlane.f32.xlu0 %v7039_v40  ;;  %1846 = vmax.xlane.f32.xlu1 %v7047_v27  ;;  %v2235_v36 = vpop.permute.xlu0 %2234  ;;  %v7138_v57 = vadd.f32 %v6997_v14, %v2278_v49  ;;  %v2280_v54 = vmax.f32 %v2248_v15, %v2264_v39  ;;  %v2265_v20 = vmul.f32 0.2, %v2249_v0  ;;  %v2266_v61 = vmul.f32 0.2, %v2250_v34 }
 0x668   :  { %v2223_v19 = vpop.permute.xlu1 %2222  ;;  %v2251_v28 = vadd.f32 %v7026_v10, %v2215_v32  ;;  %v2252_v59 = vadd.f32 %v7026_v10, %v2219_v18  ;;  %v7145_v48 = vadd.f32 %v7009_v21, %v2279_v51 }
 0x669   :  { %v7148_v49 = vadd.f32 %v7017_v63, %v2280_v54  ;;  %v2253_v60 = vadd.f32 %v7026_v10, %v2223_v19  ;;  %v2281_v39 = vmax.f32 %v2249_v0, %v2265_v20  ;;  %v2282_v14 = vmax.f32 %v2250_v34, %v2266_v61 }
 0x66a   :  { %v2267_v24 = vmul.f32 0.2, %v2251_v28  ;;  %v2268_v37 = vmul.f32 0.2, %v2252_v59  ;;  %v2256_v63 = vadd.f32 %v7026_v10, %v2235_v36 }
 0x66b   :  { %1848 = vmax.xlane.f32.xlu0 %v7057_v26  ;;  %1850 = vmax.xlane.f32.xlu1 %v7065_v17  ;;  %v2227_v8 = vpop.permute.xlu0 %2226  ;;  %v2269_v5 = vmul.f32 0.2, %v2253_v60  ;;  %v7157_v6 = vadd.f32 %v7036_v38, %v2281_v39  ;;  %v7160_v25 = vadd.f32 %v7044_v56, %v2282_v14 }
 0x66c   :  { %v2254_v53 = vadd.f32 %v7026_v10, %v2227_v8  ;;  %v2231_v18 = vpop.permute.xlu1 %2230  ;;  %v2283_v32 = vmax.f32 %v2251_v28, %v2267_v24  ;;  %v2284_v58 = vmax.f32 %v2252_v59, %v2268_v37  ;;  %v2272_v38 = vmul.f32 0.2, %v2256_v63 }
 0x66d   :  { %v2255_v21 = vadd.f32 %v7026_v10, %v2231_v18  ;;  %v2285_v0 = vmax.f32 %v2253_v60, %v2269_v5 }
 0x66e   :  { %v2270_v15 = vmul.f32 0.2, %v2254_v53  ;;  %v7165_v51 = vadd.f32 %v7054_v31, %v2283_v32  ;;  %v7168_v54 = vadd.f32 %v7062_v44, %v2284_v58  ;;  %v2288_v20 = vmax.f32 %v2256_v63, %v2272_v38 }
 0x66f   :  { %1852 = vmax.xlane.f32.xlu0 %v7079_v33  ;;  %1854 = vmax.xlane.f32.xlu1 %v7087_v16  ;;  %v2271_v34 = vmul.f32 0.2, %v2255_v21  ;;  %v7173_v56 = vadd.f32 %v7076_v41, %v2285_v0 }
 0x670   :  { %v2286_v10 = vmax.f32 %v2254_v53, %v2270_v15  ;;  %v7184_v44 = vadd.f32 %v7105_v23, %v2288_v20 }
 0x671   :  { %v2287_v19 = vmax.f32 %v2255_v21, %v2271_v34 }
 0x672   :  { %v7176_v36 = vadd.f32 %v7084_v29, %v2286_v10 }
 0x673   :  { %1856 = vmax.xlane.f32.xlu0 %v7100_v4  ;;  %1858 = vmax.xlane.f32.xlu1 %v7108_v3  ;;  %v7181_v31 = vadd.f32 %v7097_v30, %v2287_v19 }
 0x677   :  { %2305 = vmax.xlane.f32.xlu0 %v7117_v46  ;;  %2307 = vmax.xlane.f32.xlu1 %v7120_v2 }
 0x67b   :  { %2309 = vmax.xlane.f32.xlu0 %v7125_v43  ;;  %2311 = vmax.xlane.f32.xlu1 %v7128_v22 }
 0x67f   :  { %2313 = vmax.xlane.f32.xlu0 %v7135_v55  ;;  %2315 = vmax.xlane.f32.xlu1 %v7138_v57 }
 0x683   :  { %2317 = vmax.xlane.f32.xlu0 %v7145_v48  ;;  %2319 = vmax.xlane.f32.xlu1 %v7148_v49 }
 0x687   :  { %2321 = vmax.xlane.f32.xlu0 %v7157_v6  ;;  %2323 = vmax.xlane.f32.xlu1 %v7160_v25 }
 0x68b   :  { %2325 = vmax.xlane.f32.xlu0 %v7165_v51  ;;  %2327 = vmax.xlane.f32.xlu1 %v7168_v54 }
 0x68f   :  { %2329 = vmax.xlane.f32.xlu0 %v7173_v56  ;;  %2331 = vmax.xlane.f32.xlu1 %v7176_v36 }
 0x693   :  { %2333 = vmax.xlane.f32.xlu0 %v7181_v31  ;;  %2335 = vmax.xlane.f32.xlu1 %v7184_v44 }
 0x6e0   :  { %v1831_v41 = vpop.xlane.xlu0 %1830  ;;  %v1829_v61 = vpop.xlane.xlu1 %1828 }
 0x6e1   :  { %v1861_v29 = vsub.f32 %v6952_v11, %v1831_v41  ;;  %v1860_v28 = vsub.f32 %v6960_v9, %v1829_v61 }
 0x6e3   :  { %v1878_v59 = vmul.f32 1.442695, %v1861_v29  ;;  %v1876_v8 = vmul.f32 1.442695, %v1860_v28 }
 0x6e4   :  { %v1833_v60 = vpop.xlane.xlu0 %1832  ;;  %v1835_v53 = vpop.xlane.xlu1 %1834 }
 0x6e5   :  { %5310 = vpow2.f32 %v1878_v59  ;;  %v1862_v30 = vsub.f32 %v6970_v12, %v1833_v60  ;;  %v1863_v23 = vsub.f32 %v6978_v62, %v1835_v53 }
 0x6e6   :  { %5312 = vpow2.f32 %v1876_v8 }
 0x6e7   :  { %v1880_v39 = vmul.f32 1.442695, %v1862_v30  ;;  %v1882_v14 = vmul.f32 1.442695, %v1863_v23 }
 0x6e8   :  { %v1837_v24 = vpop.xlane.xlu0 %1836  ;;  %v1839_v37 = vpop.xlane.xlu1 %1838 }
 0x6e9   :  { %5314 = vpow2.f32 %v1880_v39  ;;  %v1864_v18 = vsub.f32 %v6992_v35, %v1837_v24  ;;  %v1865_v11 = vsub.f32 %v7000_v7, %v1839_v37 }
 0x6ea   :  { %5316 = vpow2.f32 %v1882_v14 }
 0x6eb   :  { %v1884_v9 = vmul.f32 1.442695, %v1864_v18  ;;  %v1886_v5 = vmul.f32 1.442695, %v1865_v11 }
 0x6ec   :  { %v1841_v15 = vpop.xlane.xlu0 %1840  ;;  %v1843_v21 = vpop.xlane.xlu1 %1842 }
 0x6ed   :  { %5318 = vpow2.f32 %v1884_v9  ;;  %v1866_v12 = vsub.f32 %v7012_v52, %v1841_v15  ;;  %v1867_v62 = vsub.f32 %v7020_v1, %v1843_v21 }
 0x6ee   :  { %5320 = vpow2.f32 %v1886_v5 }
 0x6ef   :  { %v1888_v63 = vmul.f32 1.442695, %v1866_v12  ;;  %v1890_v32 = vmul.f32 1.442695, %v1867_v62 }
 0x6f0   :  { %v1845_v58 = vpop.xlane.xlu0 %1844  ;;  %v1847_v0 = vpop.xlane.xlu1 %1846 }
 0x6f1   :  { %5322 = vpow2.f32 %v1888_v63  ;;  %v1868_v35 = vsub.f32 %v7039_v40, %v1845_v58  ;;  %v1869_v7 = vsub.f32 %v7047_v27, %v1847_v0 }
 0x6f2   :  { %v5311_v34 = vpop.eup %5310  ;;  %5324 = vpow2.f32 %v1890_v32 }
 0x6f3   :  { %v5313_v10 = vpop.eup %5312  ;;  %v1892_v38 = vmul.f32 1.442695, %v1868_v35  ;;  %v1894_v19 = vmul.f32 1.442695, %v1869_v7 }
 0x6f4   :  { %v1849_v20 = vpop.xlane.xlu0 %1848  ;;  %v1851_v41 = vpop.xlane.xlu1 %1850  ;;  %v1908_v52 = vpack.c.bf16 %v5311_v34, %v5313_v10 }
 0x6f5   :  { %5326 = vpow2.f32 %v1892_v38  ;;  %v1870_v1 = vsub.f32 %v7057_v26, %v1849_v20  ;;  %v1871_v61 = vsub.f32 %v7065_v17, %v1851_v41 }
 0x6f6   :  { %v5315_v29 = vpop.eup %5314  ;;  %5328 = vpow2.f32 %v1894_v19  ;;  %4870 = vmatprep.mubr.bf16.mxu1 %v1908_v52 }
 0x6f7   :  { %v5317_v28 = vpop.eup %5316  ;;  %v1896_v40 = vmul.f32 1.442695, %v1870_v1  ;;  %v1898_v59 = vmul.f32 1.442695, %v1871_v61  ;;  %v8460_v61 = vld [vmem:[#allocation16_spill] sm:$0xff] }
 0x6f8   :  { %v1853_v27 = vpop.xlane.xlu0 %1852  ;;  %v1855_v8 = vpop.xlane.xlu1 %1854  ;;  %v1909_v60 = vpack.c.bf16 %v5317_v28, %v5315_v29 }
 0x6f9   :  { %5330 = vpow2.f32 %v1896_v40  ;;  %v1872_v53 = vsub.f32 %v7079_v33, %v1853_v27  ;;  %v1873_v30 = vsub.f32 %v7087_v16, %v1855_v8 }
 0x6fa   :  { %v5319_v23 = vpop.eup %5318  ;;  %5332 = vpow2.f32 %v1898_v59  ;;  %4871 = vmatmul.mubr.bf16.vlgmr.msra.gmra.mxu1 %v1909_v60  ;;  %v8461_v60 = vld [vmem:[#allocation13_spill] sm:$0xff] }
 0x6fb   :  { %v5321_v26 = vpop.eup %5320  ;;  %v1900_v39 = vmul.f32 1.442695, %v1872_v53  ;;  %v1902_v17 = vmul.f32 1.442695, %v1873_v30  ;;  %4887 = vmatpush3.bf16.msra.mxu1 %v6907_v50 }
 0x6fc   :  { %4888 = vmatprep.subr.bf16.mxu1 %v6842_v13  ;;  %v1857_v14 = vpop.xlane.xlu0 %1856  ;;  %v1859_v24 = vpop.xlane.xlu1 %1858  ;;  %v1910_v37 = vpack.c.bf16 %v5321_v26, %v5319_v23 }
 0x6fd   :  { %5334 = vpow2.f32 %v1900_v39  ;;  %v1874_v18 = vsub.f32 %v7100_v4, %v1857_v14  ;;  %v1875_v33 = vsub.f32 %v7108_v3, %v1859_v24  ;;  %v8462_v14 = vld [vmem:[#allocation14_spill] sm:$0xff] }
 0x6fe   :  { %v5323_v11 = vpop.eup %5322  ;;  %5336 = vpow2.f32 %v1902_v17  ;;  %4874 = vmatprep.mubr.bf16.mxu1 %v1910_v37 }
 0x6ff   :  { %v5325_v16 = vpop.eup %5324  ;;  %v1904_v9 = vmul.f32 1.442695, %v1874_v18  ;;  %v1906_v5 = vmul.f32 1.442695, %v1875_v33  ;;  %4889 = vmatpush3.bf16.msra.mxu1 %v6842_v13 }
 0x700   :  { %4890 = vmatprep.subr.bf16.mxu1 %v6783_v45  ;;  %v2306_v50 = vpop.xlane.xlu0 %2305  ;;  %v2308_v15 = vpop.xlane.xlu1 %2307  ;;  %v1911_v21 = vpack.c.bf16 %v5325_v16, %v5323_v11 }
 0x701   :  { %5338 = vpow2.f32 %v1904_v9  ;;  %v2337_v12 = vsub.f32 %v7117_v46, %v2306_v50  ;;  %v2338_v4 = vsub.f32 %v7120_v2, %v2308_v15 }
 0x702   :  { %v5327_v62 = vpop.eup %5326  ;;  %5340 = vpow2.f32 %v1906_v5  ;;  %4875 = vmatmul.mubr.bf16.gmra.mxu1 %v1911_v21  ;;  %v8463_v21 = vmov 0.0  }
 0x703   :  { %v5329_v3 = vpop.eup %5328  ;;  %v2353_v63 = vmul.f32 1.442695, %v2337_v12  ;;  %v2355_v32 = vmul.f32 1.442695, %v2338_v4  ;;  %4891 = vmatpush3.bf16.msra.mxu1 %v6783_v45 }
 0x704   :  { %4892 = vmatprep.subr.bf16.mxu1 %v6793_v42  ;;  %v2310_v13 = vpop.xlane.xlu0 %2309  ;;  %v2312_v58 = vpop.xlane.xlu1 %2311  ;;  %v1912_v0 = vpack.c.bf16 %v5329_v3, %v5327_v62 }
 0x705   :  { %5342 = vpow2.f32 %v2353_v63  ;;  %v2339_v35 = vsub.f32 %v7125_v43, %v2310_v13  ;;  %v2340_v46 = vsub.f32 %v7128_v22, %v2312_v58 }
 0x706   :  { %v5331_v7 = vpop.eup %5330  ;;  %5344 = vpow2.f32 %v2355_v32  ;;  %4878 = vmatprep.mubr.bf16.mxu1 %v1912_v0 }
 0x707   :  { %v5333_v2 = vpop.eup %5332  ;;  %v2357_v34 = vmul.f32 1.442695, %v2339_v35  ;;  %v2359_v10 = vmul.f32 1.442695, %v2340_v46  ;;  %4893 = vmatpush3.bf16.msra.mxu1 %v6793_v42 }
 0x708   :  { %4894 = vmatprep.subr.bf16.mxu1 %v6755_v47  ;;  %v2314_v45 = vpop.xlane.xlu0 %2313  ;;  %v2316_v38 = vpop.xlane.xlu1 %2315  ;;  %v1913_v19 = vpack.c.bf16 %v5333_v2, %v5331_v7 }
 0x709   :  { %5346 = vpow2.f32 %v2357_v34  ;;  %v2341_v20 = vsub.f32 %v7135_v55, %v2314_v45  ;;  %v2342_v43 = vsub.f32 %v7138_v57, %v2316_v38 }
 0x70a   :  { %v5335_v41 = vpop.eup %5334  ;;  %5348 = vpow2.f32 %v2359_v10  ;;  %4879 = vmatmul.mubr.bf16.gmra.mxu1 %v1913_v19 }
 0x70b   :  { %v5337_v22 = vpop.eup %5336  ;;  %v2361_v52 = vmul.f32 1.442695, %v2341_v20  ;;  %v2363_v1 = vmul.f32 1.442695, %v2342_v43  ;;  %4895 = vmatpush3.bf16.msra.mxu1 %v6755_v47 }
 0x70c   :  { %4896 = vmatprep.subr.bf16.mxu1 %v8460_v61  ;;  %v2318_v42 = vpop.xlane.xlu0 %2317  ;;  %v2320_v29 = vpop.xlane.xlu1 %2319  ;;  %v1914_v28 = vpack.c.bf16 %v5337_v22, %v5335_v41 }
 0x70d   :  { %5350 = vpow2.f32 %v2361_v52  ;;  %v2343_v40 = vsub.f32 %v7145_v48, %v2318_v42  ;;  %v2344_v55 = vsub.f32 %v7148_v49, %v2320_v29 }
 0x70e   :  { %v5339_v59 = vpop.eup %5338  ;;  %5352 = vpow2.f32 %v2363_v1  ;;  %4882 = vmatprep.mubr.bf16.mxu1 %v1914_v28 }
 0x70f   :  { %v5341_v57 = vpop.eup %5340  ;;  %v2365_v27 = vmul.f32 1.442695, %v2343_v40  ;;  %v2367_v8 = vmul.f32 1.442695, %v2344_v55  ;;  %4897 = vmatpush3.bf16.msra.mxu1 %v8460_v61 }
 0x710   :  { %4898 = vmatprep.subr.bf16.mxu1 %v8461_v60  ;;  %v2322_v47 = vpop.xlane.xlu0 %2321  ;;  %v2324_v53 = vpop.xlane.xlu1 %2323  ;;  %v1915_v30 = vpack.c.bf16 %v5341_v57, %v5339_v59 }
 0x711   :  { %5354 = vpow2.f32 %v2365_v27  ;;  %v2345_v23 = vsub.f32 %v7157_v6, %v2322_v47  ;;  %v2346_v48 = vsub.f32 %v7160_v25, %v2324_v53 }
 0x712   :  { %v5343_v26 = vpop.eup %5342  ;;  %5356 = vpow2.f32 %v2367_v8  ;;  %4883 = vmatmul.mubr.bf16.gmra.mxu1 %v1915_v30 }
 0x713   :  { %v5345_v49 = vpop.eup %5344  ;;  %v2369_v39 = vmul.f32 1.442695, %v2345_v23  ;;  %v2371_v17 = vmul.f32 1.442695, %v2346_v48  ;;  %4899 = vmatpush3.bf16.msra.mxu1 %v8461_v60 }
 0x714   :  { %4900 = vmatprep.subr.bf16.mxu1 %v8462_v14  ;;  %v2326_v24 = vpop.xlane.xlu0 %2325  ;;  %v2328_v37 = vpop.xlane.xlu1 %2327  ;;  %v2385_v18 = vpack.c.bf16 %v5345_v49, %v5343_v26 }
 0x715   :  { %5358 = vpow2.f32 %v2369_v39  ;;  %v2347_v33 = vsub.f32 %v7165_v51, %v2326_v24  ;;  %v2348_v6 = vsub.f32 %v7168_v54, %v2328_v37 }
 0x716   :  { %v5347_v11 = vpop.eup %5346  ;;  %5360 = vpow2.f32 %v2371_v17  ;;  %4902 = vmatprep.mubr.bf16.mxu1 %v2385_v18 }
 0x717   :  { %v5349_v25 = vpop.eup %5348  ;;  %v2373_v16 = vmul.f32 1.442695, %v2347_v33  ;;  %v2375_v9 = vmul.f32 1.442695, %v2348_v6  ;;  %4901 = vmatpush3.bf16.msra.mxu1 %v8462_v14 }
 0x718   :  { %v2330_v5 = vpop.xlane.xlu0 %2329  ;;  %v2332_v50 = vpop.xlane.xlu1 %2331  ;;  %v2386_v15 = vpack.c.bf16 %v5349_v25, %v5347_v11  ;;  %4938 = vmatprep.subr.bf16.mxu1 %v8463_v21 }
 0x719   :  { %5362 = vpow2.f32 %v2373_v16  ;;  %v2349_v12 = vsub.f32 %v7173_v56, %v2330_v5  ;;  %v2350_v51 = vsub.f32 %v7176_v36, %v2332_v50  ;;  %v8464_v50 = vmov 17  }
 0x71a   :  { %v5351_v4 = vpop.eup %5350  ;;  %5364 = vpow2.f32 %v2375_v9  ;;  %4903 = vmatmul.mubr.bf16.vlgmr.msra.gmra.mxu1 %v2386_v15 }
 0x71b   :  { %v5353_v54 = vpop.eup %5352  ;;  %v2377_v62 = vmul.f32 1.442695, %v2349_v12  ;;  %v2379_v3 = vmul.f32 1.442695, %v2350_v51 }
 0x71c   :  { %v2334_v63 = vpop.xlane.xlu0 %2333  ;;  %v2336_v32 = vpop.xlane.xlu1 %2335  ;;  %v2387_v13 = vpack.c.bf16 %v5353_v54, %v5351_v4 }
 0x71d   :  { %5366 = vpow2.f32 %v2377_v62  ;;  %v2351_v58 = vsub.f32 %v7181_v31, %v2334_v63  ;;  %v2352_v0 = vsub.f32 %v7184_v44, %v2336_v32 }
 0x71e   :  { %v5355_v35 = vpop.eup %5354  ;;  %5368 = vpow2.f32 %v2379_v3  ;;  %4906 = vmatprep.mubr.bf16.mxu1 %v2387_v13 }
 0x71f   :  { %v5357_v56 = vpop.eup %5356  ;;  %v2381_v46 = vmul.f32 1.442695, %v2351_v58  ;;  %v2383_v36 = vmul.f32 1.442695, %v2352_v0 }
 0x720   :  { %v2388_v7 = vpack.c.bf16 %v5357_v56, %v5355_v35 }
 0x721   :  { %5370 = vpow2.f32 %v2381_v46 }
 0x722   :  { %v5359_v2 = vpop.eup %5358  ;;  %5372 = vpow2.f32 %v2383_v36  ;;  %4907 = vmatmul.mubr.bf16.gmra.mxu1 %v2388_v7  ;;  %v8465_v36 = vmov 16   ;;  %v5159_v7 = vld [vmem:[%s8374_s15 + $0x8] ss:$0 sps:$4 sm:$0x33]  }
 0x723   :  { %v5361_v34 = vpop.eup %5360  ;;  %5094 = vmatprep.subr.msk.bf16.mxu0 %vm1473_vm4, %v5159_v7 }
 0x724   :  { %v2389_v10 = vpack.c.bf16 %v5361_v34, %v5359_v2  ;;  %v2757_v34 = vsel %vm1473_vm4, %v5159_v7, 0 }
 0x725   :  { %4919 = vmatpush3.bf16.msra.mxu0 %v2757_v34 }
 0x726   :  { %v5363_v45 = vpop.eup %5362  ;;  %4910 = vmatprep.mubr.bf16.mxu1 %v2389_v10  ;;  %v5160_v10 = vld [vmem:[%s8374_s15] sm:$0xff]  }
 0x727   :  { %v5365_v38 = vpop.eup %5364  ;;  %4920 = vmatprep.subr.bf16.mxu0 %v5160_v10 }
 0x728   :  { %v2390_v19 = vpack.c.bf16 %v5365_v38, %v5363_v45 }
 0x729   :  { %4921 = vmatpush3.bf16.msra.mxu0 %v5160_v10 }
 0x72a   :  { %v5367_v31 = vpop.eup %5366  ;;  %4911 = vmatmul.mubr.bf16.gmra.mxu1 %v2390_v19 }
 0x72b   :  { %v5369_v44 = vpop.eup %5368 }
 0x72c   :  { %v2391_v20 = vpack.c.bf16 %v5369_v44, %v5367_v31 }
 0x72e   :  { %v5371_v43 = vpop.eup %5370  ;;  %4914 = vmatprep.mubr.bf16.mxu1 %v2391_v20 }
 0x72f   :  { %v5373_v41 = vpop.eup %5372 }
 0x730   :  { %v2392_v22 = vpack.c.bf16 %v5373_v41, %v5371_v43 }
 0x732   :  { %4915 = vmatmul.mubr.bf16.gmra.mxu1 %v2392_v22 }
 0x733   :  { %4954 = vmatprep.mubr.msk.bf16.mxu1 %vm5689_vm2, %v8463_v21 }
 0x7ba   :  { %v7238_v52 = vpop.f32.mrf.mxu1 }
 0x7bb   :  { %5374 = vrcp.f32 %v7238_v52 }
 0x7bc   :  { %v7241_v1 = vpop.f32.mrf.mxu1 }
 0x7bd   :  { %5376 = vrcp.f32 %v7241_v1 }
 0x7be   :  { %v7244_v61 = vpop.f32.mrf.mxu1 }
 0x7bf   :  { %5378 = vrcp.f32 %v7244_v61 }
 0x7c0   :  { %v7247_v42 = vpop.f32.mrf.mxu1 }
 0x7c1   :  { %5380 = vrcp.f32 %v7247_v42 }
 0x7c2   :  { %v7249_v29 = vpop.f32.mrf.mxu1 }
 0x7c4   :  { %v7252_v28 = vpop.f32.mrf.mxu1 }
 0x7c5   :  { %5382 = vrcp.f32 %v7252_v28 }
 0x7c6   :  { %v7255_v40 = vpop.f32.mrf.mxu1  ;;  %5384 = vrcp.f32 %v7249_v29 }
 0x7c7   :  { %5386 = vrcp.f32 %v7255_v40 }
 0x7c8   :  { %v5375_v55 = vpop.eup %5374  ;;  %v7258_v59 = vpop.f32.mrf.mxu1 }
 0x7c9   :  { %2089 = vperm.xlu1 %5129, %v5375_v55   ;;  %5388 = vrcp.f32 %v7258_v59 }
 0x7ca   :  { %v5377_v57 = vpop.eup %5376  ;;  %v7261_v27 = vpop.f32.mrf.mxu1 }
 0x7cb   :  { %2079 = vperm.xlu0 %5130, %v5377_v57  }
 0x7cc   :  { %v5379_v8 = vpop.eup %5378  ;;  %v7264_v60 = vpop.f32.mrf.mxu1 }
 0x7cd   :  { %5390 = vrcp.f32 %v7264_v60  ;;  %2094 = vperm.xlu1 %5129, %v5379_v8  }
 0x7ce   :  { %v7267_v47 = vpop.f32.mrf.mxu1  ;;  %5392 = vrcp.f32 %v7261_v27  ;;  %v5381_v53 = vpop.eup %5380 }
 0x7cf   :  { %5394 = vrcp.f32 %v7267_v47 }
 0x7d0   :  { %v7270_v30 = vpop.f32.mrf.mxu1 }
 0x7d1   :  { %2084 = vperm.xlu1 %5129, %v5381_v53   ;;  %5396 = vrcp.f32 %v7270_v30 }
 0x7d2   :  { %v5383_v23 = vpop.eup %5382  ;;  %v7273_v48 = vpop.f32.mrf.mxu1 }
 0x7d3   :  { %2099 = vperm.xlu0 %5130, %v5383_v23   ;;  %v5385_v26 = vpop.eup %5384 }
 0x7d4   :  { %v7276_v49 = vpop.f32.mrf.mxu1  ;;  %v5387_v39 = vpop.eup %5386 }
 0x7d5   :  { %2109 = vperm.xlu1 %5129, %v5385_v26  }
 0x7d6   :  { %v7278_v17 = vpop.f32.mrf.mxu1  ;;  %v5389_v14 = vpop.eup %5388 }
 0x7d7   :  { %2114 = vperm.xlu0 %5130, %v5387_v39   ;;  %v8466_v39 = vmov 18  }
 0x7d8   :  { %v7280_v24 = vpop.f32.mrf.mxu1 }
 0x7d9   :  { %2104 = vperm.xlu1 %5129, %v5389_v14   ;;  %v5161_v14 = vld [vmem:[%s8375_s16] sm:$0xff]  }
 0x7da   :  { %v5391_v37 = vpop.eup %5390  ;;  %v7282_v18 = vpop.f32.mrf.mxu1 }
 0x7db   :  { %5398 = vrcp.f32 %v7282_v18  ;;  %2119 = vperm.xlu0 %5130, %v5391_v37   ;;  %v5393_v33 = vpop.eup %5392  ;;  %v5162_v37 = vld [vmem:[%s8375_s16 + $0x8] ss:$0 sps:$4 sm:$0x33]  }
 0x7dc   :  { %v7285_v6 = vpop.f32.mrf.mxu1  ;;  %v5395_v11 = vpop.eup %5394 }
 0x7dd   :  { %2129 = vperm.xlu1 %5129, %v5393_v33   ;;  %5400 = vrcp.f32 %v7285_v6  ;;  %v8467_v33 = vmov 19  }
 0x7de   :  { %v7287_v25 = vpop.f32.mrf.mxu1  ;;  %v5397_v16 = vpop.eup %5396 }
 0x7df   :  { %2134 = vperm.xlu0 %5130, %v5395_v11   ;;  %5402 = vrcp.f32 %v7287_v25 }
 0x7e0   :  { %v7290_v9 = vpop.f32.mrf.mxu1 }
 0x7e1   :  { %2124 = vperm.xlu1 %5129, %v5397_v16  }
 0x7e2   :  { %v7292_v5 = vpop.f32.mrf.mxu1 }
 0x7e3   :  { %5132 = vset.pattern.permute.xlu0 %v8464_v50 }
 0x7e4   :  { %v7296_v15 = vpop.f32.mrf.mxu1 }
 0x7e5   :  { %5404 = vrcp.f32 %v7296_v15  ;;  %5131 = vset.pattern.permute.xlu1 %v8464_v50 }
 0x7e6   :  { %v7300_v12 = vpop.f32.mrf.mxu1  ;;  %5406 = vrcp.f32 %v7290_v9 }
 0x7e7   :  { %5408 = vrcp.f32 %v7276_v49 }
 0x7e8   :  { %v5399_v51 = vpop.eup %5398  ;;  %v7303_v4 = vpop.f32.mrf.mxu1  ;;  %5410 = vrcp.f32 %v7292_v5 }
 0x7e9   :  { %2566 = vperm.xlu1 %5131, %v5399_v51  }
 0x7ea   :  { %v7306_v54 = vpop.f32.mrf.mxu1  ;;  %v5401_v62 = vpop.eup %5400 }
 0x7ec   :  { %v7309_v3 = vpop.f32.mrf.mxu1  ;;  %v5403_v32 = vpop.eup %5402 }
 0x7ed   :  { %2556 = vperm.xlu1 %5131, %v5401_v62   ;;  %5412 = vrcp.f32 %v7309_v3 }
 0x7ee   :  { %v7311_v63 = vpop.f32.mrf.mxu1  ;;  %5414 = vrcp.f32 %v7280_v24 }
 0x7ef   :  { %5416 = vrcp.f32 %v7273_v48 }
 0x7f0   :  { %v7315_v13 = vpop.f32.mrf.mxu1 }
 0x7f1   :  { %2571 = vperm.xlu1 %5131, %v5403_v32  }
 0x7f2   :  { %v5405_v58 = vpop.eup %5404  ;;  %v7317_v0 = vpop.f32.mrf.mxu1 }
 0x7f3   :  { %2576 = vperm.xlu0 %5132, %v5405_v58   ;;  %v5407_v35 = vpop.eup %5406 }
 0x7f4   :  { %v7320_v56 = vpop.f32.mrf.mxu1  ;;  %v5409_v46 = vpop.eup %5408 }
 0x7f5   :  { %5418 = vrcp.f32 %v7320_v56  ;;  %2561 = vperm.xlu1 %5131, %v5407_v35   ;;  %v5411_v2 = vpop.eup %5410 }
 0x7f6   :  { %5420 = vrcp.f32 %v7300_v12  ;;  %v7342_v41 = vpop.f32.mrf.mxu1 }
 0x7f7   :  { %5133 = vset.pattern.permute.xlu0 %v8465_v36  ;;  %5422 = vrcp.f32 %v7278_v17 }
 0x7f8   :  { %2139 = vperm.xlu0 %5133, %v5409_v46   ;;  %5424 = vrcp.f32 %v7303_v4  ;;  %v7345_v55 = vpop.f32.mrf.mxu1 }
 0x7f9   :  { %2586 = vperm.xlu1 %5131, %v5411_v2   ;;  %5426 = vrcp.f32 %v7306_v54 }
 0x7fa   :  { %v5413_v45 = vpop.eup %5412  ;;  %5428 = vrcp.f32 %v7311_v63 }
 0x7fb   :  { %v5415_v38 = vpop.eup %5414  ;;  %5430 = vrcp.f32 %v7315_v13 }
 0x7fc   :  { %5136 = vset.pattern.permute.xlu0 %v8464_v50  ;;  %v5417_v19 = vpop.eup %5416  ;;  %5432 = vrcp.f32 %v7317_v0 }
 0x7fd   :  { %5134 = vset.pattern.permute.xlu1 %v8465_v36  ;;  %2596 = vperm.xlu0 %5136, %v5413_v45   ;;  %5434 = vrcp.f32 %v7345_v55 }
 0x7fe   :  { %2144 = vperm.xlu1 %5134, %v5415_v38   ;;  %5436 = vrcp.f32 %v7342_v41 }
 0x802   :  { %v5419_v31 = vpop.eup %5418  ;;  %2149 = vperm.xlu1 %5134, %v5417_v19  }
 0x803   :  { %2616 = vperm.xlu0 %5136, %v5419_v31   ;;  %v5421_v44 = vpop.eup %5420 }
 0x804   :  { %v5423_v20 = vpop.eup %5422 }
 0x805   :  { %v5425_v43 = vpop.eup %5424 }
 0x806   :  { %5135 = vset.pattern.permute.xlu1 %v8464_v50  ;;  %v5427_v22 = vpop.eup %5426 }
 0x807   :  { %2591 = vperm.xlu1 %5135, %v5421_v44   ;;  %5137 = vset.pattern.permute.xlu0 %v8465_v36  ;;  %v5429_v57 = vpop.eup %5428 }
 0x808   :  { %2154 = vperm.xlu0 %5137, %v5423_v20   ;;  %v5431_v8 = vpop.eup %5430 }
 0x809   :  { %v5433_v53 = vpop.eup %5432 }
 0x80a   :  { %v5435_v23 = vpop.eup %5434 }
 0x80b   :  { %2581 = vperm.xlu1 %5135, %v5425_v43   ;;  %v5437_v26 = vpop.eup %5436 }
 0x80f   :  { %2606 = vperm.xlu1 %5135, %v5427_v22  }
 0x813   :  { %2611 = vperm.xlu1 %5135, %v5429_v57  }
 0x817   :  { %2601 = vperm.xlu1 %5135, %v5431_v8  }
 0x81b   :  { %2626 = vperm.xlu1 %5135, %v5433_v53  }
 0x81f   :  { %2621 = vperm.xlu1 %5135, %v5435_v23  }
 0x823   :  { %2631 = vperm.xlu1 %5135, %v5437_v26  }
 0x826   :  { %2877 = vxpose.xlu0.c.b16.start [1/2] (short) (narrow) %v5161_v14, 16 }
 0x827   :  { %5138 = vset.pattern.permute.xlu1 %v8466_v39 }
 0x82a   :  { %2878 = vxpose.xlu0.c.b16.end [2/2] (short) (narrow) %v5162_v37, 16 }
 0x833   :  { %5139 = vset.pattern.permute.xlu0 %v8467_v33 }
 0x844   :  { %v2090_v11 = vpop.permute.xlu1 %2089 }
 0x845   :  { %v2159_v20 = vmul.f32 %v7238_v52, %v2090_v11 }
 0x846   :  { %v2080_v46 = vpop.permute.xlu0 %2079 }
 0x847   :  { %v2157_v19 = vmul.f32 %v2080_v46, %v7241_v1 }
 0x848   :  { %v2095_v16 = vpop.permute.xlu1 %2094 }
 0x849   :  { %v2160_v31 = vmul.f32 %v7244_v61, %v2095_v16 }
 0x84c   :  { %v2085_v51 = vpop.permute.xlu1 %2084 }
 0x84d   :  { %v2158_v23 = vmul.f32 %v2085_v51, %v7247_v42  ;;  %v7380_v42 = vld [vmem:[%s8373_s14] ss:$0 sm:$0xff] }
 0x84e   :  { %v2100_v2 = vpop.permute.xlu0 %2099 }
 0x850   :  { %v2110_v62 = vpop.permute.xlu1 %2109 }
 0x852   :  { %v2115_v43 = vpop.permute.xlu0 %2114 }
 0x854   :  { %v2105_v32 = vpop.permute.xlu1 %2104 }
 0x856   :  { %v2120_v52 = vpop.permute.xlu0 %2119 }
 0x858   :  { %v7357_v58 = vpop.permute.xlu1 %2129 }
 0x85c   :  { %v7359_v35 = vpop.permute.xlu1 %2124 }
 0x864   :  { %v2567_v7 = vpop.permute.xlu1 %2566 }
 0x865   :  { %v2636_v45 = vmul.f32 %v7282_v18, %v2567_v7  ;;  %v7371_v18 = vld [vmem:[%s8372_s13] ss:$0 sm:$0xff] }
 0x867   :  { %v2652_v8 = vadd.f32 %v2636_v45, %v2159_v20  ;;  %v2161_v20 = vmul.f32 %v2100_v2, %v7252_v28 }
 0x868   :  { %v2557_v34 = vpop.permute.xlu1 %2556 }
 0x869   :  { %v2634_v10 = vmul.f32 %v2557_v34, %v7285_v6  ;;  %v2675_v26 = vmul.f32 %v7371_v18, %v2652_v8  ;;  %v2135_v34 = vpop.permute.xlu0 %2134  ;;  %v2163_v8 = vmul.f32 %v7249_v29, %v2110_v62 }
 0x86b   :  { %v2650_v22 = vadd.f32 %v2634_v10, %v2157_v19  ;;  %v2698_v51 = vadd.f32 %v7380_v42, %v2675_v26 }
 0x86c   :  { %v2572_v38 = vpop.permute.xlu1 %2571 }
 0x86d   :  { %v2637_v44 = vmul.f32 %v7287_v25, %v2572_v38  ;;  %v2673_v6 = vmul.f32 %v7371_v18, %v2650_v22  ;;  %v2164_v22 = vmul.f32 %v7255_v40, %v2115_v43 }
 0x86e   :  { %v2577_v38 = vpop.permute.xlu0 %2576 }
 0x86f   :  { %v2653_v57 = vadd.f32 %v2637_v44, %v2160_v31  ;;  %v2638_v19 = vmul.f32 %v2577_v38, %v7296_v15 }
 0x870   :  { %v2562_v53 = vpop.permute.xlu1 %2561 }
 0x871   :  { %v2635_v1 = vmul.f32 %v2562_v53, %v7290_v9  ;;  %v2676_v61 = vmul.f32 %v7371_v18, %v2653_v57  ;;  %v2696_v9 = vadd.f32 %v7380_v42, %v2673_v6 }
 0x873   :  { %v2651_v25 = vadd.f32 %v2635_v1, %v2158_v23  ;;  %v2699_v11 = vadd.f32 %v7380_v42, %v2676_v61  ;;  %v2140_v53 = vpop.permute.xlu0 %2139  ;;  %v2654_v23 = vadd.f32 %v2638_v19, %v2161_v20 }
 0x874   :  { %v2587_v14 = vpop.permute.xlu1 %2586  ;;  %v2169_v20 = vmul.f32 %v2140_v53, %v7276_v49 }
 0x875   :  { %v2674_v37 = vmul.f32 %v7371_v18, %v2651_v25  ;;  %v2713_v10 = vpack.c.bf16 %v2699_v11, %v2698_v51  ;;  %v2640_v31 = vmul.f32 %v7292_v5, %v2587_v14  ;;  %v2162_v25 = vmul.f32 %v2105_v32, %v7258_v59 }
 0x876   :  { %v2677_v26 = vmul.f32 %v7371_v18, %v2654_v23  ;;  %v2165_v11 = vmul.f32 %v2120_v52, %v7264_v60  ;;  %v2166_v60 = vmul.f32 %v7359_v35, %v7270_v30 }
 0x877   :  { %v2697_v16 = vadd.f32 %v7380_v42, %v2674_v37  ;;  %v2656_v61 = vadd.f32 %v2640_v31, %v2163_v8 }
 0x878   :  { %v2597_v2 = vpop.permute.xlu0 %2596  ;;  %v2700_v43 = vadd.f32 %v7380_v42, %v2677_v26 }
 0x879   :  { %v7387_v46 = vpop.permute.xlu1 %2144  ;;  %v2712_v7 = vpack.c.bf16 %v2697_v16, %v2696_v9  ;;  %v2679_v40 = vmul.f32 %v7371_v18, %v2656_v61  ;;  %v2642_v14 = vmul.f32 %v2597_v2, %v7309_v3  ;;  %v2168_v9 = vmul.f32 %v7267_v47, %v2135_v34 }
 0x87b   :  { %4922 = vmatprep.mubr.msk.bf16.mxu0 %vm311_vm3, %v2712_v7  ;;  %v2167_v7 = vmul.f32 %v7261_v27, %v7357_v58  ;;  %v2658_v38 = vadd.f32 %v2642_v14, %v2165_v11 }
 0x87c   :  { %4923 = vmatmul.mubr.msk.bf16.vlgmr.msra.gmra.mxu0 %vm311_vm3, %v2713_v10 }
 0x87d   :  { %v2150_v45 = vpop.permute.xlu1 %2149  ;;  %v2681_v52 = vmul.f32 %v7371_v18, %v2658_v38 }
 0x87e   :  { %v2617_v19 = vpop.permute.xlu0 %2616  ;;  %v2171_v61 = vmul.f32 %v7273_v48, %v2150_v45 }
 0x87f   :  { %v2646_v27 = vmul.f32 %v2617_v19, %v7320_v56  ;;  %v2704_v30 = vadd.f32 %v7380_v42, %v2681_v52 }
 0x881   :  { %v2662_v35 = vadd.f32 %v2646_v27, %v2169_v20 }
 0x882   :  { %v2592_v44 = vpop.permute.xlu1 %2591 }
 0x883   :  { %v2641_v57 = vmul.f32 %v7300_v12, %v2592_v44 }
 0x885   :  { %v2657_v1 = vadd.f32 %v2641_v57, %v2164_v22 }
 0x886   :  { %v2582_v6 = vpop.permute.xlu1 %2581 }
 0x887   :  { %v2639_v15 = vmul.f32 %v2582_v6, %v7303_v4  ;;  %v2680_v5 = vmul.f32 %v7371_v18, %v2657_v1  ;;  %v2702_v4 = vadd.f32 %v7380_v42, %v2679_v40  ;;  %v2170_v1 = vmul.f32 %v7387_v46, %v7280_v24  ;;  %v2155_v6 = vpop.permute.xlu0 %2154 }
 0x889   :  { %v2655_v28 = vadd.f32 %v2639_v15, %v2162_v25  ;;  %v2703_v62 = vadd.f32 %v7380_v42, %v2680_v5  ;;  %v2685_v15 = vmul.f32 %v7371_v18, %v2662_v35 }
 0x88a   :  { %v2607_v12 = vpop.permute.xlu1 %2606 }
 0x88b   :  { %v2678_v29 = vmul.f32 %v7371_v18, %v2655_v28  ;;  %v2644_v32 = vmul.f32 %v7306_v54, %v2607_v12  ;;  %v2715_v10 = vpack.c.bf16 %v2703_v62, %v2702_v4  ;;  %v2172_v28 = vmul.f32 %v7278_v17, %v2155_v6 }
 0x88d   :  { %v2701_v59 = vadd.f32 %v7380_v42, %v2678_v29  ;;  %v2660_v31 = vadd.f32 %v2644_v32, %v2167_v7 }
 0x88e   :  { %v2612_v37 = vpop.permute.xlu1 %2611 }
 0x88f   :  { %v2645_v16 = vmul.f32 %v7311_v63, %v2612_v37  ;;  %v2714_v51 = vpack.c.bf16 %v2701_v59, %v2700_v43  ;;  %v2683_v34 = vmul.f32 %v7371_v18, %v2660_v31  ;;  %v7456_v43 = vld [vmem:[%s8377_s18] sm:$0x3] }
 0x891   :  { %v2661_v3 = vadd.f32 %v2645_v16, %v2168_v9  ;;  %4926 = vmatprep.mubr.msk.bf16.mxu0 %vm311_vm3, %v2714_v51  ;;  %v2706_v23 = vadd.f32 %v7380_v42, %v2683_v34 }
 0x892   :  { %4927 = vmatmul.mubr.msk.bf16.gmra.mxu0 %vm311_vm3, %v2715_v10  ;;  %v2602_v54 = vpop.permute.xlu1 %2601 }
 0x893   :  { %v2643_v47 = vmul.f32 %v2602_v54, %v7315_v13  ;;  %v2684_v63 = vmul.f32 %v7371_v18, %v2661_v3 }
 0x895   :  { %v2659_v58 = vadd.f32 %v2643_v47, %v2166_v60  ;;  %v2707_v57 = vadd.f32 %v7380_v42, %v2684_v63 }
 0x896   :  { %v2627_v44 = vpop.permute.xlu1 %2626 }
 0x897   :  { %v2682_v22 = vmul.f32 %v7371_v18, %v2659_v58  ;;  %v2648_v8 = vmul.f32 %v7317_v0, %v2627_v44  ;;  %v2717_v25 = vpack.c.bf16 %v2707_v57, %v2706_v23 }
 0x899   :  { %v2705_v13 = vadd.f32 %v7380_v42, %v2682_v22  ;;  %v2664_v5 = vadd.f32 %v2648_v8, %v2171_v61 }
 0x89a   :  { %v2622_v56 = vpop.permute.xlu1 %2621 }
 0x89b   :  { %v2647_v49 = vmul.f32 %v2622_v56, %v7345_v55  ;;  %v2716_v53 = vpack.c.bf16 %v2705_v13, %v2704_v30  ;;  %v2708_v55 = vadd.f32 %v7380_v42, %v2685_v15  ;;  %v2687_v46 = vmul.f32 %v7371_v18, %v2664_v5 }
 0x89d   :  { %v2663_v26 = vadd.f32 %v2647_v49, %v2170_v1  ;;  %4930 = vmatprep.mubr.msk.bf16.mxu0 %vm311_vm3, %v2716_v53  ;;  %v2710_v29 = vadd.f32 %v7380_v42, %v2687_v46 }
 0x89e   :  { %4931 = vmatmul.mubr.msk.bf16.gmra.mxu0 %vm311_vm3, %v2717_v25  ;;  %v2632_v0 = vpop.permute.xlu1 %2631 }
 0x89f   :  { %v2686_v24 = vmul.f32 %v7371_v18, %v2663_v26  ;;  %v2649_v48 = vmul.f32 %v7342_v41, %v2632_v0  ;;  %v7451_v41 = vld [vmem:[%s8376_s17] sm:$0x3] }
 0x8a1   :  { %v2709_v45 = vadd.f32 %v7380_v42, %v2686_v24  ;;  %v2665_v40 = vadd.f32 %v2649_v48, %v2172_v28  ;;  %v8472_v24 = vld [vmem:[#allocation15_spill] sm:$0xff] }
 0x8a2   :  { %v7561_v48 = vrot.slane %v7451_v41, %v8472_v24 }
 0x8a3   :  { %v2688_v2 = vmul.f32 %v7371_v18, %v2665_v40  ;;  %v2718_v12 = vpack.c.bf16 %v2709_v45, %v2708_v55  ;;  %v8468_v18 = vld [vmem:[#allocation12_spill] sm:$0xff] }
 0x8a4   :  { %v7460_v14 = vrot.slane %v7451_v41, %v8468_v18 }
 0x8a5   :  { %v2711_v62 = vadd.f32 %v7380_v42, %v2688_v2  ;;  %4934 = vmatprep.mubr.msk.bf16.mxu0 %vm311_vm3, %v2718_v12  ;;  %v7464_v42 = vrot.slane %v7456_v43, %v8468_v18 }
 0x8a7   :  { %v2719_v17 = vpack.c.bf16 %v2711_v62, %v2710_v29  ;;  %v7581_v62 = vrot.slane %v7456_v43, %v8472_v24 }
 0x8a9   :  { %4935 = vmatmul.mubr.msk.bf16.gmra.mxu0 %vm311_vm3, %v2719_v17 }
 0x93c   :  { %v7466_v59 = vpop.f32.mrf.mxu0 }
 0x93d   :  { %2974 = vperm.xlu1 %5138, %v7466_v59   ;;  %v3681_v4 = vmul.f32 %v7466_v59, %v7460_v14 }
 0x93e   :  { %v7471_v32 = vpop.f32.mrf.mxu0 }
 0x93f   :  { %3456 = vperm.xlu0 %5139, %v7471_v32   ;;  %v3701_v37 = vadd.f32 %v7464_v42, %v3681_v4  ;;  %v3679_v11 = vmul.f32 %v7460_v14, %v7471_v32 }
 0x940   :  { %v7477_v9 = vpop.f32.mrf.mxu0 }
 0x941   :  { %2964 = vperm.xlu1 %5138, %v7471_v32   ;;  %v2857_v16 = vpack.c.bf16 %v7477_v9, %v7466_v59  ;;  %v3682_v51 = vmul.f32 %v7477_v9, %v7460_v14  ;;  %v3699_v10 = vadd.f32 %v7464_v42, %v3679_v11 }
 0x942   :  { %v7484_v7 = vpop.f32.mrf.mxu0 }
 0x943   :  { %5142 = vset.pattern.permute.xlu0 %v8466_v39  ;;  %v2856_v38 = vpack.c.bf16 %v7484_v7, %v7471_v32  ;;  %v3702_v3 = vadd.f32 %v7464_v42, %v3682_v51  ;;  %v3680_v19 = vmul.f32 %v7460_v14, %v7484_v7 }
 0x945   :  { %2979 = vperm.xlu1 %5138, %v7477_v9   ;;  %v7494_v31 = vpack.c.bf16 %v3702_v3, %v3701_v37  ;;  %v3700_v54 = vadd.f32 %v7464_v42, %v3680_v19 }
 0x947   :  { %8469 = vst [vmem:[#allocation16_spill] sm:$0xff] %v7494_v31  ;;  %v7497_v60 = vpack.c.bf16 %v3700_v54, %v3699_v10 }
 0x949   :  { %8470 = vst [vmem:[#allocation13_spill] sm:$0xff] %v7497_v60  ;;  %2969 = vperm.xlu1 %5138, %v7484_v7  }
 0x94d   :  { %5140 = vset.pattern.permute.xlu1 %v8467_v33 }
 0x94e   :  { %3460 = vperm.xlu1 %5140, %v7484_v7  }
 0x952   :  { %5141 = vset.pattern.permute.xlu1 %v8466_v39  ;;  %v7503_v47 = vpop.f32.mrf.mxu0 }
 0x953   :  { %2994 = vperm.xlu1 %5141, %v7503_v47   ;;  %v3685_v63 = vmul.f32 %v7503_v47, %v7460_v14 }
 0x954   :  { %v7508_v52 = vpop.f32.mrf.mxu0 }
 0x955   :  { %v3705_v27 = vadd.f32 %v7464_v42, %v3685_v63  ;;  %v3683_v58 = vmul.f32 %v7460_v14, %v7508_v52 }
 0x956   :  { %v7513_v34 = vpop.f32.mrf.mxu0 }
 0x957   :  { %2984 = vperm.xlu1 %5141, %v7508_v52   ;;  %v3686_v39 = vmul.f32 %v7513_v34, %v7460_v14  ;;  %v3703_v20 = vadd.f32 %v7464_v42, %v3683_v58 }
 0x958   :  { %v7518_v44 = vpop.f32.mrf.mxu0 }
 0x959   :  { %v3706_v22 = vadd.f32 %v7464_v42, %v3686_v39  ;;  %v3684_v57 = vmul.f32 %v7460_v14, %v7518_v44 }
 0x95b   :  { %2999 = vperm.xlu1 %5141, %v7513_v34   ;;  %v7525_v30 = vpack.c.bf16 %v3706_v22, %v3705_v27  ;;  %v3704_v35 = vadd.f32 %v7464_v42, %v3684_v57 }
 0x95d   :  { %v7530_v8 = vpack.c.bf16 %v3704_v35, %v3703_v20 }
 0x95e   :  { %v7528_v13 = vpop.f32.mrf.mxu0 }
 0x95f   :  { %8471 = vst [vmem:[#allocation14_spill] sm:$0xff] %v7530_v8  ;;  %2989 = vperm.xlu1 %5141, %v7518_v44   ;;  %v3689_v23 = vmul.f32 %v7528_v13, %v7460_v14  ;;  %v3212_v3 = vmul.f32 %v7528_v13, %v7561_v48 }
 0x960   :  { %v7535_v56 = vpop.f32.mrf.mxu0 }
 0x961   :  { %v3709_v1 = vadd.f32 %v7464_v42, %v3689_v23  ;;  %v3687_v61 = vmul.f32 %v7460_v14, %v7535_v56  ;;  %v3232_v23 = vadd.f32 %v7581_v62, %v3212_v3 }
 0x962   :  { %v7540_v49 = vpop.f32.mrf.mxu0 }
 0x963   :  { %3014 = vperm.xlu1 %5141, %v7528_v13   ;;  %v3690_v53 = vmul.f32 %v7540_v49, %v7460_v14  ;;  %v3707_v25 = vadd.f32 %v7464_v42, %v3687_v61  ;;  %v3213_v4 = vmul.f32 %v7540_v49, %v7561_v48 }
 0x964   :  { %v7545_v6 = vpop.f32.mrf.mxu0 }
 0x965   :  { %3009 = vperm.xlu0 %5142, %v7545_v6   ;;  %v3710_v15 = vadd.f32 %v7464_v42, %v3690_v53  ;;  %v3688_v5 = vmul.f32 %v7460_v14, %v7545_v6  ;;  %v3233_v22 = vadd.f32 %v7581_v62, %v3213_v4  ;;  %v3211_v57 = vmul.f32 %v7561_v48, %v7545_v6 }
 0x967   :  { %3004 = vperm.xlu1 %5141, %v7535_v56   ;;  %v7553_v26 = vpack.c.bf16 %v3710_v15, %v3709_v1  ;;  %v3708_v0 = vadd.f32 %v7464_v42, %v3688_v5  ;;  %v3210_v1 = vmul.f32 %v7561_v48, %v7535_v56  ;;  %v3243_v53 = vpack.c.bf16 %v3233_v22, %v3232_v23 }
 0x968   :  { %v3209_v15 = vmul.f32 %v7513_v34, %v7561_v48  ;;  %v2859_v22 = vpack.c.bf16 %v7513_v34, %v7503_v47 }
 0x969   :  { %v7556_v28 = vpop.f32.mrf.mxu0  ;;  %v7563_v55 = vpack.c.bf16 %v3708_v0, %v3707_v25  ;;  %v3231_v25 = vadd.f32 %v7581_v62, %v3211_v57  ;;  %v3230_v5 = vadd.f32 %v7581_v62, %v3210_v1 }
 0x96a   :  { %3034 = vperm.xlu0 %5142, %v7556_v28   ;;  %v3216_v45 = vmul.f32 %v7556_v28, %v7561_v48 }
 0x96b   :  { %3019 = vperm.xlu1 %5141, %v7540_v49   ;;  %v7566_v46 = vpop.f32.mrf.mxu0  ;;  %v3242_v0 = vpack.c.bf16 %v3231_v25, %v3230_v5 }
 0x96c   :  { %v3691_v40 = vmul.f32 %v7460_v14, %v7566_v46  ;;  %v3214_v17 = vmul.f32 %v7561_v48, %v7566_v46  ;;  %v3236_v51 = vadd.f32 %v7581_v62, %v3216_v45  ;;  %v2861_v45 = vpack.c.bf16 %v7540_v49, %v7528_v13 }
 0x96d   :  { %v7572_v2 = vpop.f32.mrf.mxu0 }
 0x96e   :  { %3024 = vperm.xlu0 %5142, %v7566_v46   ;;  %v2863_v12 = vpack.c.bf16 %v7572_v2, %v7556_v28  ;;  %v3217_v29 = vmul.f32 %v7572_v2, %v7561_v48  ;;  %v3711_v37 = vadd.f32 %v7464_v42, %v3691_v40  ;;  %v3234_v63 = vadd.f32 %v7581_v62, %v3214_v17 }
 0x96f   :  { %3039 = vperm.xlu1 %5141, %v7572_v2   ;;  %v7586_v41 = vpop.f32.mrf.mxu0  ;;  %v3229_v40 = vadd.f32 %v7581_v62, %v3209_v15  ;;  %v3206_v17 = vmul.f32 %v7561_v48, %v7508_v52  ;;  %v2912_v4 = vsel %vm311_vm3, %v2861_v45, 0 }
 0x970   :  { %v2918_v11 = vsel %vm311_vm3, %v2863_v12, 0  ;;  %v3237_v10 = vadd.f32 %v7581_v62, %v3217_v29  ;;  %v3215_v43 = vmul.f32 %v7561_v48, %v7586_v41  ;;  %v3692_v19 = vmul.f32 %v7460_v14, %v7586_v41 }
 0x971   :  { %4939 = vmatpush3.bf16.xpose.msra.mxu1 %v2918_v11  ;;  %v2862_v20 = vpack.c.bf16 %v7586_v41, %v7566_v46  ;;  %v3207_v12 = vmul.f32 %v7561_v48, %v7518_v44 }
 0x972   :  { %5144 = vset.pattern.permute.xlu0 %v8467_v33  ;;  %v3245_v54 = vpack.c.bf16 %v3237_v10, %v3236_v51  ;;  %v3235_v27 = vadd.f32 %v7581_v62, %v3215_v43  ;;  %4940 = vmatprep.subr.bf16.mxu1 %v8463_v21  ;;  %v3712_v58 = vadd.f32 %v7464_v42, %v3692_v19 }
 0x973   :  { %3468 = vperm.xlu0 %5144, %v7477_v9   ;;  %3029 = vperm.xlu1 %5141, %v7586_v41   ;;  %v2915_v61 = vsel %vm311_vm3, %v2862_v20, 0  ;;  %v3227_v11 = vadd.f32 %v7581_v62, %v3207_v12  ;;  %v3205_v51 = vmul.f32 %v7477_v9, %v7561_v48  ;;  %v3226_v10 = vadd.f32 %v7581_v62, %v3206_v17 }
 0x974   :  { %4958 = vmatprep.subr.bf16.mxu0 %v3245_v54  ;;  %v3244_v39 = vpack.c.bf16 %v3235_v27, %v3234_v63  ;;  %v7612_v35 = vpack.c.bf16 %v3712_v58, %v3711_v37  ;;  %v3204_v43 = vmul.f32 %v7466_v59, %v7561_v48  ;;  %v2860_v19 = vpack.c.bf16 %v7545_v6, %v7535_v56 }
 0x975   :  { %4959 = vmatpush3.bf16.msra.mxu0 %v3245_v54  ;;  %v3240_v3 = vpack.c.bf16 %v3227_v11, %v3226_v10  ;;  %v3225_v54 = vadd.f32 %v7581_v62, %v3205_v51  ;;  %v3203_v63 = vmul.f32 %v7561_v48, %v7484_v7  ;;  %v3202_v58 = vmul.f32 %v7561_v48, %v7471_v32 }
 0x976   :  { %4960 = vmatprep.subr.bf16.mxu0 %v3244_v39  ;;  %v3224_v27 = vadd.f32 %v7581_v62, %v3204_v43 }
 0x977   :  { %3476 = vperm.xlu0 %5144, %v7518_v44   ;;  %5143 = vset.pattern.permute.xlu1 %v8467_v33  ;;  %v3208_v33 = vmul.f32 %v7503_v47, %v7561_v48  ;;  %v3222_v20 = vadd.f32 %v7581_v62, %v3202_v58  ;;  %v3693_v48 = vmul.f32 %v7556_v28, %v7460_v14 }
 0x978   :  { %3464 = vperm.xlu1 %5143, %v7466_v59  }
 0x979   :  { %4941 = vmatpush3.bf16.xpose.msra.mxu1 %v2915_v61  ;;  %4961 = vmatpush3.bf16.msra.mxu0 %v3244_v39  ;;  %v3228_v29 = vadd.f32 %v7581_v62, %v3208_v33  ;;  %v3239_v39 = vpack.c.bf16 %v3225_v54, %v3224_v27  ;;  %v3713_v57 = vadd.f32 %v7464_v42, %v3693_v48 }
 0x97a   :  { %4962 = vmatprep.subr.bf16.mxu0 %v3243_v53  ;;  %4942 = vmatprep.subr.bf16.mxu1 %v8463_v21 }
 0x97b   :  { %3484 = vperm.xlu0 %5144, %v7513_v34   ;;  %v3241_v37 = vpack.c.bf16 %v3229_v40, %v3228_v29  ;;  %v2900_v34 = vsel %vm311_vm3, %v2857_v16, 0 }
 0x97c   :  { %3472 = vperm.xlu1 %5143, %v7508_v52  }
 0x97d   :  { %4963 = vmatpush3.bf16.msra.mxu0 %v3243_v53 }
 0x97e   :  { %4964 = vmatprep.subr.bf16.mxu0 %v3242_v0 }
 0x97f   :  { %3492 = vperm.xlu0 %5144, %v7545_v6   ;;  %v3694_v6 = vmul.f32 %v7572_v2, %v7460_v14  ;;  %v2906_v14 = vsel %vm311_vm3, %v2859_v22, 0 }
 0x980   :  { %3480 = vperm.xlu1 %5143, %v7503_v47   ;;  %v2858_v47 = vpack.c.bf16 %v7518_v44, %v7508_v52  ;;  %v2897_v52 = vsel %vm311_vm3, %v2856_v38, 0  ;;  %v2885_v44 = vpop.trf.xlu0 }
 0x981   :  { %4943 = vmatpush3.bf16.xpose.msra.mxu1 %v2912_v4  ;;  %4965 = vmatpush3.bf16.msra.mxu0 %v3242_v0 }
 0x982   :  { %4966 = vmatprep.subr.bf16.mxu0 %v3241_v37  ;;  %4944 = vmatprep.subr.bf16.mxu1 %v8463_v21 }
 0x983   :  { %3500 = vperm.xlu0 %5144, %v7540_v49   ;;  %v2909_v49 = vsel %vm311_vm3, %v2860_v19, 0 }
 0x984   :  { %3488 = vperm.xlu1 %5143, %v7535_v56   ;;  %v3223_v56 = vadd.f32 %v7581_v62, %v3203_v63 }
 0x985   :  { %4967 = vmatpush3.bf16.msra.mxu0 %v3241_v37 }
 0x986   :  { %4968 = vmatprep.subr.bf16.mxu0 %v3240_v3 }
 0x987   :  { %3516 = vperm.xlu0 %5144, %v7572_v2   ;;  %v3714_v2 = vadd.f32 %v7464_v42, %v3694_v6  ;;  %v2903_v42 = vsel %vm311_vm3, %v2858_v47, 0 }
 0x988   :  { %3496 = vperm.xlu1 %5143, %v7528_v13   ;;  %v3238_v13 = vpack.c.bf16 %v3223_v56, %v3222_v20  ;;  %v7722_v56 = vld [vmem:[%s8446_s6 + $0x8] sm:$0xff]  ;;  %v7730_v20 = vld [vmem:[%s8446_s6] sm:$0xff] }
 0x989   :  { %4945 = vmatpush3.bf16.xpose.msra.mxu1 %v2909_v49  ;;  %4969 = vmatpush3.bf16.msra.mxu0 %v3240_v3  ;;  %v7677_v62 = vpack.c.bf16 %v3714_v2, %v3713_v57 }
 0x98a   :  { %4970 = vmatprep.subr.bf16.mxu0 %v3239_v39  ;;  %4946 = vmatprep.subr.bf16.mxu1 %v8463_v21 }
 0x98b   :  { %3508 = vperm.xlu0 %5144, %v7586_v41  }
 0x98c   :  { %3504 = vperm.xlu1 %5143, %v7566_v46  }
 0x98d   :  { %4971 = vmatpush3.bf16.msra.mxu0 %v3239_v39 }
 0x98e   :  { %4972 = vmatprep.subr.bf16.mxu0 %v3238_v13 }
 0x98f   :  { %5145 = vset.pattern.permute.xlu0 %v8465_v36 }
 0x990   :  { %3512 = vperm.xlu1 %5143, %v7556_v28  }
 0x991   :  { %4947 = vmatpush3.bf16.xpose.msra.mxu1 %v2906_v14  ;;  %4973 = vmatpush3.bf16.msra.mxu0 %v3238_v13 }
 0x992   :  { %4990 = vmatprep.subr.bf16.mxu0 %v7677_v62  ;;  %4948 = vmatprep.subr.bf16.mxu1 %v8463_v21 }
 0x994   :  { %5146 = vset.pattern.permute.xlu1 %v8465_v36 }
 0x999   :  { %4949 = vmatpush3.bf16.xpose.msra.mxu1 %v2903_v42 }
 0x99a   :  { %4950 = vmatprep.subr.bf16.mxu1 %v8463_v21 }
 0x9a1   :  { %4951 = vmatpush3.bf16.xpose.msra.mxu1 %v2900_v34  ;;  %v7740_v34 = vld [vmem:[%s8446_s6 + $0x10] sm:$0xff] }
 0x9a2   :  { %4952 = vmatprep.subr.bf16.mxu1 %v8463_v21 }
 0x9a9   :  { %4953 = vmatpush3.bf16.xpose.msra.mxu1 %v2897_v52 }
 0x9aa   :  { %5022 = vmatprep.subr.bf16.mxu1 %v8463_v21 }
 0x9b0   :  { %4955 = vmatmul.mubr.msk.bf16.vlgmr.msra.gmra.mxu1 %vm311_vm3, %v2885_v44  ;;  %v7748_v44 = vld [vmem:[%s8446_s6 + $0x18] sm:$0xff] }
 0x9b1   :  { %5038 = vmatprep.mubr.msk.bf16.mxu1 %vm5689_vm2, %v8463_v21 }
 0x9b8   :  { %v2975_v59 = vpop.permute.xlu1 %2974 }
 0x9ba   :  { %v7701_v1 = vpop.permute.xlu0 %3456 }
 0x9bc   :  { %v2965_v9 = vpop.permute.xlu1 %2964 }
 0x9c0   :  { %v2980_v16 = vpop.permute.xlu1 %2979 }
 0x9c4   :  { %v2970_v28 = vpop.permute.xlu1 %2969 }
 0x9c9   :  { %v7699_v46 = vpop.permute.xlu1 %3460 }
 0x9ce   :  { %v2995_v41 = vpop.permute.xlu1 %2994 }
 0x9d2   :  { %v2985_v23 = vpop.permute.xlu1 %2984 }
 0x9d6   :  { %v3000_v32 = vpop.permute.xlu1 %2999 }
 0x9da   :  { %v2990_v7 = vpop.permute.xlu1 %2989 }
 0x9de   :  { %v3015_v38 = vpop.permute.xlu1 %3014 }
 0x9e0   :  { %v3010_v53 = vpop.permute.xlu0 %3009 }
 0x9e2   :  { %v3005_v61 = vpop.permute.xlu1 %3004 }
 0x9e5   :  { %v7709_v0 = vpop.permute.xlu0 %3034 }
 0x9e6   :  { %v3020_v15 = vpop.permute.xlu1 %3019 }
 0x9e9   :  { %v3025_v39 = vpop.permute.xlu0 %3024 }
 0x9ea   :  { %v3040_v3 = vpop.permute.xlu1 %3039 }
 0x9ee   :  { %v3030_v42 = vpop.permute.xlu1 %3029 }
 0xa70   :  { %v7703_v25 = vpop.f32.mrf.mxu1 }
 0xa71   :  { %v7707_v5 = vrot.slane %v7703_v25, %v8472_v24 }
 0xa72   :  { %v4956_v33 = vpop.f32.mrf.mxu1 }
 0xa73   :  { %v3047_v45 = vadd.f32 %v7707_v5, %v2970_v28  ;;  %v3046_v40 = vadd.f32 %v7707_v5, %v2965_v9  ;;  %v3048_v12 = vadd.f32 %v7707_v5, %v2975_v59  ;;  %v3049_v29 = vadd.f32 %v7707_v5, %v2980_v16  ;;  %v7755_v28 = vpop.permute.xlu0 %3468 }
 0xa74   :  { %v2957_v17 = vpop.f32.mrf.mxu1  ;;  %v3050_v4 = vadd.f32 %v7707_v5, %v2985_v23  ;;  %v3051_v37 = vadd.f32 %v7707_v5, %v2990_v7  ;;  %v3052_v58 = vadd.f32 %v7707_v5, %v2995_v41  ;;  %v3053_v49 = vadd.f32 %v7707_v5, %v3000_v32  ;;  %v7762_v41 = vld [vmem:[%s8446_s6 + $0x20] sm:$0xff]  ;;  %v7770_v32 = vld [vmem:[%s8446_s6 + $0x28] sm:$0xff] }
 0xa75   :  { %v3063_v11 = vmul.f32 0.2, %v3047_v45  ;;  %v3062_v51 = vmul.f32 0.2, %v3046_v40  ;;  %v3064_v24 = vmul.f32 0.2, %v3048_v12  ;;  %v3054_v9 = vadd.f32 %v7707_v5, %v3005_v61 }
 0xa76   :  { %v4957_v10 = vpop.f32.mrf.mxu1  ;;  %v3065_v43 = vmul.f32 0.2, %v3049_v29  ;;  %v3066_v63 = vmul.f32 0.2, %v3050_v4  ;;  %v3067_v27 = vmul.f32 0.2, %v3051_v37  ;;  %v3055_v16 = vadd.f32 %v7707_v5, %v3010_v53 }
 0xa77   :  { %v3079_v19 = vmax.f32 %v3047_v45, %v3063_v11  ;;  %v3078_v54 = vmax.f32 %v3046_v40, %v3062_v51  ;;  %v3080_v13 = vmax.f32 %v3048_v12, %v3064_v24  ;;  %v3068_v14 = vmul.f32 0.2, %v3052_v58  ;;  %v7782_v17 = vld [vmem:[%s8446_s6 + $0x30] sm:$0xff]  ;;  %v3477_v51 = vpop.permute.xlu0 %3476 }
 0xa78   :  { %v3081_v22 = vmax.f32 %v3049_v29, %v3065_v43  ;;  %v3082_v2 = vmax.f32 %v3050_v4, %v3066_v63  ;;  %v3083_v57 = vmax.f32 %v3051_v37, %v3067_v27  ;;  %v3069_v47 = vmul.f32 0.2, %v3053_v49  ;;  %v3465_v29 = vpop.permute.xlu1 %3464  ;;  %v7790_v37 = vld [vmem:[%s8446_s6 + $0x38] sm:$0xff] }
 0xa79   :  { %v7725_v6 = vadd.f32 %v7722_v56, %v3079_v19  ;;  %v7733_v48 = vadd.f32 %v7730_v20, %v3078_v54  ;;  %v7743_v52 = vadd.f32 %v7740_v34, %v3080_v13  ;;  %v3084_v61 = vmax.f32 %v3052_v58, %v3068_v14  ;;  %v7809_v13 = vld [vmem:[%s8446_s6 + $0x40] sm:$0xff] }
 0xa7a   :  { %v7751_v59 = vadd.f32 %v7748_v44, %v3081_v22  ;;  %v7765_v23 = vadd.f32 %v7762_v41, %v3082_v2  ;;  %v7773_v7 = vadd.f32 %v7770_v32, %v3083_v57  ;;  %v3085_v53 = vmax.f32 %v3053_v49, %v3069_v47 }
 0xa7b   :  { %3112 = vmax.xlane.f32.xlu0 %v7725_v6  ;;  %3110 = vmax.xlane.f32.xlu1 %v7733_v48  ;;  %v3070_v33 = vmul.f32 0.2, %v3054_v9  ;;  %v3071_v45 = vmul.f32 0.2, %v3055_v16  ;;  %v3056_v40 = vadd.f32 %v7707_v5, %v3015_v38  ;;  %v3057_v12 = vadd.f32 %v7707_v5, %v3020_v15 }
 0xa7c   :  { %v7785_v4 = vadd.f32 %v7782_v17, %v3084_v61  ;;  %v7793_v38 = vadd.f32 %v7790_v37, %v3085_v53  ;;  %v3058_v15 = vadd.f32 %v7707_v5, %v3025_v39  ;;  %v3059_v11 = vadd.f32 %v7707_v5, %v3030_v42  ;;  %v3473_v39 = vpop.permute.xlu1 %3472  ;;  %v7827_v42 = vld [vmem:[%s8446_s6 + $0x50] sm:$0xff] }
 0xa7d   :  { %v3086_v24 = vmax.f32 %v3054_v9, %v3070_v33  ;;  %v3087_v10 = vmax.f32 %v3055_v16, %v3071_v45  ;;  %v3072_v43 = vmul.f32 0.2, %v3056_v40  ;;  %v3073_v19 = vmul.f32 0.2, %v3057_v12  ;;  %v7835_v16 = vld [vmem:[%s8446_s6 + $0x58] sm:$0xff] }
 0xa7e   :  { %v7799_v54 = vrot.slane %v7703_v25, %v8468_v18  ;;  %v3074_v63 = vmul.f32 0.2, %v3058_v15  ;;  %v3075_v27 = vmul.f32 0.2, %v3059_v11  ;;  %v3060_v58 = vadd.f32 %v7707_v5, %v7709_v0  ;;  %v7817_v25 = vld [vmem:[%s8446_s6 + $0x48] sm:$0xff] }
 0xa7f   :  { %3114 = vmax.xlane.f32.xlu0 %v7743_v52  ;;  %3116 = vmax.xlane.f32.xlu1 %v7751_v59  ;;  %v3061_v49 = vadd.f32 %v7707_v5, %v3040_v3  ;;  %v7812_v18 = vadd.f32 %v7809_v13, %v3086_v24  ;;  %v7820_v22 = vadd.f32 %v7817_v25, %v3087_v10  ;;  %v3485_v5 = vpop.permute.xlu0 %3484 }
 0xa80   :  { %v3088_v0 = vmax.f32 %v3056_v40, %v3072_v43  ;;  %v3089_v2 = vmax.f32 %v3057_v12, %v3073_v19  ;;  %v3090_v3 = vmax.f32 %v3058_v15, %v3074_v63  ;;  %v3091_v57 = vmax.f32 %v3059_v11, %v3075_v27  ;;  %v3481_v45 = vpop.permute.xlu1 %3480  ;;  %v7849_v40 = vld [vmem:[%s8446_s6 + $0x60] sm:$0xff]  ;;  %v7870_v27 = vld [vmem:[%s8446_s6 + $0x70] sm:$0xff] }
 0xa81   :  { %v3076_v14 = vmul.f32 0.2, %v3060_v58  ;;  %v3077_v47 = vmul.f32 0.2, %v3061_v49  ;;  %v3523_v53 = vadd.f32 %v7799_v54, %v7701_v1  ;;  %v3524_v33 = vadd.f32 %v7799_v54, %v7699_v46  ;;  %v7857_v1 = vld [vmem:[%s8446_s6 + $0x68] sm:$0xff] }
 0xa82   :  { %v7830_v9 = vadd.f32 %v7827_v42, %v3088_v0  ;;  %v7838_v61 = vadd.f32 %v7835_v16, %v3089_v2  ;;  %v7852_v12 = vadd.f32 %v7849_v40, %v3090_v3  ;;  %v7860_v46 = vadd.f32 %v7857_v1, %v3091_v57 }
 0xa83   :  { %3118 = vmax.xlane.f32.xlu0 %v7765_v23  ;;  %3120 = vmax.xlane.f32.xlu1 %v7773_v7  ;;  %v3092_v15 = vmax.f32 %v3060_v58, %v3076_v14  ;;  %v3093_v11 = vmax.f32 %v3061_v49, %v3077_v47  ;;  %v3493_v24 = vpop.permute.xlu0 %3492  ;;  %v3539_v10 = vmul.f32 0.2, %v3523_v53  ;;  %v3540_v43 = vmul.f32 0.2, %v3524_v33  ;;  %v7878_v49 = vld [vmem:[%s8446_s6 + $0x78] sm:$0xff] }
 0xa84   :  { %v3525_v19 = vadd.f32 %v7799_v54, %v3465_v29  ;;  %v3526_v63 = vadd.f32 %v7799_v54, %v7755_v28  ;;  %v3527_v28 = vadd.f32 %v7799_v54, %v3473_v39  ;;  %v3528_v0 = vadd.f32 %v7799_v54, %v3477_v51  ;;  %v3489_v2 = vpop.permute.xlu1 %3488 }
 0xa85   :  { %v7873_v58 = vadd.f32 %v7870_v27, %v3092_v15  ;;  %v7881_v29 = vadd.f32 %v7878_v49, %v3093_v11  ;;  %v3555_v3 = vmax.f32 %v3523_v53, %v3539_v10  ;;  %v3556_v57 = vmax.f32 %v3524_v33, %v3540_v43 }
 0xa86   :  { %v3541_v14 = vmul.f32 0.2, %v3525_v19  ;;  %v3542_v47 = vmul.f32 0.2, %v3526_v63  ;;  %v3543_v15 = vmul.f32 0.2, %v3527_v28  ;;  %v3529_v21 = vadd.f32 %v7799_v54, %v3481_v45 }
 0xa87   :  { %3122 = vmax.xlane.f32.xlu0 %v7785_v4  ;;  %3124 = vmax.xlane.f32.xlu1 %v7793_v38  ;;  %v3501_v36 = vpop.permute.xlu0 %3500  ;;  %v3544_v50 = vmul.f32 0.2, %v3528_v0  ;;  %v3530_v11 = vadd.f32 %v7799_v54, %v3485_v5  ;;  %v7890_v39 = vadd.f32 %v7730_v20, %v3555_v3  ;;  %v7893_v51 = vadd.f32 %v7722_v56, %v3556_v57 }
 0xa88   :  { %v3557_v53 = vmax.f32 %v3525_v19, %v3541_v14  ;;  %v3558_v33 = vmax.f32 %v3526_v63, %v3542_v47  ;;  %v3497_v10 = vpop.permute.xlu1 %3496  ;;  %v3559_v43 = vmax.f32 %v3527_v28, %v3543_v15  ;;  %v3545_v31 = vmul.f32 0.2, %v3529_v21 }
 0xa89   :  { %v3560_v60 = vmax.f32 %v3528_v0, %v3544_v50  ;;  %v3546_v8 = vmul.f32 0.2, %v3530_v11  ;;  %v3531_v56 = vadd.f32 %v7799_v54, %v3489_v2  ;;  %v3532_v19 = vadd.f32 %v7799_v54, %v3493_v24 }
 0xa8a   :  { %v7898_v5 = vadd.f32 %v7740_v34, %v3557_v53  ;;  %v7901_v20 = vadd.f32 %v7748_v44, %v3558_v33  ;;  %v7908_v63 = vadd.f32 %v7762_v41, %v3559_v43  ;;  %v3561_v28 = vmax.f32 %v3529_v21, %v3545_v31 }
 0xa8b   :  { %3126 = vmax.xlane.f32.xlu0 %v7812_v18  ;;  %3128 = vmax.xlane.f32.xlu1 %v7820_v22  ;;  %v3517_v45 = vpop.permute.xlu0 %3516  ;;  %v7911_v50 = vadd.f32 %v7770_v32, %v3560_v60  ;;  %v3562_v34 = vmax.f32 %v3530_v11, %v3546_v8  ;;  %v3547_v3 = vmul.f32 0.2, %v3531_v56  ;;  %v3548_v44 = vmul.f32 0.2, %v3532_v19 }
 0xa8c   :  { %v3505_v0 = vpop.permute.xlu1 %3504  ;;  %v3533_v57 = vadd.f32 %v7799_v54, %v3497_v10  ;;  %v3534_v2 = vadd.f32 %v7799_v54, %v3501_v36  ;;  %v7918_v41 = vadd.f32 %v7782_v17, %v3561_v28 }
 0xa8d   :  { %v7921_v60 = vadd.f32 %v7790_v37, %v3562_v34  ;;  %v3535_v21 = vadd.f32 %v7799_v54, %v3505_v0  ;;  %v3563_v8 = vmax.f32 %v3531_v56, %v3547_v3  ;;  %v3564_v32 = vmax.f32 %v3532_v19, %v3548_v44 }
 0xa8e   :  { %v3549_v14 = vmul.f32 0.2, %v3533_v57  ;;  %v3550_v47 = vmul.f32 0.2, %v3534_v2  ;;  %v3538_v37 = vadd.f32 %v7799_v54, %v3517_v45 }
 0xa8f   :  { %3130 = vmax.xlane.f32.xlu0 %v7830_v9  ;;  %3132 = vmax.xlane.f32.xlu1 %v7838_v61  ;;  %v3509_v24 = vpop.permute.xlu0 %3508  ;;  %v3551_v15 = vmul.f32 0.2, %v3535_v21  ;;  %v7930_v53 = vadd.f32 %v7809_v13, %v3563_v8  ;;  %v7933_v33 = vadd.f32 %v7817_v25, %v3564_v32 }
 0xa90   :  { %v3536_v31 = vadd.f32 %v7799_v54, %v3509_v24  ;;  %v3513_v36 = vpop.permute.xlu1 %3512  ;;  %v3565_v10 = vmax.f32 %v3533_v57, %v3549_v14  ;;  %v3566_v43 = vmax.f32 %v3534_v2, %v3550_v47  ;;  %v3554_v13 = vmul.f32 0.2, %v3538_v37 }
 0xa91   :  { %v3537_v17 = vadd.f32 %v7799_v54, %v3513_v36  ;;  %v3567_v56 = vmax.f32 %v3535_v21, %v3551_v15 }
 0xa92   :  { %v3552_v11 = vmul.f32 0.2, %v3536_v31  ;;  %v7938_v28 = vadd.f32 %v7827_v42, %v3565_v10  ;;  %v7941_v34 = vadd.f32 %v7835_v16, %v3566_v43  ;;  %v3570_v3 = vmax.f32 %v3538_v37, %v3554_v13 }
 0xa93   :  { %3134 = vmax.xlane.f32.xlu0 %v7852_v12  ;;  %3136 = vmax.xlane.f32.xlu1 %v7860_v46  ;;  %v3553_v19 = vmul.f32 0.2, %v3537_v17  ;;  %v7946_v25 = vadd.f32 %v7849_v40, %v3567_v56 }
 0xa94   :  { %v3568_v54 = vmax.f32 %v3536_v31, %v3552_v11  ;;  %v7957_v16 = vadd.f32 %v7878_v49, %v3570_v3 }
 0xa95   :  { %v3569_v0 = vmax.f32 %v3537_v17, %v3553_v19 }
 0xa96   :  { %v7949_v45 = vadd.f32 %v7857_v1, %v3568_v54 }
 0xa97   :  { %3138 = vmax.xlane.f32.xlu0 %v7873_v58  ;;  %3140 = vmax.xlane.f32.xlu1 %v7881_v29  ;;  %v7954_v42 = vadd.f32 %v7870_v27, %v3569_v0 }
 0xa9b   :  { %3587 = vmax.xlane.f32.xlu0 %v7890_v39  ;;  %3589 = vmax.xlane.f32.xlu1 %v7893_v51 }
 0xa9f   :  { %3591 = vmax.xlane.f32.xlu0 %v7898_v5  ;;  %3593 = vmax.xlane.f32.xlu1 %v7901_v20 }
 0xaa3   :  { %3595 = vmax.xlane.f32.xlu0 %v7908_v63  ;;  %3597 = vmax.xlane.f32.xlu1 %v7911_v50 }
 0xaa7   :  { %3599 = vmax.xlane.f32.xlu0 %v7918_v41  ;;  %3601 = vmax.xlane.f32.xlu1 %v7921_v60 }
 0xaab   :  { %3603 = vmax.xlane.f32.xlu0 %v7930_v53  ;;  %3605 = vmax.xlane.f32.xlu1 %v7933_v33 }
 0xaaf   :  { %3607 = vmax.xlane.f32.xlu0 %v7938_v28  ;;  %3609 = vmax.xlane.f32.xlu1 %v7941_v34 }
 0xab3   :  { %3611 = vmax.xlane.f32.xlu0 %v7946_v25  ;;  %3613 = vmax.xlane.f32.xlu1 %v7949_v45 }
 0xab7   :  { %3615 = vmax.xlane.f32.xlu0 %v7954_v42  ;;  %3617 = vmax.xlane.f32.xlu1 %v7957_v16 }
 0xb04   :  { %v3113_v40 = vpop.xlane.xlu0 %3112  ;;  %v3111_v44 = vpop.xlane.xlu1 %3110 }
 0xb05   :  { %v3143_v1 = vsub.f32 %v7725_v6, %v3113_v40  ;;  %v3142_v57 = vsub.f32 %v7733_v48, %v3111_v44 }
 0xb07   :  { %v3160_v2 = vmul.f32 1.442695, %v3143_v1  ;;  %v3158_v24 = vmul.f32 1.442695, %v3142_v57 }
 0xb08   :  { %v3115_v21 = vpop.xlane.xlu0 %3114  ;;  %v3117_v31 = vpop.xlane.xlu1 %3116 }
 0xb09   :  { %5438 = vpow2.f32 %v3160_v2  ;;  %v3144_v27 = vsub.f32 %v7743_v52, %v3115_v21  ;;  %v3145_v49 = vsub.f32 %v7751_v59, %v3117_v31 }
 0xb0a   :  { %5440 = vpow2.f32 %v3158_v24 }
 0xb0b   :  { %v3162_v8 = vmul.f32 1.442695, %v3144_v27  ;;  %v3164_v32 = vmul.f32 1.442695, %v3145_v49 }
 0xb0c   :  { %v3119_v14 = vpop.xlane.xlu0 %3118  ;;  %v3121_v47 = vpop.xlane.xlu1 %3120 }
 0xb0d   :  { %5442 = vpow2.f32 %v3162_v8  ;;  %v3146_v36 = vsub.f32 %v7765_v23, %v3119_v14  ;;  %v3147_v6 = vsub.f32 %v7773_v7, %v3121_v47 }
 0xb0e   :  { %5444 = vpow2.f32 %v3164_v32 }
 0xb0f   :  { %v3166_v48 = vmul.f32 1.442695, %v3146_v36  ;;  %v3168_v15 = vmul.f32 1.442695, %v3147_v6 }
 0xb10   :  { %v3123_v11 = vpop.xlane.xlu0 %3122  ;;  %v3125_v17 = vpop.xlane.xlu1 %3124 }
 0xb11   :  { %5446 = vpow2.f32 %v3166_v48  ;;  %v3148_v52 = vsub.f32 %v7785_v4, %v3123_v11  ;;  %v3149_v59 = vsub.f32 %v7793_v38, %v3125_v17 }
 0xb12   :  { %5448 = vpow2.f32 %v3168_v15 }
 0xb13   :  { %v3170_v37 = vmul.f32 1.442695, %v3148_v52  ;;  %v3172_v10 = vmul.f32 1.442695, %v3149_v59 }
 0xb14   :  { %v3127_v43 = vpop.xlane.xlu0 %3126  ;;  %v3129_v56 = vpop.xlane.xlu1 %3128 }
 0xb15   :  { %5450 = vpow2.f32 %v3170_v37  ;;  %v3150_v23 = vsub.f32 %v7812_v18, %v3127_v43  ;;  %v3151_v7 = vsub.f32 %v7820_v22, %v3129_v56 }
 0xb16   :  { %v5439_v19 = vpop.eup %5438  ;;  %5452 = vpow2.f32 %v3172_v10 }
 0xb17   :  { %v5441_v54 = vpop.eup %5440  ;;  %v3174_v13 = vmul.f32 1.442695, %v3150_v23  ;;  %v3176_v0 = vmul.f32 1.442695, %v3151_v7 }
 0xb18   :  { %v3131_v3 = vpop.xlane.xlu0 %3130  ;;  %v3133_v40 = vpop.xlane.xlu1 %3132  ;;  %v3190_v4 = vpack.c.bf16 %v5439_v19, %v5441_v54 }
 0xb19   :  { %5454 = vpow2.f32 %v3174_v13  ;;  %v3152_v38 = vsub.f32 %v7830_v9, %v3131_v3  ;;  %v3153_v44 = vsub.f32 %v7838_v61, %v3133_v40 }
 0xb1a   :  { %v5443_v1 = vpop.eup %5442  ;;  %5456 = vpow2.f32 %v3176_v0  ;;  %4974 = vmatprep.mubr.bf16.mxu0 %v3190_v4 }
 0xb1b   :  { %v5445_v57 = vpop.eup %5444  ;;  %v3178_v18 = vmul.f32 1.442695, %v3152_v38  ;;  %v3180_v2 = vmul.f32 1.442695, %v3153_v44  ;;  %v8473_v44 = vld [vmem:[#allocation14_spill] sm:$0xff] }
 0xb1c   :  { %v3135_v22 = vpop.xlane.xlu0 %3134  ;;  %v3137_v24 = vpop.xlane.xlu1 %3136  ;;  %v3191_v21 = vpack.c.bf16 %v5445_v57, %v5443_v1 }
 0xb1d   :  { %5458 = vpow2.f32 %v3178_v18  ;;  %v3154_v31 = vsub.f32 %v7852_v12, %v3135_v22  ;;  %v3155_v27 = vsub.f32 %v7860_v46, %v3137_v24 }
 0xb1e   :  { %v5447_v49 = vpop.eup %5446  ;;  %5460 = vpow2.f32 %v3180_v2  ;;  %4975 = vmatmul.mubr.bf16.vlgmr.msra.gmra.mxu0 %v3191_v21  ;;  %v8474_v21 = vld [vmem:[#allocation16_spill] sm:$0xff] }
 0xb1f   :  { %v5449_v9 = vpop.eup %5448  ;;  %v3182_v8 = vmul.f32 1.442695, %v3154_v31  ;;  %v3184_v61 = vmul.f32 1.442695, %v3155_v27  ;;  %4991 = vmatpush3.bf16.msra.mxu0 %v7677_v62 }
 0xb20   :  { %4992 = vmatprep.subr.bf16.mxu0 %v7612_v35  ;;  %v3139_v32 = vpop.xlane.xlu0 %3138  ;;  %v3141_v14 = vpop.xlane.xlu1 %3140  ;;  %v3192_v47 = vpack.c.bf16 %v5449_v9, %v5447_v49 }
 0xb21   :  { %5462 = vpow2.f32 %v3182_v8  ;;  %v3156_v36 = vsub.f32 %v7873_v58, %v3139_v32  ;;  %v3157_v12 = vsub.f32 %v7881_v29, %v3141_v14  ;;  %v8475_v32 = vld [vmem:[#allocation13_spill] sm:$0xff] }
 0xb22   :  { %v5451_v6 = vpop.eup %5450  ;;  %5464 = vpow2.f32 %v3184_v61  ;;  %4978 = vmatprep.mubr.bf16.mxu0 %v3192_v47 }
 0xb23   :  { %v5453_v46 = vpop.eup %5452  ;;  %v3186_v48 = vmul.f32 1.442695, %v3156_v36  ;;  %v3188_v15 = vmul.f32 1.442695, %v3157_v12  ;;  %4993 = vmatpush3.bf16.msra.mxu0 %v7612_v35 }
 0xb24   :  { %4994 = vmatprep.subr.bf16.mxu0 %v7553_v26  ;;  %v3588_v62 = vpop.xlane.xlu0 %3587  ;;  %v3590_v11 = vpop.xlane.xlu1 %3589  ;;  %v3193_v17 = vpack.c.bf16 %v5453_v46, %v5451_v6 }
 0xb25   :  { %5466 = vpow2.f32 %v3186_v48  ;;  %v3619_v52 = vsub.f32 %v7890_v39, %v3588_v62  ;;  %v3620_v58 = vsub.f32 %v7893_v51, %v3590_v11 }
 0xb26   :  { %v5455_v59 = vpop.eup %5454  ;;  %5468 = vpow2.f32 %v3188_v15  ;;  %4979 = vmatmul.mubr.bf16.gmra.mxu0 %v3193_v17  ;;  %v8476_v17 = vmov 0.0  }
 0xb27   :  { %v5457_v29 = vpop.eup %5456  ;;  %v3635_v37 = vmul.f32 1.442695, %v3619_v52  ;;  %v3637_v10 = vmul.f32 1.442695, %v3620_v58  ;;  %4995 = vmatpush3.bf16.msra.mxu0 %v7553_v26 }
 0xb28   :  { %4996 = vmatprep.subr.bf16.mxu0 %v7563_v55  ;;  %v3592_v35 = vpop.xlane.xlu0 %3591  ;;  %v3594_v43 = vpop.xlane.xlu1 %3593  ;;  %v3194_v56 = vpack.c.bf16 %v5457_v29, %v5455_v59 }
 0xb29   :  { %5470 = vpow2.f32 %v3635_v37  ;;  %v3621_v23 = vsub.f32 %v7898_v5, %v3592_v35  ;;  %v3622_v39 = vsub.f32 %v7901_v20, %v3594_v43 }
 0xb2a   :  { %v5459_v7 = vpop.eup %5458  ;;  %5472 = vpow2.f32 %v3637_v10  ;;  %4982 = vmatprep.mubr.bf16.mxu0 %v3194_v56 }
 0xb2b   :  { %v5461_v51 = vpop.eup %5460  ;;  %v3639_v19 = vmul.f32 1.442695, %v3621_v23  ;;  %v3641_v54 = vmul.f32 1.442695, %v3622_v39  ;;  %4997 = vmatpush3.bf16.msra.mxu0 %v7563_v55 }
 0xb2c   :  { %4998 = vmatprep.subr.bf16.mxu0 %v7525_v30  ;;  %v3596_v26 = vpop.xlane.xlu0 %3595  ;;  %v3598_v13 = vpop.xlane.xlu1 %3597  ;;  %v3195_v0 = vpack.c.bf16 %v5461_v51, %v5459_v7 }
 0xb2d   :  { %5474 = vpow2.f32 %v3639_v19  ;;  %v3623_v3 = vsub.f32 %v7908_v63, %v3596_v26  ;;  %v3624_v5 = vsub.f32 %v7911_v50, %v3598_v13 }
 0xb2e   :  { %v5463_v40 = vpop.eup %5462  ;;  %5476 = vpow2.f32 %v3641_v54  ;;  %4983 = vmatmul.mubr.bf16.gmra.mxu0 %v3195_v0 }
 0xb2f   :  { %v5465_v20 = vpop.eup %5464  ;;  %v3643_v4 = vmul.f32 1.442695, %v3623_v3  ;;  %v3645_v38 = vmul.f32 1.442695, %v3624_v5  ;;  %4999 = vmatpush3.bf16.msra.mxu0 %v7525_v30 }
 0xb30   :  { %5000 = vmatprep.subr.bf16.mxu0 %v8473_v44  ;;  %v3600_v55 = vpop.xlane.xlu0 %3599  ;;  %v3602_v1 = vpop.xlane.xlu1 %3601  ;;  %v3196_v57 = vpack.c.bf16 %v5465_v20, %v5463_v40 }
 0xb31   :  { %5478 = vpow2.f32 %v3643_v4  ;;  %v3625_v18 = vsub.f32 %v7918_v41, %v3600_v55  ;;  %v3626_v63 = vsub.f32 %v7921_v60, %v3602_v1 }
 0xb32   :  { %v5467_v2 = vpop.eup %5466  ;;  %5480 = vpow2.f32 %v3645_v38  ;;  %4986 = vmatprep.mubr.bf16.mxu0 %v3196_v57 }
 0xb33   :  { %v5469_v50 = vpop.eup %5468  ;;  %v3647_v22 = vmul.f32 1.442695, %v3625_v18  ;;  %v3649_v24 = vmul.f32 1.442695, %v3626_v63  ;;  %5001 = vmatpush3.bf16.msra.mxu0 %v8473_v44 }
 0xb34   :  { %5002 = vmatprep.subr.bf16.mxu0 %v8474_v21  ;;  %v3604_v30 = vpop.xlane.xlu0 %3603  ;;  %v3606_v31 = vpop.xlane.xlu1 %3605  ;;  %v3197_v27 = vpack.c.bf16 %v5469_v50, %v5467_v2 }
 0xb35   :  { %5482 = vpow2.f32 %v3647_v22  ;;  %v3627_v49 = vsub.f32 %v7930_v53, %v3604_v30  ;;  %v3628_v41 = vsub.f32 %v7933_v33, %v3606_v31 }
 0xb36   :  { %v5471_v9 = vpop.eup %5470  ;;  %5484 = vpow2.f32 %v3649_v24  ;;  %4987 = vmatmul.mubr.bf16.gmra.mxu0 %v3197_v27 }
 0xb37   :  { %v5473_v60 = vpop.eup %5472  ;;  %v3651_v8 = vmul.f32 1.442695, %v3627_v49  ;;  %v3653_v61 = vmul.f32 1.442695, %v3628_v41  ;;  %5003 = vmatpush3.bf16.msra.mxu0 %v8474_v21 }
 0xb38   :  { %5004 = vmatprep.subr.bf16.mxu0 %v8475_v32  ;;  %v3608_v14 = vpop.xlane.xlu0 %3607  ;;  %v3610_v47 = vpop.xlane.xlu1 %3609  ;;  %v3667_v36 = vpack.c.bf16 %v5473_v60, %v5471_v9 }
 0xb39   :  { %5486 = vpow2.f32 %v3651_v8  ;;  %v3629_v12 = vsub.f32 %v7938_v28, %v3608_v14  ;;  %v3630_v53 = vsub.f32 %v7941_v34, %v3610_v47 }
 0xb3a   :  { %v5475_v6 = vpop.eup %5474  ;;  %5488 = vpow2.f32 %v3653_v61  ;;  %5006 = vmatprep.mubr.bf16.mxu0 %v3667_v36 }
 0xb3b   :  { %v5477_v33 = vpop.eup %5476  ;;  %v3655_v46 = vmul.f32 1.442695, %v3629_v12  ;;  %v3657_v48 = vmul.f32 1.442695, %v3630_v53  ;;  %5005 = vmatpush3.bf16.msra.mxu0 %v8475_v32 }
 0xb3c   :  { %v3612_v15 = vpop.xlane.xlu0 %3611  ;;  %v3614_v62 = vpop.xlane.xlu1 %3613  ;;  %v3668_v11 = vpack.c.bf16 %v5477_v33, %v5475_v6  ;;  %5042 = vmatprep.subr.bf16.mxu0 %v8476_v17 }
 0xb3d   :  { %5490 = vpow2.f32 %v3655_v46  ;;  %v3631_v52 = vsub.f32 %v7946_v25, %v3612_v15  ;;  %v3632_v28 = vsub.f32 %v7949_v45, %v3614_v62 }
 0xb3e   :  { %v5479_v58 = vpop.eup %5478  ;;  %5492 = vpow2.f32 %v3657_v48  ;;  %5007 = vmatmul.mubr.bf16.vlgmr.msra.gmra.mxu0 %v3668_v11  ;;  %v8477_v11 = vmov 17  }
 0xb3f   :  { %v5481_v34 = vpop.eup %5480  ;;  %v3659_v59 = vmul.f32 1.442695, %v3631_v52  ;;  %v3661_v29 = vmul.f32 1.442695, %v3632_v28 }
 0xb40   :  { %v3616_v37 = vpop.xlane.xlu0 %3615  ;;  %v3618_v10 = vpop.xlane.xlu1 %3617  ;;  %v3669_v35 = vpack.c.bf16 %v5481_v34, %v5479_v58 }
 0xb41   :  { %5494 = vpow2.f32 %v3659_v59  ;;  %v3633_v43 = vsub.f32 %v7954_v42, %v3616_v37  ;;  %v3634_v56 = vsub.f32 %v7957_v16, %v3618_v10 }
 0xb42   :  { %v5483_v23 = vpop.eup %5482  ;;  %5496 = vpow2.f32 %v3661_v29  ;;  %5010 = vmatprep.mubr.bf16.mxu0 %v3669_v35 }
 0xb43   :  { %v5485_v25 = vpop.eup %5484  ;;  %v3663_v39 = vmul.f32 1.442695, %v3633_v43  ;;  %v3665_v45 = vmul.f32 1.442695, %v3634_v56 }
 0xb44   :  { %v3670_v7 = vpack.c.bf16 %v5485_v25, %v5483_v23 }
 0xb45   :  { %5498 = vpow2.f32 %v3663_v39 }
 0xb46   :  { %v5487_v51 = vpop.eup %5486  ;;  %5500 = vpow2.f32 %v3665_v45  ;;  %5011 = vmatmul.mubr.bf16.gmra.mxu0 %v3670_v7 }
 0xb47   :  { %v5489_v19 = vpop.eup %5488 }
 0xb48   :  { %v3671_v54 = vpack.c.bf16 %v5489_v19, %v5487_v51 }
 0xb4a   :  { %v5491_v26 = vpop.eup %5490  ;;  %5014 = vmatprep.mubr.bf16.mxu0 %v3671_v54 }
 0xb4b   :  { %v5493_v13 = vpop.eup %5492 }
 0xb4c   :  { %v3672_v0 = vpack.c.bf16 %v5493_v13, %v5491_v26 }
 0xb4e   :  { %v5495_v42 = vpop.eup %5494  ;;  %5015 = vmatmul.mubr.bf16.gmra.mxu0 %v3672_v0 }
 0xb4f   :  { %v5497_v16 = vpop.eup %5496 }
 0xb50   :  { %v3673_v3 = vpack.c.bf16 %v5497_v16, %v5495_v42 }
 0xb52   :  { %v5499_v5 = vpop.eup %5498  ;;  %5018 = vmatprep.mubr.bf16.mxu0 %v3673_v3 }
 0xb53   :  { %v5501_v40 = vpop.eup %5500 }
 0xb54   :  { %v3674_v20 = vpack.c.bf16 %v5501_v40, %v5499_v5  ;;  %v8478_v40 = vmov 16  }
 0xb56   :  { %5019 = vmatmul.mubr.bf16.gmra.mxu0 %v3674_v20 }
 0xb57   :  { %5048 = vmatprep.mubr.msk.bf16.mxu0 %vm5689_vm2, %v8476_v17 }
 0xbde   :  { %v8011_v4 = vpop.f32.mrf.mxu0 }
 0xbe0   :  { %v8013_v38 = vpop.f32.mrf.mxu0 }
 0xbe2   :  { %v8015_v44 = vpop.f32.mrf.mxu0 }
 0xbe4   :  { %v8017_v55 = vpop.f32.mrf.mxu0 }
 0xbe6   :  { %v8019_v1 = vpop.f32.mrf.mxu0 }
 0xbe7   :  { %5502 = vrcp.f32 %v8019_v1 }
 0xbe8   :  { %v8022_v57 = vpop.f32.mrf.mxu0 }
 0xbe9   :  { %5504 = vrcp.f32 %v8022_v57 }
 0xbea   :  { %v8025_v18 = vpop.f32.mrf.mxu0 }
 0xbeb   :  { %5506 = vrcp.f32 %v8025_v18 }
 0xbec   :  { %v8027_v63 = vpop.f32.mrf.mxu0 }
 0xbed   :  { %5508 = vrcp.f32 %v8027_v63 }
 0xbee   :  { %v8030_v2 = vpop.f32.mrf.mxu0 }
 0xbf0   :  { %v8032_v50 = vpop.f32.mrf.mxu0 }
 0xbf2   :  { %v8035_v22 = vpop.f32.mrf.mxu0 }
 0xbf3   :  { %5510 = vrcp.f32 %v8035_v22 }
 0xbf4   :  { %v5503_v24 = vpop.eup %5502  ;;  %v8038_v21 = vpop.f32.mrf.mxu0  ;;  %5512 = vrcp.f32 %v8030_v2 }
 0xbf5   :  { %3391 = vperm.xlu0 %5145, %v5503_v24  }
 0xbf6   :  { %v5505_v30 = vpop.eup %5504  ;;  %v8041_v31 = vpop.f32.mrf.mxu0 }
 0xbf7   :  { %5514 = vrcp.f32 %v8041_v31  ;;  %3381 = vperm.xlu1 %5146, %v5505_v30  }
 0xbf8   :  { %v8044_v27 = vpop.f32.mrf.mxu0  ;;  %5516 = vrcp.f32 %v8032_v50  ;;  %v5507_v49 = vpop.eup %5506 }
 0xbf9   :  { %5518 = vrcp.f32 %v8011_v4 }
 0xbfa   :  { %v8047_v41 = vpop.f32.mrf.mxu0  ;;  %5520 = vrcp.f32 %v8038_v21  ;;  %v5509_v60 = vpop.eup %5508 }
 0xbfb   :  { %3396 = vperm.xlu1 %5146, %v5507_v49   ;;  %5522 = vrcp.f32 %v8044_v27 }
 0xbfc   :  { %v8050_v9 = vpop.f32.mrf.mxu0  ;;  %5524 = vrcp.f32 %v8047_v41 }
 0xbfd   :  { %5526 = vrcp.f32 %v8050_v9 }
 0xbfe   :  { %v8053_v8 = vpop.f32.mrf.mxu0 }
 0xbff   :  { %3386 = vperm.xlu1 %5146, %v5509_v60  }
 0xc00   :  { %v5511_v61 = vpop.eup %5510  ;;  %v8055_v32 = vpop.f32.mrf.mxu0 }
 0xc01   :  { %3416 = vperm.xlu0 %5145, %v5511_v61   ;;  %v5513_v14 = vpop.eup %5512 }
 0xc02   :  { %v8058_v47 = vpop.f32.mrf.mxu0 }
 0xc03   :  { %3411 = vperm.xlu1 %5146, %v5513_v14  }
 0xc04   :  { %v5515_v36 = vpop.eup %5514  ;;  %v8060_v12 = vpop.f32.mrf.mxu0 }
 0xc05   :  { %3431 = vperm.xlu0 %5145, %v5515_v36   ;;  %v5517_v53 = vpop.eup %5516 }
 0xc06   :  { %v8063_v6 = vpop.f32.mrf.mxu0  ;;  %v5519_v33 = vpop.eup %5518 }
 0xc07   :  { %3401 = vperm.xlu1 %5146, %v5517_v53   ;;  %v5521_v48 = vpop.eup %5520  ;;  %5528 = vrcp.f32 %v8063_v6 }
 0xc08   :  { %v8065_v46 = vpop.f32.mrf.mxu0  ;;  %v5523_v52 = vpop.eup %5522 }
 0xc09   :  { %3371 = vperm.xlu0 %5145, %v5519_v33   ;;  %v5525_v34 = vpop.eup %5524 }
 0xc0a   :  { %v8068_v15 = vpop.f32.mrf.mxu0  ;;  %v5527_v37 = vpop.eup %5526 }
 0xc0b   :  { %3406 = vperm.xlu1 %5146, %v5521_v48  }
 0xc0c   :  { %v8070_v62 = vpop.f32.mrf.mxu0 }
 0xc0d   :  { %5148 = vset.pattern.permute.xlu0 %v8477_v11 }
 0xc0e   :  { %v8074_v28 = vpop.f32.mrf.mxu0 }
 0xc0f   :  { %3421 = vperm.xlu1 %5146, %v5523_v52   ;;  %5530 = vrcp.f32 %v8074_v28 }
 0xc10   :  { %v8076_v58 = vpop.f32.mrf.mxu0 }
 0xc12   :  { %v8079_v59 = vpop.f32.mrf.mxu0 }
 0xc13   :  { %5532 = vrcp.f32 %v8079_v59  ;;  %3436 = vperm.xlu1 %5146, %v5525_v34  }
 0xc14   :  { %v8082_v29 = vpop.f32.mrf.mxu0  ;;  %v5529_v35 = vpop.eup %5528 }
 0xc15   :  { %5534 = vrcp.f32 %v8082_v29 }
 0xc16   :  { %5536 = vrcp.f32 %v8076_v58  ;;  %v8086_v10 = vpop.f32.mrf.mxu0 }
 0xc17   :  { %3426 = vperm.xlu1 %5146, %v5527_v37   ;;  %5538 = vrcp.f32 %v8086_v10 }
 0xc18   :  { %5540 = vrcp.f32 %v8068_v15  ;;  %v8090_v43 = vpop.f32.mrf.mxu0 }
 0xc19   :  { %5542 = vrcp.f32 %v8090_v43 }
 0xc1a   :  { %5544 = vrcp.f32 %v8065_v46  ;;  %v8095_v23 = vpop.f32.mrf.mxu0 }
 0xc1b   :  { %5147 = vset.pattern.permute.xlu1 %v8477_v11  ;;  %5546 = vrcp.f32 %v8095_v23 }
 0xc1c   :  { %3868 = vperm.xlu1 %5147, %v5529_v35   ;;  %v5531_v56 = vpop.eup %5530  ;;  %5548 = vrcp.f32 %v8058_v47  ;;  %v8099_v45 = vpop.f32.mrf.mxu0 }
 0xc1d   :  { %5550 = vrcp.f32 %v8099_v45 }
 0xc1e   :  { %5552 = vrcp.f32 %v8055_v32 }
 0xc1f   :  { %5554 = vrcp.f32 %v8070_v62 }
 0xc20   :  { %v5533_v25 = vpop.eup %5532  ;;  %3888 = vperm.xlu1 %5147, %v5531_v56   ;;  %5556 = vrcp.f32 %v8015_v44 }
 0xc21   :  { %3893 = vperm.xlu0 %5148, %v5533_v25   ;;  %5558 = vrcp.f32 %v8053_v8 }
 0xc22   :  { %v5535_v39 = vpop.eup %5534  ;;  %5560 = vrcp.f32 %v8013_v38 }
 0xc23   :  { %v5537_v7 = vpop.eup %5536  ;;  %5562 = vrcp.f32 %v8017_v55 }
 0xc24   :  { %3883 = vperm.xlu1 %5147, %v5535_v39   ;;  %v5539_v51 = vpop.eup %5538  ;;  %5564 = vrcp.f32 %v8060_v12 }
 0xc25   :  { %3878 = vperm.xlu0 %5148, %v5537_v7   ;;  %v5541_v19 = vpop.eup %5540 }
 0xc26   :  { %v5543_v54 = vpop.eup %5542 }
 0xc27   :  { %v5545_v26 = vpop.eup %5544 }
 0xc28   :  { %3908 = vperm.xlu1 %5147, %v5539_v51   ;;  %v5547_v13 = vpop.eup %5546 }
 0xc29   :  { %3873 = vperm.xlu0 %5148, %v5541_v19   ;;  %v5549_v0 = vpop.eup %5548 }
 0xc2a   :  { %v5551_v42 = vpop.eup %5550 }
 0xc2b   :  { %v5553_v16 = vpop.eup %5552 }
 0xc2c   :  { %3898 = vperm.xlu1 %5147, %v5543_v54   ;;  %v5555_v3 = vpop.eup %5554 }
 0xc2d   :  { %3858 = vperm.xlu0 %5148, %v5545_v26   ;;  %v5557_v5 = vpop.eup %5556 }
 0xc2e   :  { %v5559_v20 = vpop.eup %5558 }
 0xc2f   :  { %v5561_v24 = vpop.eup %5560 }
 0xc30   :  { %3913 = vperm.xlu1 %5147, %v5547_v13   ;;  %v5563_v30 = vpop.eup %5562 }
 0xc31   :  { %3853 = vperm.xlu0 %5148, %v5549_v0   ;;  %v5565_v49 = vpop.eup %5564 }
 0xc34   :  { %3903 = vperm.xlu1 %5147, %v5551_v42  }
 0xc35   :  { %3838 = vperm.xlu0 %5148, %v5553_v16   ;;  %v8130_v16 = vld [vmem:[%s8378_s19] ss:$0 sm:$0xff] }
 0xc38   :  { %3863 = vperm.xlu1 %5147, %v5555_v3  }
 0xc3c   :  { %5149 = vset.pattern.permute.xlu1 %v8478_v40 }
 0xc3d   :  { %3376 = vperm.xlu1 %5149, %v5557_v5  }
 0xc41   :  { %5150 = vset.pattern.permute.xlu1 %v8477_v11 }
 0xc42   :  { %3848 = vperm.xlu1 %5150, %v5559_v20  }
 0xc46   :  { %5151 = vset.pattern.permute.xlu1 %v8478_v40 }
 0xc47   :  { %3361 = vperm.xlu1 %5151, %v5561_v24  }
 0xc4b   :  { %3366 = vperm.xlu1 %5151, %v5563_v30  }
 0xc4f   :  { %5152 = vset.pattern.permute.xlu1 %v8477_v11 }
 0xc50   :  { %3843 = vperm.xlu1 %5152, %v5565_v49  }
 0xc70   :  { %v3392_v48 = vpop.permute.xlu0 %3391 }
 0xc71   :  { %v3445_v0 = vmul.f32 %v8019_v1, %v3392_v48  ;;  %v8139_v1 = vld [vmem:[%s8379_s20] ss:$0 sm:$0xff] }
 0xc72   :  { %v8113_v60 = vpop.permute.xlu1 %3381 }
 0xc76   :  { %v3397_v61 = vpop.permute.xlu1 %3396 }
 0xc7a   :  { %v8115_v14 = vpop.permute.xlu1 %3386 }
 0xc7c   :  { %v3417_v34 = vpop.permute.xlu0 %3416 }
 0xc7d   :  { %v3450_v26 = vmul.f32 %v8035_v22, %v3417_v34 }
 0xc7e   :  { %v3412_v36 = vpop.permute.xlu1 %3411 }
 0xc7f   :  { %v3449_v7 = vmul.f32 %v8030_v2, %v3412_v36 }
 0xc80   :  { %v3432_v35 = vpop.permute.xlu0 %3431 }
 0xc82   :  { %v3402_v53 = vpop.permute.xlu1 %3401 }
 0xc84   :  { %v8119_v39 = vpop.permute.xlu0 %3371 }
 0xc86   :  { %v3407_v33 = vpop.permute.xlu1 %3406 }
 0xc87   :  { %v3448_v2 = vmul.f32 %v3407_v33, %v8038_v21 }
 0xc8a   :  { %v3422_v52 = vpop.permute.xlu1 %3421 }
 0xc8e   :  { %v3437_v37 = vpop.permute.xlu1 %3436 }
 0xc92   :  { %v8117_v56 = vpop.permute.xlu1 %3426 }
 0xc97   :  { %v3869_v25 = vpop.permute.xlu1 %3868 }
 0xc98   :  { %v3922_v51 = vmul.f32 %v8063_v6, %v3869_v25 }
 0xc9a   :  { %v3938_v6 = vadd.f32 %v3922_v51, %v3445_v0 }
 0xc9b   :  { %v3889_v11 = vpop.permute.xlu1 %3888 }
 0xc9c   :  { %v3926_v19 = vmul.f32 %v8074_v28, %v3889_v11  ;;  %v3894_v54 = vpop.permute.xlu0 %3893 }
 0xc9d   :  { %v3927_v13 = vmul.f32 %v8079_v59, %v3894_v54  ;;  %v3447_v59 = vmul.f32 %v3402_v53, %v8032_v50  ;;  %v3446_v50 = vmul.f32 %v8025_v18, %v3397_v61  ;;  %v3961_v53 = vmul.f32 %v8130_v16, %v3938_v6 }
 0xc9e   :  { %v3942_v42 = vadd.f32 %v3926_v19, %v3449_v7  ;;  %v3453_v61 = vmul.f32 %v8041_v31, %v3432_v35  ;;  %v3451_v35 = vmul.f32 %v3422_v52, %v8044_v27  ;;  %v3443_v52 = vmul.f32 %v8113_v60, %v8022_v57 }
 0xc9f   :  { %v3943_v3 = vadd.f32 %v3927_v13, %v3450_v26  ;;  %v3884_v5 = vpop.permute.xlu1 %3883  ;;  %v3444_v57 = vmul.f32 %v8115_v14, %v8027_v63 }
 0xca0   :  { %v3965_v28 = vmul.f32 %v8130_v16, %v3942_v42  ;;  %v3925_v40 = vmul.f32 %v3884_v5, %v8082_v29  ;;  %v3879_v22 = vpop.permute.xlu0 %3878 }
 0xca1   :  { %v3966_v20 = vmul.f32 %v8130_v16, %v3943_v3  ;;  %v3924_v24 = vmul.f32 %v3879_v22, %v8076_v58 }
 0xca2   :  { %v8144_v30 = vadd.f32 %v8139_v1, %v3965_v28  ;;  %v3941_v21 = vadd.f32 %v3925_v40, %v3448_v2 }
 0xca3   :  { %v8147_v49 = vadd.f32 %v8139_v1, %v3966_v20  ;;  %v3940_v29 = vadd.f32 %v3924_v24, %v3447_v59  ;;  %v3909_v36 = vpop.permute.xlu1 %3908 }
 0xca4   :  { %v4039_v33 = vsel %vm311_vm3, %v8144_v30, -inf  ;;  %v3964_v48 = vmul.f32 %v8130_v16, %v3941_v21  ;;  %v3874_v34 = vpop.permute.xlu0 %3873  ;;  %v3930_v11 = vmul.f32 %v8086_v10, %v3909_v36  ;;  %v8172_v10 = vadd.f32 %v8139_v1, %v3961_v53 }
 0xca5   :  { %v4040_v58 = vsel %vm311_vm3, %v8147_v49, -inf  ;;  %v3963_v25 = vmul.f32 %v8130_v16, %v3940_v29  ;;  %v3923_v7 = vmul.f32 %v8068_v15, %v3874_v34 }
 0xca6   :  { %v8159_v51 = vmax.f32 %v4039_v33, %v4040_v58  ;;  %v8162_v18 = vadd.f32 %v8139_v1, %v3964_v48  ;;  %v3946_v42 = vadd.f32 %v3930_v11, %v3453_v61  ;;  %v4021_v22 = vsel %vm311_vm3, %v8172_v10, -inf }
 0xca7   :  { %v8166_v19 = vadd.f32 %v8139_v1, %v3963_v25  ;;  %v3939_v54 = vadd.f32 %v3923_v7, %v3446_v50  ;;  %v3899_v26 = vpop.permute.xlu1 %3898 }
 0xca8   :  { %v4031_v13 = vsel %vm311_vm3, %v8162_v18, -inf  ;;  %v3928_v0 = vmul.f32 %v3899_v26, %v8090_v43  ;;  %v3859_v31 = vpop.permute.xlu0 %3858  ;;  %v3454_v43 = vmul.f32 %v8047_v41, %v3437_v37  ;;  %v3969_v59 = vmul.f32 %v8130_v16, %v3946_v42 }
 0xca9   :  { %v4030_v15 = vsel %vm311_vm3, %v8166_v19, -inf  ;;  %v3962_v3 = vmul.f32 %v8130_v16, %v3939_v54  ;;  %v3920_v40 = vmul.f32 %v3859_v31, %v8065_v46  ;;  %v3452_v46 = vmul.f32 %v8117_v56, %v8050_v9 }
 0xcaa   :  { %v8178_v5 = vmax.f32 %v4030_v15, %v4031_v13  ;;  %v3944_v28 = vadd.f32 %v3928_v0, %v3451_v35  ;;  %v3992_v50 = vadd.f32 %v8139_v1, %v3969_v59 }
 0xcab   :  { %v8181_v2 = vadd.f32 %v8139_v1, %v3962_v3  ;;  %v3914_v6 = vpop.permute.xlu1 %3913  ;;  %v3936_v29 = vadd.f32 %v3920_v40, %v3443_v52  ;;  %v4072_v52 = vpack.c.bf16 %v8162_v18, %v8166_v19 }
 0xcac   :  { %v3931_v27 = vmul.f32 %v8095_v23, %v3914_v6  ;;  %v3967_v37 = vmul.f32 %v8130_v16, %v3944_v28  ;;  %v3854_v7 = vpop.permute.xlu0 %3853 }
 0xcad   :  { %v4022_v20 = vsel %vm311_vm3, %v8181_v2, -inf  ;;  %v3959_v9 = vmul.f32 %v8130_v16, %v3936_v29  ;;  %v3919_v0 = vmul.f32 %v8058_v47, %v3854_v7  ;;  %v4073_v47 = vpack.c.bf16 %v8147_v49, %v8144_v30 }
 0xcae   :  { %v8193_v24 = vmax.f32 %v4021_v22, %v4022_v20  ;;  %v3947_v21 = vadd.f32 %v3931_v27, %v3454_v43  ;;  %v3990_v48 = vadd.f32 %v8139_v1, %v3967_v37 }
 0xcaf   :  { %v3904_v41 = vpop.permute.xlu1 %3903  ;;  %v3982_v54 = vadd.f32 %v8139_v1, %v3959_v9 }
 0xcb0   :  { %v3929_v36 = vmul.f32 %v3904_v41, %v8099_v45  ;;  %v3970_v53 = vmul.f32 %v8130_v16, %v3947_v21  ;;  %v4057_v45 = vsel %vm311_vm3, %v3992_v50, -inf  ;;  %v4048_v61 = vsel %vm311_vm3, %v3990_v48, -inf  ;;  %v3839_v30 = vpop.permute.xlu0 %3838 }
 0xcb1   :  { %v4012_v6 = vsel %vm311_vm3, %v3982_v54, -inf  ;;  %v3916_v49 = vmul.f32 %v3839_v30, %v8055_v32 }
 0xcb2   :  { %v3945_v23 = vadd.f32 %v3929_v36, %v3452_v46  ;;  %v3993_v60 = vadd.f32 %v8139_v1, %v3970_v53 }
 0xcb3   :  { %v3864_v33 = vpop.permute.xlu1 %3863 }
 0xcb4   :  { %v3968_v56 = vmul.f32 %v8130_v16, %v3945_v23  ;;  %v3921_v34 = vmul.f32 %v3864_v33, %v8070_v62  ;;  %v4058_v58 = vsel %vm311_vm3, %v3993_v60, -inf  ;;  %v4075_v25 = vpack.c.bf16 %v3993_v60, %v3992_v50 }
 0xcb5   :  { %v8210_v11 = vmax.f32 %v4057_v45, %v4058_v58  ;;  %v4024_v60 = vrot.slane %v8193_v24, 4  ;;  %v4033_v33 = vrot.slane %v8178_v5, 4  ;;  %v4066_v58 = vld [vmem:[#allocation2] sm:$0xff] }
 0xcb6   :  { %v3991_v63 = vadd.f32 %v8139_v1, %v3968_v56  ;;  %v3937_v14 = vadd.f32 %v3921_v34, %v3444_v57  ;;  %5023 = vmatpush3.bf16.msra.mxu1 %v4075_v25 }
 0xcb7   :  { %5024 = vmatprep.subr.bf16.mxu1 %v8476_v17  ;;  %v4025_v25 = vmax.f32 %v8193_v24, %v4024_v60  ;;  %v4060_v7 = vrot.slane %v8210_v11, 4 }
 0xcb8   :  { %v4049_v26 = vsel %vm311_vm3, %v3991_v63, -inf  ;;  %v3960_v62 = vmul.f32 %v8130_v16, %v3937_v14  ;;  %v3377_v13 = vpop.permute.xlu1 %3376  ;;  %v4074_v3 = vpack.c.bf16 %v3991_v63, %v3990_v48  ;;  %v4034_v63 = vmax.f32 %v8178_v5, %v4033_v33  ;;  %v5164_v33 = vld [vmem:[%s8380_s21 + $0x8] sm:$0xff]  }
 0xcb9   :  { %v8219_v15 = vmax.f32 %v4048_v61, %v4049_v26  ;;  %v3442_v42 = vmul.f32 %v8015_v44, %v3377_v13  ;;  %v3441_v44 = vmul.f32 %v8011_v4, %v8119_v39  ;;  %v4067_v13 = vpack.c.bf16 %v4066_v58, %v4066_v58 }
 0xcba   :  { %v3983_v31 = vadd.f32 %v8139_v1, %v3960_v62  ;;  %5025 = vmatpush3.bf16.msra.mxu1 %v4074_v3  ;;  %v4061_v24 = vmax.f32 %v8210_v11, %v4060_v7  ;;  %v4035_v5 = vrot.slane %v4034_v63, 2 }
 0xcbb   :  { %v3935_v35 = vadd.f32 %v3919_v0, %v3442_v42  ;;  %5026 = vmatprep.subr.bf16.mxu1 %v8476_v17  ;;  %v4051_v56 = vrot.slane %v8219_v15, 4  ;;  %v4026_v42 = vrot.slane %v4025_v25, 2 }
 0xcbc   :  { %v4013_v43 = vsel %vm311_vm3, %v3983_v31, -inf  ;;  %v4070_v28 = vpack.c.bf16 %v3983_v31, %v3982_v54 }
 0xcbd   :  { %v4014_v40 = vmax.f32 %v4012_v6, %v4013_v43  ;;  %v3849_v22 = vpop.permute.xlu1 %3848  ;;  %v3958_v59 = vmul.f32 %v8130_v16, %v3935_v35  ;;  %v4052_v0 = vmax.f32 %v8219_v15, %v4051_v56 }
 0xcbe   :  { %v3918_v20 = vmul.f32 %v8053_v8, %v3849_v22  ;;  %5027 = vmatpush3.bf16.msra.mxu1 %v4073_v47  ;;  %v4071_v8 = vpack.c.bf16 %v8181_v2, %v8172_v10  ;;  %v4036_v22 = vmax.f32 %v4034_v63, %v4035_v5  ;;  %v5171_v63 = vld [vmem:[%s8382_s23 + $0x10] sm:$0xff]  }
 0xcbf   :  { %5028 = vmatprep.subr.bf16.mxu1 %v8476_v17  ;;  %v3981_v21 = vadd.f32 %v8139_v1, %v3958_v59  ;;  %v4015_v23 = vrot.slane %v4014_v40, 4  ;;  %v4053_v43 = vrot.slane %v4052_v0, 2 }
 0xcc0   :  { %v3934_v27 = vadd.f32 %v3918_v20, %v3441_v44 }
 0xcc1   :  { %v4004_v18 = vsel %vm311_vm3, %v3981_v21, -inf  ;;  %v4016_v34 = vmax.f32 %v4014_v40, %v4015_v23  ;;  %v4062_v40 = vrot.slane %v4061_v24, 2  ;;  %v4054_v20 = vmax.f32 %v4052_v0, %v4053_v43  ;;  %v5176_v0 = vld [vmem:[%s8384_s25 + $0x28] sm:$0xff]  }
 0xcc2   :  { %v3957_v41 = vmul.f32 %v8130_v16, %v3934_v27  ;;  %v3362_v46 = vpop.permute.xlu1 %3361  ;;  %5029 = vmatpush3.bf16.msra.mxu1 %v4072_v52 }
 0xcc3   :  { %v3439_v39 = vmul.f32 %v3362_v46, %v8013_v38  ;;  %5030 = vmatprep.subr.bf16.mxu1 %v8476_v17 }
 0xcc4   :  { %v3980_v4 = vadd.f32 %v8139_v1, %v3957_v41  ;;  %v4037_v41 = vrot.slane %v4036_v22, 1 }
 0xcc5   :  { %v3932_v36 = vadd.f32 %v3916_v49, %v3439_v39 }
 0xcc6   :  { %v4003_v19 = vsel %vm311_vm3, %v3980_v4, -inf  ;;  %v3367_v37 = vpop.permute.xlu1 %3366  ;;  %5031 = vmatpush3.bf16.msra.mxu1 %v4071_v8  ;;  %v4069_v2 = vpack.c.bf16 %v3981_v21, %v3980_v4  ;;  %v4063_v21 = vmax.f32 %v4061_v24, %v4062_v40  ;;  %v4055_v8 = vrot.slane %v4054_v20, 1  ;;  %v5179_v24 = vld [vmem:[%s8384_s25 + $0x10] sm:$0xff]   ;;  %v5181_v40 = vld [vmem:[%s8384_s25] sm:$0xff]  }
 0xcc7   :  { %v4005_v29 = vmax.f32 %v4003_v19, %v4004_v18  ;;  %5032 = vmatprep.subr.bf16.mxu1 %v8476_v17  ;;  %v3955_v38 = vmul.f32 %v8130_v16, %v3932_v36  ;;  %v3440_v53 = vmul.f32 %v3367_v37, %v8017_v55  ;;  %v4042_v55 = vrot.slane %v8159_v51, 4 }
 0xcc8   :  { %v4064_v18 = vrot.slane %v4063_v21, 1  ;;  %v4038_v37 = vmax.f32 %v4036_v22, %v4037_v41  ;;  %v4511_v22 = vld [vmem:[%s8383_s24] ss:$0 sm:$0xff] }
 0xcc9   :  { %v4006_v32 = vrot.slane %v4005_v29, 4  ;;  %v3978_v48 = vadd.f32 %v8139_v1, %v3955_v38  ;;  %v4043_v54 = vmax.f32 %v8159_v51, %v4042_v55  ;;  %v4056_v38 = vmax.f32 %v4054_v20, %v4055_v8  ;;  %v5167_v55 = vld [vmem:[%s8382_s23 + $0x30] sm:$0xff]  }
 0xcca   :  { %5033 = vmatpush3.bf16.msra.mxu1 %v4070_v28  ;;  %v4027_v28 = vmax.f32 %v4025_v25, %v4026_v42  ;;  %v5170_v25 = vld [vmem:[%s8382_s23 + $0x18] sm:$0xff]  }
 0xccb   :  { %v3844_v50 = vpop.permute.xlu1 %3843  ;;  %5034 = vmatprep.subr.bf16.mxu1 %v8476_v17  ;;  %v3994_v14 = vsel %vm311_vm3, %v3978_v48, -inf  ;;  %v4044_v31 = vrot.slane %v4043_v54, 2  ;;  %v5178_v42 = vld [vmem:[%s8384_s25 + $0x18] sm:$0xff]  }
 0xccc   :  { %v3917_v10 = vmul.f32 %v3844_v50, %v8060_v12  ;;  %v4007_v12 = vmax.f32 %v4005_v29, %v4006_v32  ;;  %v4028_v27 = vrot.slane %v4027_v28, 1 }
 0xccd   :  { %v4045_v47 = vmax.f32 %v4043_v54, %v4044_v31  ;;  %v5172_v54 = vld [vmem:[%s8382_s23 + $0x8] sm:$0xff]  }
 0xcce   :  { %v3933_v57 = vadd.f32 %v3917_v10, %v3440_v53  ;;  %5035 = vmatpush3.bf16.msra.mxu1 %v4069_v2  ;;  %v4008_v26 = vrot.slane %v4007_v12, 2  ;;  %v4029_v49 = vmax.f32 %v4027_v28, %v4028_v27  ;;  %v4065_v10 = vmax.f32 %v4063_v21, %v4064_v18  ;;  %v4520_v21 = vld [vmem:[%s8385_s26] ss:$0 sm:$0xff] }
 0xccf   :  { %5036 = vmatprep.subr.bf16.mxu1 %v8476_v17  ;;  %v4046_v4 = vrot.slane %v4045_v47, 1 }
 0xcd0   :  { %v3956_v9 = vmul.f32 %v8130_v16, %v3933_v57  ;;  %v4009_v35 = vmax.f32 %v4007_v12, %v4008_v26  ;;  %v5163_v57 = vld [vmem:[%s8380_s21 + $0x10] ss:$0 sps:$4 sm:$0xff]   ;;  %v5168_v12 = vld [vmem:[%s8382_s23 + $0x28] sm:$0xff]   ;;  %v5173_v26 = vld [vmem:[%s8382_s23] sm:$0xff]  }
 0xcd1   :  { %v4047_v36 = vmax.f32 %v4045_v47, %v4046_v4  ;;  %v4177_v60 = vsel %vm173_vm0, %v5163_v57, 0 }
 0xcd2   :  { %v3979_v45 = vadd.f32 %v8139_v1, %v3956_v9  ;;  %v4017_v1 = vrot.slane %v4016_v34, 2  ;;  %v4010_v44 = vrot.slane %v4009_v35, 1  ;;  %5043 = vmatpush3.bf16.msra.mxu0 %v4177_v60  ;;  %v5166_v9 = vld [vmem:[%s8382_s23 + $0x38] sm:$0xff]  }
 0xcd3   :  { %5044 = vmatprep.subr.bf16.mxu0 %v8476_v17 }
 0xcd4   :  { %v3995_v16 = vsel %vm311_vm3, %v3979_v45, -inf  ;;  %v4068_v61 = vpack.c.bf16 %v3979_v45, %v3978_v48  ;;  %v4018_v51 = vmax.f32 %v4016_v34, %v4017_v1  ;;  %v4011_v46 = vmax.f32 %v4009_v35, %v4010_v44  ;;  %v5165_v48 = vld [vmem:[%s8380_s21] sm:$0xff]   ;;  %s5693_s21 = smov 20  }
 0xcd5   :  { %v3996_v62 = vmax.f32 %v3994_v14, %v3995_v16  ;;  %v5169_v34 = vld [vmem:[%s8382_s23 + $0x20] sm:$0xff]  }
 0xcd6   :  { %5037 = vmatpush3.bf16.msra.mxu1 %v4068_v61  ;;  %v4019_v59 = vrot.slane %v4018_v51, 1  ;;  %5045 = vmatpush3.bf16.msra.mxu0 %v5164_v33  ;;  %v5177_v1 = vld [vmem:[%s8384_s25 + $0x20] sm:$0xff]  }
 0xcd7   :  { %v3997_v3 = vrot.slane %v3996_v62, 4  ;;  %5052 = vmatprep.subr.bf16.mxu1 %v8476_v17  ;;  %5046 = vmatprep.subr.bf16.mxu0 %v8476_v17 }
 0xcd8   :  { %v4020_v39 = vmax.f32 %v4018_v51, %v4019_v59 }
 0xcd9   :  { %v3998_v6 = vmax.f32 %v3996_v62, %v3997_v3  ;;  %5039 = vmatmul.mubr.bf16.vlgmr.msra.gmra.mxu1 %v4067_v13  ;;  %v5174_v62 = vld [vmem:[%s8384_s25 + $0x38] sm:$0xff]   ;;  %v5175_v13 = vld [vmem:[%s8384_s25 + $0x30] sm:$0xff]   ;;  %v4506_v3 = vld [vmem:[%s8381_s22] ss:$0 sm:$0xff] }
 0xcda   :  { %5068 = vmatprep.mubr.msk.bf16.mxu1 %vm5689_vm2, %v8476_v17  ;;  %5047 = vmatpush3.bf16.msra.mxu0 %v5165_v48 }
 0xcdb   :  { %v3999_v15 = vrot.slane %v3998_v6, 2  ;;  %5072 = vmatprep.subr.bf16.mxu0 %v8476_v17  ;;  %5053 = vmatpush3.bf16.msra.mxu1 %v5166_v9 }
 0xcdc   :  { %5054 = vmatprep.subr.bf16.mxu1 %v8476_v17 }
 0xcdd   :  { %v4000_v11 = vmax.f32 %v3998_v6, %v3999_v15  ;;  %v5180_v15 = vld [vmem:[%s8384_s25 + $0x8] sm:$0xff]   ;;  %s5694_s25 = smov [#allocation8]  }
 0xcde   :  { %s4453_s9 = sshll.u32 %s5694_s25, 4  ;;  %s4454_s9 = int_to_ptr.vmem [resolvable:$true] %s4453_s9 }
 0xcdf   :  { %v4001_v52 = vrot.slane %v4000_v11, 1  ;;  %5055 = vmatpush3.bf16.msra.mxu1 %v5167_v55  ;;  %s5658_s24 = scalar_lea.vmem %s4454_s9, 128  ;;  %p5663_p2 = scmp.lt.s32.totalorder %s4454_s9, %s4454_s9 }
 0xce0   :  { %5056 = vmatprep.subr.bf16.mxu1 %v8476_v17  ;;  %p5659_p1 = scmp.ne.s32.totalorder %s4454_s9, %s5658_s24  ;;  %p5664_p3 = scmp.lt.s32.totalorder %s5658_s24, %s5658_s24 }
 0xce1   :  { %v4002_v30 = vmax.f32 %v4000_v11, %v4001_v52 }
 0xce2   :  { %p5665_p4 = por %p5664_p3, %p5663_p2 }
 0xce3   :  { %v4125_v19 = vsel %vm4124_vm5, %v4011_v46, %v4002_v30  ;;  %5057 = vmatpush3.bf16.msra.mxu1 %v5168_v12 }
 0xce4   :  { %v4127_v29 = vsel %vm4126_vm6, %v4020_v39, %v4125_v19  ;;  %5058 = vmatprep.subr.bf16.mxu1 %v8476_v17  ;;  %p5666_p5 = pnand %p5665_p4, %p5659_p1 }
 0xce5   :  { %v4129_v50 = vsel %vm4128_vm7, %v4029_v49, %v4127_v29 }
 0xce6   :  { %v4131_v53 = vsel %vm4130_vm8, %v4038_v37, %v4129_v50 }
 0xce7   :  { %v4133_v32 = vsel %vm4132_vm9, %v4047_v36, %v4131_v53  ;;  %5059 = vmatpush3.bf16.msra.mxu1 %v5169_v34 }
 0xce8   :  { %v4135_v2 = vsel %vm4134_vm10, %v4056_v38, %v4133_v32  ;;  %5060 = vmatprep.subr.bf16.mxu1 %v8476_v17 }
 0xce9   :  { %v4137_v23 = vsel %vm4136_vm11, %v4065_v10, %v4135_v2 }
 0xceb   :  { %5061 = vmatpush3.bf16.msra.mxu1 %v5170_v25 }
 0xcec   :  { %5062 = vmatprep.subr.bf16.mxu1 %v8476_v17 }
 0xcef   :  { %5063 = vmatpush3.bf16.msra.mxu1 %v5171_v63 }
 0xcf0   :  { %5064 = vmatprep.subr.bf16.mxu1 %v8476_v17 }
 0xcf3   :  { %5065 = vmatpush3.bf16.msra.mxu1 %v5172_v54 }
 0xcf4   :  { %5066 = vmatprep.subr.bf16.mxu1 %v8476_v17 }
 0xcf7   :  { %5067 = vmatpush3.bf16.msra.mxu1 %v5173_v26 }
 0xd99   :  { %v4110_v56 = vpop.f32.mrf.mxu1 }
 0xd9a   :  { %4140 = vrot.lane.b32.xlu0 %v4110_v56, %s5693_s21 }
 0xd9b   :  { %v5040_v45 = vpop.f32.mrf.mxu1 }
 0xd9d   :  { %v4113_v58 = vpop.f32.mrf.mxu1 }
 0xd9f   :  { %v5041_v7 = vpop.f32.mrf.mxu1 }
 0xe0c   :  { %v4141_v14 = vpop.permute.xlu0 %4140 }
 0xe0d   :  { %v4143_v16 = vsel %vm311_vm3, %v4137_v23, %v4141_v14 }
 0xe0e   :  { %v4144_v61 = vpack.c.bf16 %v4143_v16, %v4143_v16 }
 0xe10   :  { %5049 = vmatmul.mubr.msk.bf16.vlgmr.msra.gmra.mxu0 %vm4172_vm12, %v4144_v61 }
 0xe11   :  { %5088 = vmatprep.mubr.msk.bf16.mxu0 %vm5689_vm2, %v8476_v17  ;;  %5073 = vmatpush3.bf16.msra.mxu0 %v5174_v62 }
 0xe12   :  { %5074 = vmatprep.subr.bf16.mxu0 %v8476_v17 }
 0xe15   :  { %5075 = vmatpush3.bf16.msra.mxu0 %v5175_v13 }
 0xe16   :  { %5076 = vmatprep.subr.bf16.mxu0 %v8476_v17 }
 0xe19   :  { %5077 = vmatpush3.bf16.msra.mxu0 %v5176_v0 }
 0xe1a   :  { %5078 = vmatprep.subr.bf16.mxu0 %v8476_v17 }
 0xe1d   :  { %5079 = vmatpush3.bf16.msra.mxu0 %v5177_v1 }
 0xe1e   :  { %5080 = vmatprep.subr.bf16.mxu0 %v8476_v17 }
 0xe21   :  { %5081 = vmatpush3.bf16.msra.mxu0 %v5178_v42 }
 0xe22   :  { %5082 = vmatprep.subr.bf16.mxu0 %v8476_v17 }
 0xe25   :  { %5083 = vmatpush3.bf16.msra.mxu0 %v5179_v24 }
 0xe26   :  { %5084 = vmatprep.subr.bf16.mxu0 %v8476_v17 }
 0xe29   :  { %5085 = vmatpush3.bf16.msra.mxu0 %v5180_v15 }
 0xe2a   :  { %5086 = vmatprep.subr.bf16.mxu0 %v8476_v17 }
 0xe2d   :  { %5087 = vmatpush3.bf16.msra.mxu0 %v5181_v40 }
 0xed0   :  { %v4213_v5 = vpop.f32.mrf.mxu0 }
 0xed1   :  { %v4214_v31 = vadd.f32 %v4506_v3, %v4213_v5 }
 0xed2   :  { %v5050_v35 = vpop.f32.mrf.mxu0 }
 0xed3   :  { %v4219_v6 = vmax.f32 %v4214_v31, 0.0 }
 0xed4   :  { %v4216_v43 = vpop.f32.mrf.mxu0 }
 0xed5   :  { %v4220_v51 = vpack.c.bf16 %v4219_v6, %v4219_v6 }
 0xed6   :  { %v5051_v28 = vpop.f32.mrf.mxu0 }
 0xed7   :  { %5069 = vmatmul.mubr.bf16.vlgmr.msra.gmra.mxu1 %v4220_v51 }
 0xf97   :  { %v4326_v47 = vpop.f32.mrf.mxu1 }
 0xf98   :  { %v4327_v44 = vadd.f32 %v4511_v22, %v4326_v47 }
 0xf99   :  { %v5070_v11 = vpop.f32.mrf.mxu1 }
 0xf9a   :  { %v4332_v59 = vmax.f32 %v4327_v44, 0.0 }
 0xf9b   :  { %v4329_v20 = vpop.f32.mrf.mxu1 }
 0xf9c   :  { %v4333_v27 = vpack.c.bf16 %v4332_v59, %v4332_v59 }
 0xf9d   :  { %v5071_v52 = vpop.f32.mrf.mxu1 }
 0xf9e   :  { %5089 = vmatmul.mubr.bf16.vlgmr.msra.gmra.mxu0 %v4333_v27 }
0x105e   :  { %v4439_v17 = vpop.f32.mrf.mxu0 }
0x105f   :  { %v4440_v41 = vadd.f32 %v4520_v21, %v4439_v17 }
0x1060   :  { %v5090_v46 = vpop.f32.mrf.mxu0 }
0x1061   :  { %4446 = vst.msk [vmem:[#allocation8] sm:$0xff] %vm4445_vm13, %v4440_v41 }
0x1062   :  { %v4442_v30 = vpop.f32.mrf.mxu0 }
0x1063   :  { %5669 = shalt.err (!%p5666_p5)
}
0x1064   :  { %4456 = dma.vmem_to_hbm [thread:$0]  %s4454_s9, 128, %s8386_s27, [#allocation4]   ;;  %v5091_v4 = vpop.f32.mrf.mxu0 }
0x1065   :  { %5682 = dma.done.wait [#allocation4], 128  }
0x1066   :  { %5683 = vsyncadd [#allocation4], 4294967168 }
0x1067   :  { %4460 = vsyncpa [#allocation3], 1 }
0x1068   :  { %4461 = vsyncpa [#allocation6], 1 }
0x1069   :  { %4462 = vsyncpa [#allocation4], 1 }

</bundles_post_ra>
